<compile_context>
chip_gen: v6e
topology: v6e:2x2x1
jax: 0.10.0
libtpu: 0.0.40
codegen_flags: <defaults>
</compile_context>

<pallas_src>
import functools

import jax
import jax.numpy as jnp
from jax import lax
from jax.experimental import pallas as pl
from jax.experimental.pallas import tpu as pltpu

# ----------------------------- scaled-down sizes -----------------------------
H = 64            # mlp_hidden (original 512)
P = 49            # 7 * 7 spatial positions of the vgg feature map
PP = 56           # P padded to a multiple of 8 (aligned per-batch blocks)
R = 6             # number of roles (hard-coded by .view(-1, 6, mlp_hidden*50))
RP = 8            # R padded to a multiple of 8
B = 2             # batch size
NV = 32           # number of verbs (output of last_class)
HID = 8 * H       # classifier hidden = mlp_hidden * 8
JOINT = H * (P + 1)   # = mlp_hidden * 50
EPS = 1e-5            # BatchNorm eps

BPAD = 8          # batch rows padded to a full sublane group
NVP = 128         # verb logits padded to a full lane group
VJ = P * H        # 3136: flattened (position-major) image part of the joint vec
TK = 1664         # K tile of the big classifier Linear (w1); multiple of 128
KT = 2            # grid steps (>= 2 so the 2nd w1 block hides behind step-0 work)
VJP = TK * KT     # 3328: VJ padded to KT full K tiles


# ------------------------------- fused kernel --------------------------------
def _fused_kernel(v2d_ref, q2d_ref, vflat_ref, expand_ref,
                  wv_ref, bv_ref, wq_ref, bq_ref, wl_ref,
                  w1v_ref, w1q_ref, s1_ref, t1_ref,
                  w2_ref, s2_ref, t2_ref,
                  w3_ref, b3_ref,
                  out_ref,
                  att_scr, qsum_scr, acc_scr):
    k = pl.program_id(0)

    # --- step 0: attention -> summed attention / summed query ----------------
    @pl.when(k == 0)
    def _init():
        acc_scr[...] = jnp.zeros_like(acc_scr)
        att_scr[...] = jnp.zeros_like(att_scr)
        qsum_scr[...] = jnp.zeros_like(qsum_scr)

        q_all = q2d_ref[...]                                            # [B*RP, H]
        # batched projections over all rows (single wv / wq weight push each)
        vproj = jnp.maximum(
            jnp.dot(v2d_ref[...], wv_ref[...],
                    preferred_element_type=jnp.float32) + bv_ref[...], 0.0)   # [B*PP, H]
        qproj = jnp.maximum(
            jnp.dot(q_all, wq_ref[...],
                    preferred_element_type=jnp.float32) + bq_ref[...], 0.0)   # [B*RP, H]
        ql = qproj * wl_ref[...]

        for b in range(B):                     # B is a small static constant
            vb = vproj[b * PP:b * PP + P, :]   # [P, H]  (sublane-aligned start)
            qb = ql[b * RP:b * RP + R, :]      # [R, H]
            # logits[r, p] = sum_h (qproj*wl)[r,h] * vproj[p,h]; the attention
            # linear bias is constant over positions -> softmax-invariant.
            logits = lax.dot_general(qb, vb,
                                     dimension_numbers=(((1,), (1,)), ((), ())),
                                     preferred_element_type=jnp.float32)      # [R, P]
            logits = logits - jnp.max(logits, axis=-1, keepdims=True)
            e = jnp.exp(logits)
            att = e * pl.reciprocal(jnp.sum(e, axis=-1, keepdims=True),
                                    approx=True)                              # softmax over P
            # sum_r (att_r * v) = (sum_r att_r) * v   and   sum_r q_r
            att_scr[pl.ds(b, 1), :] = jnp.sum(att, axis=0, keepdims=True)     # [1, P]
            # padded query rows are zero, so summing the full RP block is exact
            qsum_scr[pl.ds(b, 1), :] = jnp.sum(q_all[b * RP:(b + 1) * RP, :],
                                               axis=0, keepdims=True)         # [1, H]

    # --- every step: build this K-block of the joint vector and accumulate ---
    #   jv[b, p*H + h] = att_sum[b, p] * v[b, p, h]   (expand = 0/1 mask, prebuilt)
    att_rep = jnp.dot(att_scr[...], expand_ref[...],
                      preferred_element_type=jnp.float32)                      # [BPAD, TK]
    jv_blk = (att_rep * vflat_ref[...]).astype(jnp.bfloat16)                   # [BPAD, TK]
    acc_scr[...] += jnp.dot(jv_blk, w1v_ref[...],
                            preferred_element_type=jnp.float32)                # [BPAD, HID]

    # --- last step: finish layer 1, run layer 2 and last_class ---------------
    @pl.when(k == KT - 1)
    def _finish():
        accq = jnp.dot(qsum_scr[...].astype(jnp.bfloat16), w1q_ref[...],
                       preferred_element_type=jnp.float32)
        # Linear -> BN(eval, bias folded into t1) -> ReLU -> [Dropout=id]
        h = jnp.maximum((acc_scr[...] + accq) * s1_ref[...] + t1_ref[...], 0.0)
        # Linear -> BN (bias folded into t2) -> ReLU -> [Dropout=id]
        h = jnp.dot(h.astype(jnp.bfloat16), w2_ref[...],
                    preferred_element_type=jnp.float32)
        h = jnp.maximum(h * s2_ref[...] + t2_ref[...], 0.0)
        # last_class Linear (output padded to 128 lanes, sliced outside)
        out_ref[...] = jnp.dot(h.astype(jnp.bfloat16), w3_ref[...],
                               preferred_element_type=jnp.float32) + b3_ref[...]


# --------------------------------- wrapper -----------------------------------
def _const_spec(shape):
    zero = (0,) * len(shape)

    def imap(k, _z=zero):
        return _z

    return pl.BlockSpec(shape, imap)


@jax.jit
def base_model_forward(img_feat_nchw, pred_rep, kp):
    """img_feat_nchw: [B, H, 7, 7]  (stand-in for self.conv(img))
       pred_rep     : [B*6, H]      (stand-in for role_module output)
       kp           : kernel-ready params (prepare_kernel_params)
       returns      : [B, NV] verb logits
    """
    bsz = img_feat_nchw.shape[0]
    assert bsz == B

    # img_embd.view(B, C, -1).permute(0, 2, 1)  ->  [B, 49, H]  (input layout glue)
    v = img_feat_nchw.reshape(bsz, H, P).transpose(0, 2, 1)               # [B, P, H]
    # per-batch blocks padded to 56 / 8 rows so in-kernel slices are aligned
    v2d = jnp.pad(v, ((0, 0), (0, PP - P), (0, 0))).reshape(bsz * PP, H)  # [B*PP, H]
    q3 = pred_rep.reshape(bsz, R, H)
    q2d = jnp.pad(q3, ((0, 0), (0, RP - R), (0, 0))).reshape(bsz * RP, H)  # [B*RP, H]
    # position-major flatten of v, padded to (BPAD, VJP)
    vflat = jnp.pad(v.reshape(bsz, VJ), ((0, BPAD - bsz), (0, VJP - VJ)))

    in_specs = [
        _const_spec((B * PP, H)),      # v2d (padded per-batch position blocks)
        _const_spec((B * RP, H)),      # q2d (padded per-batch role blocks)
        pl.BlockSpec((BPAD, TK), lambda k: (0, k)),   # vflat: K-blocked
        pl.BlockSpec((P, TK), lambda k: (0, k)),      # expand mask: K-blocked
        _const_spec((H, H)),           # wv
        _const_spec((1, H)),           # bv
        _const_spec((H, H)),           # wq
        _const_spec((1, H)),           # bq
        _const_spec((1, H)),           # wl
        pl.BlockSpec((TK, HID), lambda k: (k, 0)),    # w1v: K-blocked, bf16
        _const_spec((H, HID)),         # w1q (bf16)
        _const_spec((1, HID)),         # s1 (folded BN scale)
        _const_spec((1, HID)),         # t1 (folded BN shift, b1 folded in)
        _const_spec((HID, HID)),       # w2 (bf16)
        _const_spec((1, HID)),         # s2
        _const_spec((1, HID)),         # t2 (b2 folded in)
        _const_spec((HID, NVP)),       # w3 (bf16, N-padded to 128)
        _const_spec((1, NVP)),         # b3 (N-padded)
    ]

    out = pl.pallas_call(
        _fused_kernel,
        grid=(KT,),
        in_specs=in_specs,
        out_specs=pl.BlockSpec((BPAD, NVP), lambda k: (0, 0)),
        out_shape=jax.ShapeDtypeStruct((BPAD, NVP), jnp.float32),
        scratch_shapes=[
            pltpu.VMEM((BPAD, P), jnp.float32),      # summed attention per position
            pltpu.VMEM((BPAD, H), jnp.float32),      # summed query per batch
            pltpu.VMEM((BPAD, HID), jnp.float32),    # layer-1 accumulator
        ],
        compiler_params=pltpu.CompilerParams(
            # single reduction axis over the w1 K-blocks
            dimension_semantics=("arbitrary",)),
    )(v2d, q2d, vflat, kp["expand"],
      kp["wv"], kp["bv"], kp["wq"], kp["bq"], kp["wl"],
      kp["w1v"], kp["w1q"], kp["s1"], kp["t1"],
      kp["w2"], kp["s2"], kp["t2"], kp["w3"], kp["b3"])

    return out[:bsz, :NV]


def prepare_kernel_params(params):
    """One-time (outside the jit hot path) parameter preparation:
       - fold BatchNorm1d (eval) AND the preceding Linear biases into scale/shift,
       - permute w1's image rows from torch channel-major (h*P+p) to the
         kernel's position-major (p*H+h) layout, zero-pad to VJP rows,
       - precompute the (P, VJP) position->lane expansion mask,
       - pad w3/b3 to a lane-dense 128-wide output,
       - store the classifier weights in bf16."""
    s1 = params["bn1_gamma"] / jnp.sqrt(params["bn1_var"] + EPS)
    t1 = params["bn1_beta"] - params["bn1_mean"] * s1 + params["b1"].reshape(-1) * s1
    s2 = params["bn2_gamma"] / jnp.sqrt(params["bn2_var"] + EPS)
    t2 = params["bn2_beta"] - params["bn2_mean"] * s2 + params["b2"].reshape(-1) * s2

    w1 = params["w1"]                                   # [JOINT, HID], torch row = h*P + p
    w1v = w1[:VJ].reshape(H, P, HID).transpose(1, 0, 2).reshape(VJ, HID)   # row = p*H + h
    w1v = jnp.pad(w1v, ((0, VJP - VJ), (0, 0))).astype(jnp.bfloat16)
    w1q = w1[VJ:].astype(jnp.bfloat16)

    # expand[p, j] = 1  iff  j in [p*H, p*H + H)   (broadcasts att over H lanes)
    rows = jnp.arange(P)[:, None]
    cols = jnp.arange(VJP)[None, :]
    expand = ((cols >= rows * H) & (cols < rows * H + H)).astype(jnp.float32)

    return dict(
        wv=params["wv"], bv=params["bv"], wq=params["wq"], bq=params["bq"], wl=params["wl"],
        w1v=w1v, w1q=w1q,
        s1=s1[None], t1=t1[None], s2=s2[None], t2=t2[None],
        w2=params["w2"].astype(jnp.bfloat16),
        w3=jnp.pad(params["w3"], ((0, 0), (0, NVP - NV))).astype(jnp.bfloat16),
        b3=jnp.pad(params["b3"], ((0, 0), (0, NVP - NV))),
        expand=expand,
    )


# ------------------------------ pure-JAX reference ---------------------------
def reference_forward(img_feat_nchw, pred_rep, params):
    """Mirror of the PyTorch forward. The classifier matmuls use bf16 operands
    (f32 accumulate) — the same storage / MXU dtype the kernel uses."""
    bsz = img_feat_nchw.shape[0]
    v = img_feat_nchw.reshape(bsz, H, P).transpose(0, 2, 1)                   # [B, P, H]
    v6 = jnp.broadcast_to(v[:, None], (bsz, R, P, H)).reshape(bsz * R, P, H)  # expand to 6 roles
    q = pred_rep                                                              # [B*6, H]

    vproj = jax.nn.relu(v6 @ params["wv"] + params["bv"])
    qproj = jax.nn.relu(q @ params["wq"] + params["bq"])
    logits = jnp.sum(vproj * qproj[:, None, :] * params["wl"], axis=-1)       # [B*6, P]
    att = jax.nn.softmax(logits, axis=1)[..., None]                           # softmax over positions
    v_emb = att * v6                                                          # [B*6, P, H]
    v_emb = jnp.transpose(v_emb, (0, 2, 1)).reshape(bsz * R, H * P)           # torch channel-major flatten
    vq = jnp.concatenate([v_emb, q], axis=-1)                                 # [B*6, H*50]
    joint = jnp.sum(vq.reshape(bsz, R, JOINT), axis=1)                        # [B, H*50]

    s1 = params["bn1_gamma"] / jnp.sqrt(params["bn1_var"] + EPS)
    t1 = params["bn1_beta"] - params["bn1_mean"] * s1
    s2 = params["bn2_gamma"] / jnp.sqrt(params["bn2_var"] + EPS)
    t2 = params["bn2_beta"] - params["bn2_mean"] * s2

    bf = jnp.bfloat16
    dot = functools.partial(jnp.dot, preferred_element_type=jnp.float32)
    h = dot(joint.astype(bf), params["w1"].astype(bf)) + params["b1"]
    h = jax.nn.relu(h * s1 + t1)
    h = dot(h.astype(bf), params["w2"].astype(bf)) + params["b2"]
    h = jax.nn.relu(h * s2 + t2)
    return dot(h.astype(bf), params["w3"].astype(bf)) + params["b3"]


# ---------------------------- deterministic params ---------------------------
def init_params(key):
    ks = jax.random.split(key, 16)
    n = lambda k, shape, scale: (scale * jax.random.normal(k, shape)).astype(jnp.float32)
    return {
        # NewAttention
        "wv": n(ks[0], (H, H), 0.05), "bv": n(ks[1], (1, H), 0.05),
        "wq": n(ks[2], (H, H), 0.05), "bq": n(ks[3], (1, H), 0.05),
        "wl": n(ks[4], (1, H), 0.05),
        # classifier Sequential
        "w1": n(ks[5], (JOINT, HID), 0.02), "b1": n(ks[6], (1, HID), 0.02),
        "bn1_gamma": 1.0 + n(ks[7], (HID,), 0.05),
        "bn1_beta": n(ks[8], (HID,), 0.05),
        "bn1_mean": n(ks[9], (HID,), 0.05),
        "bn1_var": 1.0 + jnp.abs(n(ks[10], (HID,), 0.05)),
        "w2": n(ks[11], (HID, HID), 0.02), "b2": n(ks[12], (1, HID), 0.02),
        "bn2_gamma": 1.0 + n(ks[13], (HID,), 0.05),
        "bn2_beta": n(ks[14], (HID,), 0.05),
        "bn2_mean": jnp.zeros((HID,), jnp.float32),
        "bn2_var": jnp.ones((HID,), jnp.float32),
        # last_class (final Linear of the vgg classifier in verb_module)
        "w3": n(ks[15], (HID, NV), 0.02),
        "b3": jnp.zeros((1, NV), jnp.float32),
    }


# ----------------------------------- main ------------------------------------
if __name__ == "__main__":
    key = jax.random.PRNGKey(0)
    k_feat, k_rep, k_par = jax.random.split(key, 3)

    # Stand-ins for external pretrained submodule outputs (see TODO(synk) above).
    img_feat = jax.random.normal(k_feat, (B, H, 7, 7), dtype=jnp.float32)   # ~ vgg16(img)
    pred_rep = jax.random.normal(k_rep, (B * R, H), dtype=jnp.float32)      # ~ role_module(img, verbs)
    params = init_params(k_par)
    kparams = prepare_kernel_params(params)   # one-time, outside the jit hot path

    out = base_model_forward(img_feat, pred_rep, kparams)
    out = jax.block_until_ready(out)

    ref = reference_forward(img_feat, pred_rep, params)
    assert out.shape == (B, NV)
    # tolerance accounts for bf16-stored classifier weights/activations
    assert jnp.allclose(out, ref, rtol=5e-3, atol=5e-3), "Pallas output mismatch vs JAX reference"

    print("KERNEL_OK")
</pallas_src>

<mosaic_0001>
module attributes {stable_mosaic.version = 11 : i64} {
  func.func @_fused_kernel(%arg0: i32, %arg1: memref<112x64xf32, #tpu.memory_space<vmem>>, %arg2: memref<16x64xf32, #tpu.memory_space<vmem>>, %arg3: memref<8x1664xf32, #tpu.memory_space<vmem>>, %arg4: memref<49x1664xf32, #tpu.memory_space<vmem>>, %arg5: memref<64x64xf32, #tpu.memory_space<vmem>>, %arg6: memref<1x64xf32, #tpu.memory_space<vmem>>, %arg7: memref<64x64xf32, #tpu.memory_space<vmem>>, %arg8: memref<1x64xf32, #tpu.memory_space<vmem>>, %arg9: memref<1x64xf32, #tpu.memory_space<vmem>>, %arg10: memref<1664x512xbf16, #tpu.memory_space<vmem>>, %arg11: memref<64x512xbf16, #tpu.memory_space<vmem>>, %arg12: memref<1x512xf32, #tpu.memory_space<vmem>>, %arg13: memref<1x512xf32, #tpu.memory_space<vmem>>, %arg14: memref<512x512xbf16, #tpu.memory_space<vmem>>, %arg15: memref<1x512xf32, #tpu.memory_space<vmem>>, %arg16: memref<1x512xf32, #tpu.memory_space<vmem>>, %arg17: memref<512x128xbf16, #tpu.memory_space<vmem>>, %arg18: memref<1x128xf32, #tpu.memory_space<vmem>>, %arg19: memref<8x128xf32, #tpu.memory_space<vmem>>, %arg20: memref<8x49xf32, #tpu.memory_space<vmem>>, %arg21: memref<8x64xf32, #tpu.memory_space<vmem>>, %arg22: memref<8x512xf32, #tpu.memory_space<vmem>>) attributes {dimension_semantics = [#tpu.dimension_semantics<arbitrary>], iteration_bounds = array<i64: 2>, scalar_prefetch = 0 : i64, scratch_operands = 3 : i64, tpu.core_type = #tpu.core_type<tc>, window_params = [{pipeline_mode = #tpu.pipeline_mode<synchronous>, transform_indices = @transform_0, window_bounds = array<i64: 112, 64>}, {pipeline_mode = #tpu.pipeline_mode<synchronous>, transform_indices = @transform_1, window_bounds = array<i64: 16, 64>}, {transform_indices = @transform_2, window_bounds = array<i64: 8, 1664>}, {transform_indices = @transform_3, window_bounds = array<i64: 49, 1664>}, {pipeline_mode = #tpu.pipeline_mode<synchronous>, transform_indices = @transform_4, window_bounds = array<i64: 64, 64>}, {pipeline_mode = #tpu.pipeline_mode<synchronous>, transform_indices = @transform_5, window_bounds = array<i64: 1, 64>}, {pipeline_mode = #tpu.pipeline_mode<synchronous>, transform_indices = @transform_6, window_bounds = array<i64: 64, 64>}, {pipeline_mode = #tpu.pipeline_mode<synchronous>, transform_indices = @transform_7, window_bounds = array<i64: 1, 64>}, {pipeline_mode = #tpu.pipeline_mode<synchronous>, transform_indices = @transform_8, window_bounds = array<i64: 1, 64>}, {transform_indices = @transform_9, window_bounds = array<i64: 1664, 512>}, {pipeline_mode = #tpu.pipeline_mode<synchronous>, transform_indices = @transform_10, window_bounds = array<i64: 64, 512>}, {pipeline_mode = #tpu.pipeline_mode<synchronous>, transform_indices = @transform_11, window_bounds = array<i64: 1, 512>}, {pipeline_mode = #tpu.pipeline_mode<synchronous>, transform_indices = @transform_12, window_bounds = array<i64: 1, 512>}, {pipeline_mode = #tpu.pipeline_mode<synchronous>, transform_indices = @transform_13, window_bounds = array<i64: 512, 512>}, {pipeline_mode = #tpu.pipeline_mode<synchronous>, transform_indices = @transform_14, window_bounds = array<i64: 1, 512>}, {pipeline_mode = #tpu.pipeline_mode<synchronous>, transform_indices = @transform_15, window_bounds = array<i64: 1, 512>}, {pipeline_mode = #tpu.pipeline_mode<synchronous>, transform_indices = @transform_16, window_bounds = array<i64: 512, 128>}, {pipeline_mode = #tpu.pipeline_mode<synchronous>, transform_indices = @transform_17, window_bounds = array<i64: 1, 128>}, {pipeline_mode = #tpu.pipeline_mode<synchronous>, transform_indices = @transform_18, window_bounds = array<i64: 8, 128>}]} {
    %c0_i32 = arith.constant 0 : i32
    %0 = arith.cmpi eq, %arg0, %c0_i32 : i32
    %1 = arith.extui %0 : i1 to i32
    %c0_i32_0 = arith.constant 0 : i32
    %2 = arith.cmpi ne, %1, %c0_i32_0 : i32
    scf.if %2 {
      %cst_14 = arith.constant 0.000000e+00 : f32
      %17 = vector.broadcast %cst_14 : f32 to vector<8x512xf32>
      %c0_15 = arith.constant 0 : index
      %c0_16 = arith.constant 0 : index
      %18 = vector.load %arg22[%c0_15, %c0_16] : memref<8x512xf32, #tpu.memory_space<vmem>>, vector<8x512xf32>
      tpu.vector_store %arg22[%c0_15, %c0_16], %17 {strides = array<i32>} : memref<8x512xf32, #tpu.memory_space<vmem>>, vector<8x512xf32>,
      %cst_17 = arith.constant 0.000000e+00 : f32
      %19 = vector.broadcast %cst_17 : f32 to vector<8x49xf32>
      %c0_18 = arith.constant 0 : index
      %c0_19 = arith.constant 0 : index
      %20 = vector.load %arg20[%c0_18, %c0_19] : memref<8x49xf32, #tpu.memory_space<vmem>>, vector<8x49xf32>
      tpu.vector_store %arg20[%c0_18, %c0_19], %19 {strides = array<i32>} : memref<8x49xf32, #tpu.memory_space<vmem>>, vector<8x49xf32>,
      %cst_20 = arith.constant 0.000000e+00 : f32
      %21 = vector.broadcast %cst_20 : f32 to vector<8x64xf32>
      %c0_21 = arith.constant 0 : index
      %c0_22 = arith.constant 0 : index
      %22 = vector.load %arg21[%c0_21, %c0_22] : memref<8x64xf32, #tpu.memory_space<vmem>>, vector<8x64xf32>
      tpu.vector_store %arg21[%c0_21, %c0_22], %21 {strides = array<i32>} : memref<8x64xf32, #tpu.memory_space<vmem>>, vector<8x64xf32>,
      %c0_23 = arith.constant 0 : index
      %c0_24 = arith.constant 0 : index
      %23 = vector.load %arg2[%c0_23, %c0_24] : memref<16x64xf32, #tpu.memory_space<vmem>>, vector<16x64xf32>
      %c0_25 = arith.constant 0 : index
      %c0_26 = arith.constant 0 : index
      %24 = vector.load %arg1[%c0_25, %c0_26] : memref<112x64xf32, #tpu.memory_space<vmem>>, vector<112x64xf32>
      %c0_27 = arith.constant 0 : index
      %c0_28 = arith.constant 0 : index
      %25 = vector.load %arg5[%c0_27, %c0_28] : memref<64x64xf32, #tpu.memory_space<vmem>>, vector<64x64xf32>
      %cst_29 = arith.constant dense<0.000000e+00> : vector<112x64xf32>
      %26 = tpu.matmul %24, %25, %cst_29 {dimension_numbers = #tpu.dot_dimension_numbers<[1], [0], [0], [1], [0, 0, 1, 1], [], []>} : vector<112x64xf32>, vector<64x64xf32>, vector<112x64xf32> -> vector<112x64xf32>
      %c0_30 = arith.constant 0 : index
      %c0_31 = arith.constant 0 : index
      %27 = vector.load %arg6[%c0_30, %c0_31] : memref<1x64xf32, #tpu.memory_space<vmem>>, vector<1x64xf32>
      %28 = vector.broadcast %27 : vector<1x64xf32> to vector<112x64xf32>
      %29 = arith.addf %26, %28 : vector<112x64xf32>
      %cst_32 = arith.constant 0.000000e+00 : f32
      %30 = vector.broadcast %cst_32 : f32 to vector<112x64xf32>
      %31 = arith.maximumf %29, %30 : vector<112x64xf32>
      %c0_33 = arith.constant 0 : index
      %c0_34 = arith.constant 0 : index
      %32 = vector.load %arg7[%c0_33, %c0_34] : memref<64x64xf32, #tpu.memory_space<vmem>>, vector<64x64xf32>
      %cst_35 = arith.constant dense<0.000000e+00> : vector<16x64xf32>
      %33 = tpu.matmul %23, %32, %cst_35 {dimension_numbers = #tpu.dot_dimension_numbers<[1], [0], [0], [1], [0, 0, 1, 1], [], []>} : vector<16x64xf32>, vector<64x64xf32>, vector<16x64xf32> -> vector<16x64xf32>
      %c0_36 = arith.constant 0 : index
      %c0_37 = arith.constant 0 : index
      %34 = vector.load %arg8[%c0_36, %c0_37] : memref<1x64xf32, #tpu.memory_space<vmem>>, vector<1x64xf32>
      %35 = vector.broadcast %34 : vector<1x64xf32> to vector<16x64xf32>
      %36 = arith.addf %33, %35 : vector<16x64xf32>
      %cst_38 = arith.constant 0.000000e+00 : f32
      %37 = vector.broadcast %cst_38 : f32 to vector<16x64xf32>
      %38 = arith.maximumf %36, %37 : vector<16x64xf32>
      %c0_39 = arith.constant 0 : index
      %c0_40 = arith.constant 0 : index
      %39 = vector.load %arg9[%c0_39, %c0_40] : memref<1x64xf32, #tpu.memory_space<vmem>>, vector<1x64xf32>
      %40 = vector.broadcast %39 : vector<1x64xf32> to vector<16x64xf32>
      %41 = arith.mulf %38, %40 : vector<16x64xf32>
      %42 = vector.extract_strided_slice %31 {offsets = [0, 0], sizes = [49, 64], strides = [1, 1]} : vector<112x64xf32> to vector<49x64xf32>
      %43 = vector.extract_strided_slice %41 {offsets = [0, 0], sizes = [6, 64], strides = [1, 1]} : vector<16x64xf32> to vector<6x64xf32>
      %cst_41 = arith.constant dense<0.000000e+00> : vector<6x49xf32>
      %44 = tpu.matmul %43, %42, %cst_41 {dimension_numbers = #tpu.dot_dimension_numbers<[1], [1], [0], [0], [0, 0, 1, 0], [], []>} : vector<6x64xf32>, vector<49x64xf32>, vector<6x49xf32> -> vector<6x49xf32>
      %cst_42 = arith.constant dense<0xFF800000> : vector<6xf32>
      %45 = vector.multi_reduction <maximumf>, %44, %cst_42 [1] : vector<6x49xf32> to vector<6xf32>
      %46 = vector.shape_cast %45 : vector<6xf32> to vector<6x1xf32>
      %47 = vector.broadcast %46 : vector<6x1xf32> to vector<6x49xf32>
      %48 = arith.subf %44, %47 : vector<6x49xf32>
      %49 = math.exp %48 : vector<6x49xf32>
      %cst_43 = arith.constant dense<0.000000e+00> : vector<6xf32>
      %50 = vector.multi_reduction <add>, %49, %cst_43 [1] : vector<6x49xf32> to vector<6xf32>
      %51 = vector.shape_cast %50 : vector<6xf32> to vector<6x1xf32>
      %52 = tpu.reciprocal %51 {approx = true} : vector<6x1xf32> -> vector<6x1xf32>
      %53 = vector.broadcast %52 : vector<6x1xf32> to vector<6x49xf32>
      %54 = arith.mulf %49, %53 : vector<6x49xf32>
      %cst_44 = arith.constant dense<0.000000e+00> : vector<49xf32>
      %55 = vector.multi_reduction <add>, %54, %cst_44 [0] : vector<6x49xf32> to vector<49xf32>
      %56 = vector.shape_cast %55 : vector<49xf32> to vector<1x49xf32>
      %c0_45 = arith.constant 0 : index
      %c0_46 = arith.constant 0 : index
      %57 = vector.load %arg20[%c0_45, %c0_46] : memref<8x49xf32, #tpu.memory_space<vmem>>, vector<1x49xf32>
      tpu.vector_store %arg20[%c0_45, %c0_46], %56 {strides = array<i32>} : memref<8x49xf32, #tpu.memory_space<vmem>>, vector<1x49xf32>,
      %58 = vector.extract_strided_slice %23 {offsets = [0, 0], sizes = [8, 64], strides = [1, 1]} : vector<16x64xf32> to vector<8x64xf32>
      %cst_47 = arith.constant dense<0.000000e+00> : vector<64xf32>
      %59 = vector.multi_reduction <add>, %58, %cst_47 [0] : vector<8x64xf32> to vector<64xf32>
      %60 = vector.shape_cast %59 : vector<64xf32> to vector<1x64xf32>
      %c0_48 = arith.constant 0 : index
      %c0_49 = arith.constant 0 : index
      %61 = vector.load %arg21[%c0_48, %c0_49] : memref<8x64xf32, #tpu.memory_space<vmem>>, vector<1x64xf32>
      tpu.vector_store %arg21[%c0_48, %c0_49], %60 {strides = array<i32>} : memref<8x64xf32, #tpu.memory_space<vmem>>, vector<1x64xf32>,
      %62 = vector.extract_strided_slice %31 {offsets = [56, 0], sizes = [49, 64], strides = [1, 1]} : vector<112x64xf32> to vector<49x64xf32>
      %63 = vector.extract_strided_slice %41 {offsets = [8, 0], sizes = [6, 64], strides = [1, 1]} : vector<16x64xf32> to vector<6x64xf32>
      %cst_50 = arith.constant dense<0.000000e+00> : vector<6x49xf32>
      %64 = tpu.matmul %63, %62, %cst_50 {dimension_numbers = #tpu.dot_dimension_numbers<[1], [1], [0], [0], [0, 0, 1, 0], [], []>} : vector<6x64xf32>, vector<49x64xf32>, vector<6x49xf32> -> vector<6x49xf32>
      %cst_51 = arith.constant dense<0xFF800000> : vector<6xf32>
      %65 = vector.multi_reduction <maximumf>, %64, %cst_51 [1] : vector<6x49xf32> to vector<6xf32>
      %66 = vector.shape_cast %65 : vector<6xf32> to vector<6x1xf32>
      %67 = vector.broadcast %66 : vector<6x1xf32> to vector<6x49xf32>
      %68 = arith.subf %64, %67 : vector<6x49xf32>
      %69 = math.exp %68 : vector<6x49xf32>
      %cst_52 = arith.constant dense<0.000000e+00> : vector<6xf32>
      %70 = vector.multi_reduction <add>, %69, %cst_52 [1] : vector<6x49xf32> to vector<6xf32>
      %71 = vector.shape_cast %70 : vector<6xf32> to vector<6x1xf32>
      %72 = tpu.reciprocal %71 {approx = true} : vector<6x1xf32> -> vector<6x1xf32>
      %73 = vector.broadcast %72 : vector<6x1xf32> to vector<6x49xf32>
      %74 = arith.mulf %69, %73 : vector<6x49xf32>
      %cst_53 = arith.constant dense<0.000000e+00> : vector<49xf32>
      %75 = vector.multi_reduction <add>, %74, %cst_53 [0] : vector<6x49xf32> to vector<49xf32>
      %76 = vector.shape_cast %75 : vector<49xf32> to vector<1x49xf32>
      %c1 = arith.constant 1 : index
      %c0_54 = arith.constant 0 : index
      %77 = vector.load %arg20[%c1, %c0_54] : memref<8x49xf32, #tpu.memory_space<vmem>>, vector<1x49xf32>
      tpu.vector_store %arg20[%c1, %c0_54], %76 {strides = array<i32>} : memref<8x49xf32, #tpu.memory_space<vmem>>, vector<1x49xf32>,
      %78 = vector.extract_strided_slice %23 {offsets = [8, 0], sizes = [8, 64], strides = [1, 1]} : vector<16x64xf32> to vector<8x64xf32>
      %cst_55 = arith.constant dense<0.000000e+00> : vector<64xf32>
      %79 = vector.multi_reduction <add>, %78, %cst_55 [0] : vector<8x64xf32> to vector<64xf32>
      %80 = vector.shape_cast %79 : vector<64xf32> to vector<1x64xf32>
      %c1_56 = arith.constant 1 : index
      %c0_57 = arith.constant 0 : index
      %81 = vector.load %arg21[%c1_56, %c0_57] : memref<8x64xf32, #tpu.memory_space<vmem>>, vector<1x64xf32>
      tpu.vector_store %arg21[%c1_56, %c0_57], %80 {strides = array<i32>} : memref<8x64xf32, #tpu.memory_space<vmem>>, vector<1x64xf32>,
    } else {
    }
    %c0 = arith.constant 0 : index
    %c0_1 = arith.constant 0 : index
    %3 = vector.load %arg20[%c0, %c0_1] : memref<8x49xf32, #tpu.memory_space<vmem>>, vector<8x49xf32>
    %c0_2 = arith.constant 0 : index
    %c0_3 = arith.constant 0 : index
    %4 = vector.load %arg4[%c0_2, %c0_3] : memref<49x1664xf32, #tpu.memory_space<vmem>>, vector<49x1664xf32>
    %cst = arith.constant dense<0.000000e+00> : vector<8x1664xf32>
    %5 = tpu.matmul %3, %4, %cst {dimension_numbers = #tpu.dot_dimension_numbers<[1], [0], [0], [1], [0, 0, 1, 1], [], []>} : vector<8x49xf32>, vector<49x1664xf32>, vector<8x1664xf32> -> vector<8x1664xf32>
    %c0_4 = arith.constant 0 : index
    %c0_5 = arith.constant 0 : index
    %6 = vector.load %arg3[%c0_4, %c0_5] : memref<8x1664xf32, #tpu.memory_space<vmem>>, vector<8x1664xf32>
    %7 = arith.mulf %5, %6 : vector<8x1664xf32>
    %8 = arith.truncf %7 : vector<8x1664xf32> to vector<8x1664xbf16>
    %c0_6 = arith.constant 0 : index
    %c0_7 = arith.constant 0 : index
    %9 = vector.load %arg22[%c0_6, %c0_7] : memref<8x512xf32, #tpu.memory_space<vmem>>, vector<8x512xf32>
    %c0_8 = arith.constant 0 : index
    %c0_9 = arith.constant 0 : index
    %10 = vector.load %arg10[%c0_8, %c0_9] : memref<1664x512xbf16, #tpu.memory_space<vmem>>, vector<1664x512xbf16>
    %cst_10 = arith.constant dense<0.000000e+00> : vector<8x512xf32>
    %11 = tpu.matmul %8, %10, %cst_10 {dimension_numbers = #tpu.dot_dimension_numbers<[1], [0], [0], [1], [0, 0, 1, 1], [], []>} : vector<8x1664xbf16>, vector<1664x512xbf16>, vector<8x512xf32> -> vector<8x512xf32>
    %12 = arith.addf %9, %11 : vector<8x512xf32>
    %c0_11 = arith.constant 0 : index
    %c0_12 = arith.constant 0 : index
    %13 = vector.load %arg22[%c0_11, %c0_12] : memref<8x512xf32, #tpu.memory_space<vmem>>, vector<8x512xf32>
    tpu.vector_store %arg22[%c0_11, %c0_12], %12 {strides = array<i32>} : memref<8x512xf32, #tpu.memory_space<vmem>>, vector<8x512xf32>,
    %c1_i32 = arith.constant 1 : i32
    %14 = arith.cmpi eq, %arg0, %c1_i32 : i32
    %15 = arith.extui %14 : i1 to i32
    %c0_i32_13 = arith.constant 0 : i32
    %16 = arith.cmpi ne, %15, %c0_i32_13 : i32
    scf.if %16 {
      %c0_14 = arith.constant 0 : index
      %c0_15 = arith.constant 0 : index
      %17 = vector.load %arg21[%c0_14, %c0_15] : memref<8x64xf32, #tpu.memory_space<vmem>>, vector<8x64xf32>
      %18 = arith.truncf %17 : vector<8x64xf32> to vector<8x64xbf16>
      %c0_16 = arith.constant 0 : index
      %c0_17 = arith.constant 0 : index
      %19 = vector.load %arg11[%c0_16, %c0_17] : memref<64x512xbf16, #tpu.memory_space<vmem>>, vector<64x512xbf16>
      %cst_18 = arith.constant dense<0.000000e+00> : vector<8x512xf32>
      %20 = tpu.matmul %18, %19, %cst_18 {dimension_numbers = #tpu.dot_dimension_numbers<[1], [0], [0], [1], [0, 0, 1, 1], [], []>} : vector<8x64xbf16>, vector<64x512xbf16>, vector<8x512xf32> -> vector<8x512xf32>
      %c0_19 = arith.constant 0 : index
      %c0_20 = arith.constant 0 : index
      %21 = vector.load %arg22[%c0_19, %c0_20] : memref<8x512xf32, #tpu.memory_space<vmem>>, vector<8x512xf32>
      %22 = arith.addf %21, %20 : vector<8x512xf32>
      %c0_21 = arith.constant 0 : index
      %c0_22 = arith.constant 0 : index
      %23 = vector.load %arg12[%c0_21, %c0_22] : memref<1x512xf32, #tpu.memory_space<vmem>>, vector<1x512xf32>
      %24 = vector.broadcast %23 : vector<1x512xf32> to vector<8x512xf32>
      %25 = arith.mulf %22, %24 : vector<8x512xf32>
      %c0_23 = arith.constant 0 : index
      %c0_24 = arith.constant 0 : index
      %26 = vector.load %arg13[%c0_23, %c0_24] : memref<1x512xf32, #tpu.memory_space<vmem>>, vector<1x512xf32>
      %27 = vector.broadcast %26 : vector<1x512xf32> to vector<8x512xf32>
      %28 = arith.addf %25, %27 : vector<8x512xf32>
      %cst_25 = arith.constant 0.000000e+00 : f32
      %29 = vector.broadcast %cst_25 : f32 to vector<8x512xf32>
      %30 = arith.maximumf %28, %29 : vector<8x512xf32>
      %31 = arith.truncf %30 : vector<8x512xf32> to vector<8x512xbf16>
      %c0_26 = arith.constant 0 : index
      %c0_27 = arith.constant 0 : index
      %32 = vector.load %arg14[%c0_26, %c0_27] : memref<512x512xbf16, #tpu.memory_space<vmem>>, vector<512x512xbf16>
      %cst_28 = arith.constant dense<0.000000e+00> : vector<8x512xf32>
      %33 = tpu.matmul %31, %32, %cst_28 {dimension_numbers = #tpu.dot_dimension_numbers<[1], [0], [0], [1], [0, 0, 1, 1], [], []>} : vector<8x512xbf16>, vector<512x512xbf16>, vector<8x512xf32> -> vector<8x512xf32>
      %c0_29 = arith.constant 0 : index
      %c0_30 = arith.constant 0 : index
      %34 = vector.load %arg15[%c0_29, %c0_30] : memref<1x512xf32, #tpu.memory_space<vmem>>, vector<1x512xf32>
      %35 = vector.broadcast %34 : vector<1x512xf32> to vector<8x512xf32>
      %36 = arith.mulf %33, %35 : vector<8x512xf32>
      %c0_31 = arith.constant 0 : index
      %c0_32 = arith.constant 0 : index
      %37 = vector.load %arg16[%c0_31, %c0_32] : memref<1x512xf32, #tpu.memory_space<vmem>>, vector<1x512xf32>
      %38 = vector.broadcast %37 : vector<1x512xf32> to vector<8x512xf32>
      %39 = arith.addf %36, %38 : vector<8x512xf32>
      %cst_33 = arith.constant 0.000000e+00 : f32
      %40 = vector.broadcast %cst_33 : f32 to vector<8x512xf32>
      %41 = arith.maximumf %39, %40 : vector<8x512xf32>
      %42 = arith.truncf %41 : vector<8x512xf32> to vector<8x512xbf16>
      %c0_34 = arith.constant 0 : index
      %c0_35 = arith.constant 0 : index
      %43 = vector.load %arg17[%c0_34, %c0_35] : memref<512x128xbf16, #tpu.memory_space<vmem>>, vector<512x128xbf16>
      %cst_36 = arith.constant dense<0.000000e+00> : vector<8x128xf32>
      %44 = tpu.matmul %42, %43, %cst_36 {dimension_numbers = #tpu.dot_dimension_numbers<[1], [0], [0], [1], [0, 0, 1, 1], [], []>} : vector<8x512xbf16>, vector<512x128xbf16>, vector<8x128xf32> -> vector<8x128xf32>
      %c0_37 = arith.constant 0 : index
      %c0_38 = arith.constant 0 : index
      %45 = vector.load %arg18[%c0_37, %c0_38] : memref<1x128xf32, #tpu.memory_space<vmem>>, vector<1x128xf32>
      %46 = vector.broadcast %45 : vector<1x128xf32> to vector<8x128xf32>
      %47 = arith.addf %44, %46 : vector<8x128xf32>
      %c0_39 = arith.constant 0 : index
      %c0_40 = arith.constant 0 : index
      %48 = vector.load %arg19[%c0_39, %c0_40] : memref<8x128xf32, #tpu.memory_space<vmem>>, vector<8x128xf32>
      tpu.vector_store %arg19[%c0_39, %c0_40], %47 {strides = array<i32>} : memref<8x128xf32, #tpu.memory_space<vmem>>, vector<8x128xf32>,
    } else {
    }
    return
  }
  func.func @transform_0(%arg0: i32) -> (i32, i32) {
    %c0_i32 = arith.constant 0 : i32
    %c0_i32_0 = arith.constant 0 : i32
    %c0_i32_1 = arith.constant 0 : i32
    return %c0_i32, %c0_i32_0 : i32, i32
  }
  func.func @transform_1(%arg0: i32) -> (i32, i32) {
    %c0_i32 = arith.constant 0 : i32
    %c0_i32_0 = arith.constant 0 : i32
    %c0_i32_1 = arith.constant 0 : i32
    return %c0_i32, %c0_i32_0 : i32, i32
  }
  func.func @transform_2(%arg0: i32) -> (i32, i32) {
    %c0_i32 = arith.constant 0 : i32
    %c0_i32_0 = arith.constant 0 : i32
    return %c0_i32, %arg0 : i32, i32
  }
  func.func @transform_3(%arg0: i32) -> (i32, i32) {
    %c0_i32 = arith.constant 0 : i32
    %c0_i32_0 = arith.constant 0 : i32
    return %c0_i32, %arg0 : i32, i32
  }
  func.func @transform_4(%arg0: i32) -> (i32, i32) {
    %c0_i32 = arith.constant 0 : i32
    %c0_i32_0 = arith.constant 0 : i32
    %c0_i32_1 = arith.constant 0 : i32
    return %c0_i32, %c0_i32_0 : i32, i32
  }
  func.func @transform_5(%arg0: i32) -> (i32, i32) {
    %c0_i32 = arith.constant 0 : i32
    %c0_i32_0 = arith.constant 0 : i32
    %c0_i32_1 = arith.constant 0 : i32
    return %c0_i32, %c0_i32_0 : i32, i32
  }
  func.func @transform_6(%arg0: i32) -> (i32, i32) {
    %c0_i32 = arith.constant 0 : i32
    %c0_i32_0 = arith.constant 0 : i32
    %c0_i32_1 = arith.constant 0 : i32
    return %c0_i32, %c0_i32_0 : i32, i32
  }
  func.func @transform_7(%arg0: i32) -> (i32, i32) {
    %c0_i32 = arith.constant 0 : i32
    %c0_i32_0 = arith.constant 0 : i32
    %c0_i32_1 = arith.constant 0 : i32
    return %c0_i32, %c0_i32_0 : i32, i32
  }
  func.func @transform_8(%arg0: i32) -> (i32, i32) {
    %c0_i32 = arith.constant 0 : i32
    %c0_i32_0 = arith.constant 0 : i32
    %c0_i32_1 = arith.constant 0 : i32
    return %c0_i32, %c0_i32_0 : i32, i32
  }
  func.func @transform_9(%arg0: i32) -> (i32, i32) {
    %c0_i32 = arith.constant 0 : i32
    %c0_i32_0 = arith.constant 0 : i32
    return %arg0, %c0_i32 : i32, i32
  }
  func.func @transform_10(%arg0: i32) -> (i32, i32) {
    %c0_i32 = arith.constant 0 : i32
    %c0_i32_0 = arith.constant 0 : i32
    %c0_i32_1 = arith.constant 0 : i32
    return %c0_i32, %c0_i32_0 : i32, i32
  }
  func.func @transform_11(%arg0: i32) -> (i32, i32) {
    %c0_i32 = arith.constant 0 : i32
    %c0_i32_0 = arith.constant 0 : i32
    %c0_i32_1 = arith.constant 0 : i32
    return %c0_i32, %c0_i32_0 : i32, i32
  }
  func.func @transform_12(%arg0: i32) -> (i32, i32) {
    %c0_i32 = arith.constant 0 : i32
    %c0_i32_0 = arith.constant 0 : i32
    %c0_i32_1 = arith.constant 0 : i32
    return %c0_i32, %c0_i32_0 : i32, i32
  }
  func.func @transform_13(%arg0: i32) -> (i32, i32) {
    %c0_i32 = arith.constant 0 : i32
    %c0_i32_0 = arith.constant 0 : i32
    %c0_i32_1 = arith.constant 0 : i32
    return %c0_i32, %c0_i32_0 : i32, i32
  }
  func.func @transform_14(%arg0: i32) -> (i32, i32) {
    %c0_i32 = arith.constant 0 : i32
    %c0_i32_0 = arith.constant 0 : i32
    %c0_i32_1 = arith.constant 0 : i32
    return %c0_i32, %c0_i32_0 : i32, i32
  }
  func.func @transform_15(%arg0: i32) -> (i32, i32) {
    %c0_i32 = arith.constant 0 : i32
    %c0_i32_0 = arith.constant 0 : i32
    %c0_i32_1 = arith.constant 0 : i32
    return %c0_i32, %c0_i32_0 : i32, i32
  }
  func.func @transform_16(%arg0: i32) -> (i32, i32) {
    %c0_i32 = arith.constant 0 : i32
    %c0_i32_0 = arith.constant 0 : i32
    %c0_i32_1 = arith.constant 0 : i32
    return %c0_i32, %c0_i32_0 : i32, i32
  }
  func.func @transform_17(%arg0: i32) -> (i32, i32) {
    %c0_i32 = arith.constant 0 : i32
    %c0_i32_0 = arith.constant 0 : i32
    %c0_i32_1 = arith.constant 0 : i32
    return %c0_i32, %c0_i32_0 : i32, i32
  }
  func.func @transform_18(%arg0: i32) -> (i32, i32) {
    %c0_i32 = arith.constant 0 : i32
    %c0_i32_0 = arith.constant 0 : i32
    %c0_i32_1 = arith.constant 0 : i32
    return %c0_i32, %c0_i32_0 : i32, i32
  }
}

</mosaic_0001>

<bundles_post_ra>
// kernel: base_model_forward.1
= control target key start
LH: loop header
LB: loop body
LE: loop exit
PB: predicated region body
PF: predicated region fallthrough
CT: control target
= control target key end

     0   :  { %s10652_s0 = inlined_call_operand.vmem [shape: f32[112,64], index: 0, kind: input, shape index: {}]   ;;  %s10653_s1 = inlined_call_operand.vmem [shape: f32[16,64], index: 1, kind: input, shape index: {}]   ;;  %s10654_s2 = inlined_call_operand.vmem [shape: f32[8,3328], index: 2, kind: input, shape index: {}]   ;;  %s10655_s3 = inlined_call_operand.hbm [shape: f32[49,3328], index: 3, kind: input, shape index: {}]   ;;  %s10656_s4 = inlined_call_operand.hbm [shape: f32[64,64], index: 4, kind: input, shape index: {}]   ;;  %s10657_s5 = inlined_call_operand.hbm [shape: f32[1,64], index: 5, kind: input, shape index: {}]   ;;  %s10658_s6 = inlined_call_operand.hbm [shape: f32[64,64], index: 6, kind: input, shape index: {}]   ;;  %s10659_s7 = inlined_call_operand.hbm [shape: f32[1,64], index: 7, kind: input, shape index: {}]   ;;  %s10660_s8 = inlined_call_operand.hbm [shape: f32[1,64], index: 8, kind: input, shape index: {}]   ;;  %s10661_s9 = inlined_call_operand.hbm [shape: bf16[3328,512], index: 9, kind: input, shape index: {}]   ;;  %s10662_s10 = inlined_call_operand.hbm [shape: bf16[64,512], index: 10, kind: input, shape index: {}]   ;;  %s10663_s11 = inlined_call_operand.hbm [shape: f32[1,512], index: 11, kind: input, shape index: {}]   ;;  %s10664_s12 = inlined_call_operand.hbm [shape: f32[1,512], index: 12, kind: input, shape index: {}]   ;;  %s10665_s13 = inlined_call_operand.hbm [shape: bf16[512,512], index: 13, kind: input, shape index: {}]   ;;  %s10666_s14 = inlined_call_operand.hbm [shape: f32[1,512], index: 14, kind: input, shape index: {}]   ;;  %s10667_s15 = inlined_call_operand.hbm [shape: f32[1,512], index: 15, kind: input, shape index: {}]   ;;  %s10668_s16 = inlined_call_operand.hbm [shape: bf16[512,128], index: 16, kind: input, shape index: {}]   ;;  %s10669_s17 = inlined_call_operand.hbm [shape: f32[1,128], index: 17, kind: input, shape index: {}]   ;;  %s10670_s18 = inlined_call_operand.vmem [shape: f32[8,128], index: 18, kind: output, shape index: {}]  }
   0x1   :  { %10688 = sst [smem:[#allocation39_spill]] %s10652_s0 }
   0x2   :  { %10689 = sst [smem:[#allocation40_spill]] %s10653_s1 }
   0x3   :  { %10690 = sst [smem:[#allocation41_spill]] %s10654_s2 }
   0x4   :  { %10691 = sst [smem:[#allocation42_spill]] %s10655_s3 }
   0x5   :  { %10692 = sst [smem:[#allocation43_spill]] %s10656_s4 }
   0x6   :  { %10693 = sst [smem:[#allocation44_spill]] %s10657_s5 }
   0x7   :  { %10694 = sst [smem:[#allocation45_spill]] %s10658_s6 }
   0x8   :  { %10695 = sst [smem:[#allocation46_spill]] %s10659_s7 }
   0x9   :  { %10696 = sst [smem:[#allocation47_spill]] %s10660_s8 }
   0xa   :  { %10697 = sst [smem:[#allocation48_spill]] %s10661_s9 }
   0xb   :  { %10698 = sst [smem:[#allocation49_spill]] %s10662_s10 }
   0xc   :  { %10699 = sst [smem:[#allocation50_spill]] %s10663_s11 }
   0xd   :  { %10700 = sst [smem:[#allocation51_spill]] %s10670_s18 }
   0xe   :  { %23 = vsyncpa [#allocation6], 0 }
   0xf   :  { %25 = vsyncpa [#allocation6 + $0x1], 0 }
  0x10   :  { %26 = vsyncpa [#allocation8], 0 }
  0x11   :  { %27 = vsyncpa [#allocation11], 0 }
  0x12   :  { %28 = vsyncpa [#allocation14], 0 }
  0x13   :  { %29 = vsyncpa [#allocation20], 0 }
  0x14   :  { %30 = vsyncpa [#allocation23], 0 }
  0x15   :  { %31 = vsyncpa [#allocation26], 0  ;;  %s9509_s27 = smov 0   ;;  %s9511_s28 = smov 0  }
  0x16   :  { %s9513_s29 = smov 0   ;;  %s9515_s30 = smov 0  }
  0x17 LB: > { %s9384_s0 = smov [#allocation7]   ;;  %s9530_s1 = sadd.s32 4294967295, %s9382_s30   ;;  %s9382_s30 = sphi %s9515_s30, %s10753_s30   ;;  %s9378_s29 = sphi %s9513_s29, %s10752_s29   ;;  %s9374_s28 = sphi %s9511_s28, %s10751_s28   ;;  %s9370_s27 = sphi %s9509_s27, %s10750_s27  }
  0x18   : > { %s474_s19 = sshll.u32 %s9384_s0, 4  ;;  %p6942_p0 = scmp.ge.s32.totalorder %s9382_s30, 1  ;;  %s475_s19 = int_to_ptr.vmem [resolvable:$true] %s474_s19 }
  0x19   : > { %p10675_p1 = scmp.eq.s32.totalorder %s9530_s1, 0  ;;  %p456_p2 = scmp.lt.s32.totalorder %s9382_s30, 3 }
  0x1a   : > { %s9385_s21 = smov [#allocation10]   ;;  %s9386_s23 = smov [#allocation9]  }
  0x1b   : > { %p9536_p4 = pnand %p6942_p0, %p456_p2  ;;  %s498_s22 = sshll.u32 %s9385_s21, 4  ;;  %s9548_s22 = int_to_ptr.vmem [resolvable:$true] %s498_s22 }
  0x1c   : > { %s488_s24 = sshll.u32 %s9386_s23, 4  ;;  %s8925_s26 = scalar_lea.vmem %s475_s19, 1024  ;;  %s9550_s24 = int_to_ptr.vmem [resolvable:$true] %s488_s24 }
  0x1d   : > { %s10701_s20 = scalar_select %p9536_p4, 1, 0 }
  0x1e   : > { %p7900_p5 = pneg %p9536_p4  ;;  %p8926_p8 = scmp.ne.s32.totalorder %s475_s19, %s8925_s26 }
  0x1f   : > { %10702 = sst [smem:[#allocation38_spill]] %s10701_s20  ;;  %p8933_p11 = scmp.lt.s32.totalorder %s475_s19, %s475_s19 }
  0x20   : > { %p9544_p6 = pnand %p7900_p5, %p10675_p1  ;;  %p8934_p12 = scmp.lt.s32.totalorder %s8925_s26, %s8925_s26 }
  0x22   : > { %s10703_s2 = scalar_select %p9544_p6, 1, 0 }
  0x23   : > { %p9554_p7 = pneg %p9544_p6  ;;  %p8935_p13 = por %p8934_p12, %p8933_p11 }
  0x25   : > { %p8928_p9 = pnand %p8926_p8, %p9554_p7 }
  0x27   : > { %p8929_p10 = pneg %p8928_p9 }
  0x29   : > { %p8936_p0 = pnand %p8935_p13, %p8929_p10 }
  0x2b   : > { %8939 = shalt.err (!%p8936_p0)
}
  0x2c   : > { %s9387_s0 = smov 128   ;;  %s9388_s21 = smov 8  }
  0x2d   : > { %s10705_s4 = sld [smem:[#allocation43_spill]]  ;;  %s8951_s20 = scalar_lea.vmem %s9548_s22, 1024 }
  0x2e   : > { %p8952_p2 = scmp.ne.s32.totalorder %s9548_s22, %s8951_s20  ;;  %p8959_p9 = scmp.lt.s32.totalorder %s9548_s22, %s9548_s22 }
  0x2f   : > { %p8960_p10 = scmp.lt.s32.totalorder %s8951_s20, %s8951_s20 }
  0x30   : > { %p8954_p5 = pnand %p8952_p2, %p9554_p7 }
  0x31   : > { %p8961_p11 = por %p8960_p10, %p8959_p9 }
  0x32   : > { %p8955_p8 = pneg %p8954_p5 }
  0x33   : > { %7903 = dma.hbm_to_vmem [thread:$0]  (!%p9544_p6), %s10705_s4, 1024, %s475_s19, [#allocation8], %s9387_s0, %s9387_s0, %s9388_s21  }
  0x34   : > { %p8962_p12 = pnand %p8961_p11, %p8955_p8 }
  0x36   : > { %8965 = shalt.err (!%p8962_p12)
}
  0x37   : > { %s10706_s6 = sld [smem:[#allocation45_spill]]  ;;  %s8977_s18 = scalar_lea.vmem %s9550_s24, 16 }
  0x38   : > { %p8978_p13 = scmp.ne.s32.totalorder %s9550_s24, %s8977_s18  ;;  %s8984_s19 = scalar_lea.vmem %s9550_s24, 32 }
  0x39   : > { %p8985_p5 = scmp.lt.s32.totalorder %s9550_s24, %s9550_s24  ;;  %p8986_p8 = scmp.lt.s32.totalorder %s8984_s19, %s8977_s18 }
  0x3a   : > { %p8980_p0 = pnand %p8978_p13, %p9554_p7 }
  0x3b   : > { %p8987_p9 = por %p8986_p8, %p8985_p5 }
  0x3c   : > { %p8981_p2 = pneg %p8980_p0 }
  0x3d   : > { %7909 = dma.hbm_to_vmem [thread:$0]  (!%p9544_p6), %s10706_s6, 1024, %s9548_s22, [#allocation11], %s9387_s0, %s9387_s0, %s9388_s21  }
  0x3e   : > { %p8988_p10 = pnand %p8987_p9, %p8981_p2 }
  0x40   : > { %8991 = shalt.err (!%p8988_p10)
}
  0x41   : > { %s10707_s5 = sld [smem:[#allocation44_spill]]  ;;  %s9389_s22 = smov [#allocation12]  }
  0x42   : > { %s512_s0 = sshll.u32 %s9389_s22, 4  ;;  %s9390_s21 = smov [#allocation13]   ;;  %s513_s0 = int_to_ptr.vmem [resolvable:$true] %s512_s0 }
  0x43   : > { %s523_s23 = sshll.u32 %s9390_s21, 4  ;;  %s9003_s26 = scalar_lea.vmem %s513_s0, 16  ;;  %s524_s23 = int_to_ptr.vmem [resolvable:$true] %s523_s23 }
  0x44   : > { %p9004_p11 = scmp.ne.s32.totalorder %s513_s0, %s9003_s26  ;;  %s9010_s18 = scalar_lea.vmem %s513_s0, 32 }
  0x45   : > { %p9011_p0 = scmp.lt.s32.totalorder %s513_s0, %s513_s0  ;;  %p9012_p2 = scmp.lt.s32.totalorder %s9010_s18, %s9003_s26 }
  0x46   : > { %p9006_p12 = pnand %p9004_p11, %p9554_p7 }
  0x47   : > { %7906 = dma.hbm_to_vmem [thread:$0]  (!%p9544_p6), %s10707_s5, 16, %s9550_s24, [#allocation8]  }
  0x48   : > { %p9007_p13 = pneg %p9006_p12  ;;  %p9013_p5 = por %p9012_p2, %p9011_p0 }
  0x4a   : > { %p9014_p8 = pnand %p9013_p5, %p9007_p13 }
  0x4c   : > { %9017 = shalt.err (!%p9014_p8)
}
  0x4d   : > { %s10708_s7 = sld [smem:[#allocation46_spill]]  ;;  %s9029_s9 = scalar_lea.vmem %s524_s23, 16 }
  0x4e   : > { %p9030_p9 = scmp.ne.s32.totalorder %s524_s23, %s9029_s9  ;;  %s9036_s20 = scalar_lea.vmem %s524_s23, 32 }
  0x4f   : > { %p9037_p12 = scmp.lt.s32.totalorder %s524_s23, %s524_s23  ;;  %p9038_p3 = scmp.lt.s32.totalorder %s9036_s20, %s9029_s9 }
  0x50   : > { %p9032_p10 = pnand %p9030_p9, %p9554_p7 }
  0x51   : > { %p9039_p1 = por %p9038_p3, %p9037_p12 }
  0x52   : > { %p9033_p11 = pneg %p9032_p10 }
  0x53   : > { %7912 = dma.hbm_to_vmem [thread:$0]  (!%p9544_p6), %s10708_s7, 16, %s513_s0, [#allocation11]  }
  0x54   : > { %p9040_p0 = pnand %p9039_p1, %p9033_p11 }
  0x56   : > { %9043 = shalt.err (!%p9040_p0)
}
  0x57   : > { %s10709_s8 = sld [smem:[#allocation47_spill]]  ;;  %s9391_s0 = smov [#allocation19]  }
  0x58   : > { %s568_s26 = sshll.u32 %s9391_s0, 4  ;;  %s9392_s18 = smov [#allocation22]   ;;  %s569_s26 = int_to_ptr.vmem [resolvable:$true] %s568_s26 }
  0x59   : > { %s593_s19 = sshll.u32 %s9392_s18, 4  ;;  %s9055_s24 = scalar_lea.vmem %s569_s26, 16384  ;;  %s594_s19 = int_to_ptr.vmem [resolvable:$true] %s593_s19 }
  0x5a   : > { %p9056_p13 = scmp.ne.s32.totalorder %s569_s26, %s9055_s24  ;;  %p9063_p3 = scmp.lt.s32.totalorder %s569_s26, %s569_s26 }
  0x5b   : > { %p9064_p1 = scmp.lt.s32.totalorder %s9055_s24, %s9055_s24 }
  0x5c   : > { %p9058_p2 = pnand %p9056_p13, %p9554_p7 }
  0x5d   : > { %7915 = dma.hbm_to_vmem [thread:$0]  (!%p9544_p6), %s10709_s8, 16, %s524_s23, [#allocation14]  }
  0x5e   : > { %p9059_p5 = pneg %p9058_p2  ;;  %p9065_p8 = por %p9064_p1, %p9063_p3 }
  0x60   : > { %p9066_p9 = pnand %p9065_p8, %p9059_p5 }
  0x62   : > { %9069 = shalt.err (!%p9066_p9)
}
  0x63   : > { %s10676_s9 = smov 256   ;;  %s10678_s20 = smov 16  }
  0x64   : > { %7927 = dma.hbm_to_vmem [thread:$0]  (!%p9544_p6), %s10665_s13, 16384, %s569_s26, [#allocation20], %s10676_s9, %s10676_s9, %s10678_s20  }
  0x65   : > { %s9081_s21 = scalar_lea.vmem %s594_s19, 64  ;;  %p9089_p0 = scmp.lt.s32.totalorder %s594_s19, %s594_s19 }
  0x66   : > { %p9082_p10 = scmp.ne.s32.totalorder %s594_s19, %s9081_s21  ;;  %p9090_p13 = scmp.lt.s32.totalorder %s9081_s21, %s9081_s21 }
  0x68   : > { %p9084_p11 = pnand %p9082_p10, %p9554_p7  ;;  %p9091_p2 = por %p9090_p13, %p9089_p0 }
  0x6a   : > { %p9085_p12 = pneg %p9084_p11 }
  0x6c   : > { %p9092_p5 = pnand %p9091_p2, %p9085_p12 }
  0x6e   : > { %9095 = shalt.err (!%p9092_p5)
}
  0x6f   : > { %7933 = dma.hbm_to_vmem [thread:$0]  (!%p9544_p6), %s10667_s15, 64, %s594_s19, [#allocation23]  }
  0x70   : > { %s9622_s26 = sadd.s32 1, %s9382_s30   ;;  %s112_s23 = sadd.s32 1, %s9378_s29 }
  0x71   : > { %s109_s24 = ssub.s32 %s9382_s30, %s9622_s26  ;;  %p119_p1 = scmp.ne.s32.totalorder %s9378_s29, %s9374_s28 }
  0x72   : > { %p110_p3 = scmp.eq.s32.totalorder %s109_s24, 0  ;;  %p120_p8 = scmp.eq.s32.totalorder %s9382_s30, 0 }
  0x73   : > { %p125_p9 = scmp.ne.s32.totalorder %s9374_s28, %s9370_s27  ;;  %p10710_p11 = scmp.eq.s32.totalorder %s9530_s1, 0 }
  0x74   : > { %s9633_s22 = scalar_select %p110_p3, %s9378_s29, %s112_s23  }
  0x75   : > { %p121_p10 = por %p120_p8, %p119_p1  ;;  %p9637_p12 = por %p10710_p11, %p125_p9 }
  0x76   : > { %p7960_p0 = scmp.lt.s32.totalorder %s9382_s30, 2  ;;  %s637_s19 = sand.u32 1, %s9382_s30  }
  0x77   : > { %s10711_s21 = scalar_select %p9637_p12, 1, 0 }
  0x78   : > { %s10680_s0 = sand.u32 1, %s9378_s29   ;;  %p9646_p13 = pnand %p7960_p0, %p121_p10 }
  0x79   : > { %s7840_s18 = smul.u32 728, %s10680_s0  ;;  %s10713_s3 = sld [smem:[#allocation42_spill]] }
  0x7a   : > { %s10712_s9 = scalar_select %p9646_p13, 1, 0 }
  0x7b   : > { %s7629_s27 = smul.u32 1664, %s9382_s30  ;;  %s641_s4 = scalar_lea.vmem [#allocation5], %s7840_s18 }
  0x7c   : > { %s648_s5 = sshll.u32 %s641_s4, 4  ;;  %s9658_s0 = scalar_lea.sflag [#allocation6], %s637_s19  ;;  %s9656_s5 = int_to_ptr.vmem [resolvable:$true] %s648_s5 }
  0x7d   : > { %p10685_p5 = pneg %p9646_p13 }
  0x7f   : > { %s9654_s20 = scalar_lea.hbm %s10713_s3, %s7629_s27  ;;  %s9101_s23 = scalar_lea.hbm %s10713_s3, 23296 }
  0x80   : > { %s9096_s6 = scalar_lea.hbm %s9654_s20, 11648  ;;  %p9102_p8 = scmp.lt.s32.totalorder %s9654_s20, %s10713_s3 }
  0x81   : > { %p9097_p2 = scmp.ne.s32.totalorder %s9654_s20, %s9096_s6  ;;  %p9103_p9 = scmp.lt.s32.totalorder %s9101_s23, %s9096_s6 }
  0x83   : > { %p9099_p3 = pnand %p10685_p5, %p9097_p2  ;;  %p9104_p10 = por %p9103_p9, %p9102_p8 }
  0x85   : > { %p9100_p1 = pneg %p9099_p3 }
  0x87   : > { %p9105_p11 = pnand %p9104_p10, %p9100_p1 }
  0x89   : > { %9108 = shalt.err (!%p9105_p11)
}
  0x8a   : > { %s9109_s4 = scalar_lea.vmem %s9656_s5, 11648  ;;  %s9395_s19 = smov [#allocation5]  }
  0x8b   : > { %p9110_p0 = scmp.ne.s32.totalorder %s9656_s5, %s9109_s4  ;;  %s9114_s18 = sshll.u32 %s9395_s19, 4  ;;  %s9115_s18 = int_to_ptr.vmem [resolvable:$false] %s9114_s18 }
  0x8c   : > { %s9116_s24 = scalar_lea.vmem %s9115_s18, 23296  ;;  %p9117_p12 = scmp.lt.s32.totalorder %s9656_s5, %s9115_s18 }
  0x8d   : > { %p9112_p2 = pnand %p9110_p0, %p10685_p5  ;;  %p9118_p4 = scmp.lt.s32.totalorder %s9116_s24, %s9109_s4 }
  0x8f   : > { %p9113_p3 = pneg %p9112_p2  ;;  %p9119_p6 = por %p9118_p4, %p9117_p12 }
  0x91   : > { %p9120_p8 = pnand %p9119_p6, %p9113_p3 }
  0x93   : > { %9123 = shalt.err (!%p9120_p8)
}
  0x94   : > { %s9396_s6 = smov 3328   ;;  %s9397_s7 = smov 1664  }
  0x95   : > { %s9398_s8 = smov 104   ;;  %s9399_s27 = smov [#allocation16]  }
  0x96   : > { %7943 = dma.hbm_to_vmem [thread:$0]  (!%p9646_p13), %s9654_s20, 11648, %s9656_s5, %s9658_s0, %s9396_s6, %s9397_s7, %s9398_s8  }
  0x97   : > { %s533_s23 = sshll.u32 %s9399_s27, 4  ;;  %s9400_s19 = smov [#allocation17]   ;;  %s534_s23 = int_to_ptr.vmem [resolvable:$true] %s533_s23 }
  0x98   : > { %s547_s3 = sshll.u32 %s9400_s19, 4  ;;  %s9135_s18 = scalar_lea.vmem %s534_s23, 2048  ;;  %s548_s3 = int_to_ptr.vmem [resolvable:$true] %s547_s3 }
  0x99   : > { %p9136_p1 = scmp.ne.s32.totalorder %s534_s23, %s9135_s18  ;;  %p9143_p12 = scmp.lt.s32.totalorder %s534_s23, %s534_s23 }
  0x9a   : > { %p9144_p9 = scmp.lt.s32.totalorder %s9135_s18, %s9135_s18 }
  0x9b   : > { %p9138_p4 = pnand %p9136_p1, %p9554_p7 }
  0x9c   : > { %p9145_p10 = por %p9144_p9, %p9143_p12 }
  0x9d   : > { %p9139_p6 = pneg %p9138_p4 }
  0x9f   : > { %p9146_p11 = pnand %p9145_p10, %p9139_p6 }
  0xa1   : > { %9149 = shalt.err (!%p9146_p11)
}
  0xa2   : > { %p10714_p0 = scmp.ne.s32.totalorder %s10703_s2, 0  ;;  %s10715_s4 = smov 16  }
  0xa3   : > { %s10716_s24 = smov 256   ;;  %s10717_s10 = sld [smem:[#allocation49_spill]] }
  0xa4   : > { %s9161_s6 = scalar_lea.vmem %s548_s3, 64  ;;  %p9169_p1 = scmp.lt.s32.totalorder %s548_s3, %s548_s3 }
  0xa5   : > { %p9162_p2 = scmp.ne.s32.totalorder %s548_s3, %s9161_s6  ;;  %p9170_p4 = scmp.lt.s32.totalorder %s9161_s6, %s9161_s6 }
  0xa7   : > { %p9164_p3 = pnand %p9162_p2, %p9554_p7  ;;  %p9171_p6 = por %p9170_p4, %p9169_p1 }
  0xa9   : > { %7918 = dma.hbm_to_vmem [thread:$0]  (!%p10714_p0), %s10717_s10, 2048, %s534_s23, [#allocation8], %s10716_s24, %s10716_s24, %s10715_s4  }
  0xaa   : > { %p9165_p8 = pneg %p9164_p3 }
  0xac   : > { %p9172_p12 = pnand %p9171_p6, %p9165_p8 }
  0xae   : > { %9175 = shalt.err (!%p9172_p12)
}
  0xaf   : > { %s10718_s11 = sld [smem:[#allocation50_spill]]  ;;  %s9401_s27 = smov [#allocation18]  }
  0xb0   : > { %s558_s23 = sshll.u32 %s9401_s27, 4  ;;  %s9402_s19 = smov [#allocation21]   ;;  %s559_s23 = int_to_ptr.vmem [resolvable:$true] %s558_s23 }
  0xb1   : > { %s582_s18 = sshll.u32 %s9402_s19, 4  ;;  %s9187_s5 = scalar_lea.vmem %s559_s23, 64  ;;  %s583_s18 = int_to_ptr.vmem [resolvable:$true] %s582_s18 }
  0xb2   : > { %p9188_p9 = scmp.ne.s32.totalorder %s559_s23, %s9187_s5  ;;  %p9195_p2 = scmp.lt.s32.totalorder %s559_s23, %s559_s23 }
  0xb3   : > { %p9196_p3 = scmp.lt.s32.totalorder %s9187_s5, %s9187_s5 }
  0xb4   : > { %p9190_p10 = pnand %p9188_p9, %p9554_p7 }
  0xb5   : > { %7921 = dma.hbm_to_vmem [thread:$0]  (!%p10714_p0), %s10718_s11, 64, %s548_s3, [#allocation11]  }
  0xb6   : > { %p9191_p11 = pneg %p9190_p10  ;;  %p9197_p8 = por %p9196_p3, %p9195_p2 }
  0xb8   : > { %p9198_p1 = pnand %p9197_p8, %p9191_p11 }
  0xba   : > { %9201 = shalt.err (!%p9198_p1)
}
  0xbb   : > { %7924 = dma.hbm_to_vmem [thread:$0]  (!%p10714_p0), %s10664_s12, 64, %s559_s23, [#allocation14]  }
  0xbc   : > { %s9213_s3 = scalar_lea.vmem %s583_s18, 64  ;;  %p9221_p9 = scmp.lt.s32.totalorder %s583_s18, %s583_s18 }
  0xbd   : > { %p9214_p4 = scmp.ne.s32.totalorder %s583_s18, %s9213_s3  ;;  %p9222_p10 = scmp.lt.s32.totalorder %s9213_s3, %s9213_s3 }
  0xbf   : > { %p9216_p6 = pnand %p9214_p4, %p9554_p7  ;;  %p9223_p5 = por %p9222_p10, %p9221_p9 }
  0xc1   : > { %p9217_p12 = pneg %p9216_p6 }
  0xc3   : > { %p9224_p13 = pnand %p9223_p5, %p9217_p12 }
  0xc5   : > { %9227 = shalt.err (!%p9224_p13)
}
  0xc6   : > { %7930 = dma.hbm_to_vmem [thread:$0]  (!%p10714_p0), %s10666_s14, 64, %s583_s18, [#allocation20]  }
  0xc7   : > { %s9403_s27 = smov [#allocation24]  }
  0xc8   : > { %s603_s23 = sshll.u32 %s9403_s27, 4  ;;  %s604_s23 = int_to_ptr.vmem [resolvable:$true] %s603_s23 }
  0xc9   : > { %s9239_s19 = scalar_lea.vmem %s604_s23, 4096  ;;  %p9247_p8 = scmp.lt.s32.totalorder %s604_s23, %s604_s23 }
  0xca   : > { %p9240_p11 = scmp.ne.s32.totalorder %s604_s23, %s9239_s19  ;;  %p9248_p1 = scmp.lt.s32.totalorder %s9239_s19, %s9239_s19 }
  0xcc   : > { %p9242_p2 = pnand %p9240_p11, %p9554_p7  ;;  %p9249_p4 = por %p9248_p1, %p9247_p8 }
  0xce   : > { %p9243_p3 = pneg %p9242_p2 }
  0xd0   : > { %p9250_p5 = pnand %p9249_p4, %p9243_p3 }
  0xd2   : > { %9253 = shalt.err (!%p9250_p5)
}
  0xd3   : > { %s9404_s5 = smov 64   ;;  %s9405_s20 = smov 4  }
  0xd4   : > { %7936 = dma.hbm_to_vmem [thread:$0]  (!%p10714_p0), %s10668_s16, 4096, %s604_s23, [#allocation23], %s9404_s5, %s9404_s5, %s9405_s20  }
  0xd5   : > { %s10719_s3 = sand.u32 1, %s9378_s29   ;;  %s9406_s8 = smov [#allocation25]  }
  0xd6   : > { %s7841_s7 = smul.u32 3328, %s10719_s3  ;;  %s617_s27 = sshll.u32 %s9406_s8, 4  ;;  %s618_s27 = int_to_ptr.vmem [resolvable:$true] %s617_s27 }
  0xd7   : > { %s7632_s10 = smul.u32 53248, %s9382_s30  ;;  %s9265_s19 = scalar_lea.vmem %s618_s27, 16 }
  0xd8   : > { %p9266_p13 = scmp.ne.s32.totalorder %s618_s27, %s9265_s19  ;;  %s9272_s11 = scalar_lea.vmem %s618_s27, 32 }
  0xd9   : > { %p9273_p9 = scmp.lt.s32.totalorder %s618_s27, %s618_s27  ;;  %p9274_p10 = scmp.lt.s32.totalorder %s9272_s11, %s9265_s19 }
  0xda   : > { %p9268_p6 = pnand %p9266_p13, %p9554_p7 }
  0xdb   : > { %p9275_p11 = por %p9274_p10, %p9273_p9 }
  0xdc   : > { %p9269_p12 = pneg %p9268_p6 }
  0xde   : > { %p9276_p2 = pnand %p9275_p11, %p9269_p12 }
  0xe0   : > { %9279 = shalt.err (!%p9276_p2)
}
  0xe1   : > { %7939 = dma.hbm_to_vmem [thread:$0]  (!%p10714_p0), %s10669_s17, 16, %s618_s27, [#allocation26]  }
  0xe2   : > { %s10720_s18 = sld [smem:[#allocation48_spill]]  ;;  %s662_s25 = scalar_lea.vmem [#allocation15], %s7841_s7 }
  0xe3   : > { %s670_s11 = sshll.u32 %s662_s25, 4  ;;  %p10721_p3 = scmp.ne.s32.totalorder %s10712_s9, 0  ;;  %s671_s11 = int_to_ptr.vmem [resolvable:$true] %s670_s11 }
  0xe5   : > { %p10722_p8 = pneg %p10721_p3 }
  0xe8   : > { %s9736_s6 = scalar_lea.hbm %s10720_s18, %s7632_s10  ;;  %s9285_s27 = scalar_lea.hbm %s10720_s18, 106496 }
  0xe9   : > { %s9280_s3 = scalar_lea.hbm %s9736_s6, 53248  ;;  %p9286_p0 = scmp.lt.s32.totalorder %s9736_s6, %s10720_s18 }
  0xea   : > { %p9281_p7 = scmp.ne.s32.totalorder %s9736_s6, %s9280_s3  ;;  %p9287_p5 = scmp.lt.s32.totalorder %s9285_s27, %s9280_s3 }
  0xec   : > { %p9283_p1 = pnand %p9281_p7, %p10722_p8  ;;  %p9288_p13 = por %p9287_p5, %p9286_p0 }
  0xee   : > { %p9284_p4 = pneg %p9283_p1 }
  0xf0   : > { %p9289_p6 = pnand %p9288_p13, %p9284_p4 }
  0xf2   : > { %9292 = shalt.err (!%p9289_p6)
}
  0xf3   : > { %s9293_s10 = scalar_lea.vmem %s671_s11, 53248  ;;  %p10723_p9 = pmov %p10722_p8 }
  0xf4   : > { %p9294_p12 = scmp.ne.s32.totalorder %s671_s11, %s9293_s10  ;;  %s9407_s7 = smov [#allocation15]  }
  0xf5   : > { %s9298_s5 = sshll.u32 %s9407_s7, 4  ;;  %s9299_s5 = int_to_ptr.vmem [resolvable:$false] %s9298_s5 }
  0xf6   : > { %p9296_p10 = pnand %p9294_p12, %p10723_p9  ;;  %s9300_s30 = scalar_lea.vmem %s9299_s5, 106496 }
  0xf7   : > { %p9301_p2 = scmp.lt.s32.totalorder %s671_s11, %s9299_s5  ;;  %p9302_p7 = scmp.lt.s32.totalorder %s9300_s30, %s9293_s10 }
  0xf8   : > { %p9297_p11 = pneg %p9296_p10 }
  0xf9   : > { %p9303_p8 = por %p9302_p7, %p9301_p2 }
  0xfb   : > { %p9304_p1 = pnand %p9303_p8, %p9297_p11 }
  0xfd   : > { %9307 = shalt.err (!%p9304_p1)
}
  0xfe   : > { %7946 = dma.hbm_to_vmem [thread:$0]  (!%p10721_p3), %s9736_s6, 53248, %s671_s11, %s9658_s0, %s10716_s24, %s10716_s24, %s10715_s4  }
  0xff   : > { %s10724_s20 = sld [smem:[#allocation38_spill]] }
 0x105   : > { %p10725_p4 = scmp.ne.s32.totalorder %s10724_s20, 0 }
 0x106   : > { %s684_s25 = sand.u32 (!%p10725_p4), 1, %s9530_s1   ;;  %s686_s3 = sand.u32 (!%p10725_p4), 1, %s9374_s28  }
 0x107   : > { %682 = sbr.rel (%p10725_p4) target bundleno = 2558 (0x9fe), region = 92  ;;  %s685_s8 = scalar_lea.sflag (!%p10725_p4), [#allocation6], %s684_s25 }
 0x108   : > { %s7842_s2 = smul.u32 (!%p10725_p4), 728, %s686_s3  ;;  %p10726_p0 = scmp.ne.s32.totalorder (!%p10725_p4), %s10711_s21, 0 }
 0x10a   : > { %s9764_s27 = scalar_lea.vmem (!%p10725_p4), [#allocation5], %s7842_s2 }
 0x10c   : > { %9325 = dma.done.wait (%p10726_p0), %s685_s8, 11648  }
 0x10d   : > { %9327 = vsyncadd (%p10726_p0), %s685_s8, 4294955648  ;;  %p10727_p5 = scmp.eq.s32.totalorder %s9530_s1, 0 }
 0x10f   : > { %9329 = dma.done.wait (%p10727_p5), [#allocation8], 1040   ;;  %p10728_p3 = pmov %p10727_p5 }
 0x111   : > { %9331 = vsyncadd (%p10728_p3), [#allocation8], 4294966256  ;;  %p10729_p13 = pmov %p10728_p3 }
 0x112   : > { %p10730_p6 = pmov %p10728_p3 }
 0x113   : > { %9333 = dma.done.wait (%p10729_p13), [#allocation11], 1040  }
 0x114   : > { %9335 = vsyncadd (%p10730_p6), [#allocation11], 4294966256  ;;  %p10731_p12 = pmov %p10728_p3 }
 0x115   : > { %p10732_p9 = pmov %p10728_p3 }
 0x116   : > { %9337 = dma.done.wait (%p10731_p12), [#allocation14], 16  }
 0x117   : > { %9339 = vsyncadd (%p10732_p9), [#allocation14], 4294967280  ;;  %s7843_s9 = smul.u32 3328, %s686_s3 }
 0x119   : > { %s9782_s0 = scalar_lea.vmem [#allocation15], %s7843_s9 }
 0x11a   : > { %9341 = dma.done.wait (%p10726_p0), %s685_s8, 53248  }
 0x11b   : > { %9343 = vsyncadd (%p10726_p0), %s685_s8, 4294914048  ;;  %p10733_p10 = pmov %p10728_p3 }
 0x11c   : > { %p10734_p11 = pmov %p10728_p3 }
 0x11d   : > { %9345 = dma.done.wait (%p10733_p10), [#allocation8], 2048  }
 0x11e   : > { %9347 = vsyncadd (%p10734_p11), [#allocation8], 4294965248  ;;  %p10735_p2 = pmov %p10728_p3 }
 0x120   : > { %9349 = dma.done.wait (%p10735_p2), [#allocation11], 64   ;;  %p10736_p7 = pmov %p10735_p2 }
 0x121   : > { %p10737_p8 = pmov %p10735_p2 }
 0x122   : > { %9351 = vsyncadd (%p10736_p7), [#allocation11], 4294967232 }
 0x123   : > { %9353 = dma.done.wait (%p10737_p8), [#allocation14], 64   ;;  %p10738_p1 = pmov %p10735_p2 }
 0x125   : > { %9355 = vsyncadd (%p10738_p1), [#allocation14], 4294967232  ;;  %p10739_p4 = pmov %p10738_p1 }
 0x126   : > { %p10740_p0 = pmov %p10738_p1 }
 0x127   : > { %9357 = dma.done.wait (%p10739_p4), [#allocation20], 16448  }
 0x128   : > { %9359 = vsyncadd (%p10740_p0), [#allocation20], 4294950848  ;;  %p10741_p5 = pmov %p10740_p0 }
 0x129   : > { %p10742_p3 = pmov %p10740_p0 }
 0x12a   : > { %9361 = dma.done.wait (%p10741_p5), [#allocation23], 4160  }
 0x12b   : > { %9363 = vsyncadd (%p10742_p3), [#allocation23], 4294963136  ;;  %p10743_p13 = pmov %p10740_p0 }
 0x12c   : > { %p10744_p6 = pmov %p10740_p0 }
 0x12d   : > { %9365 = dma.done.wait (%p10743_p13), [#allocation26], 16  }
 0x12e   : > { %9367 = vsyncadd (%p10744_p6), [#allocation26], 4294967280  ;;  %s807_s21 = smul.u32 13, %s9530_s1  ;;  %s10745_s11 = sld [smem:[#allocation41_spill]] }
 0x12f   : > { %p10746_p9 = scmp.ne.s32.totalorder %s9530_s1, 0 }
 0x130   : > { %p808_p12 = scmp.lt.s32.totalorder %s807_s21, 25  ;;  %s10747_s7 = sld [smem:[#allocation39_spill]] (!%p10746_p9) }
 0x131   : > { %819 = sbr.rel (%p10746_p9) target bundleno = 1094 (0x446), region = 156  ;;  %s10748_s20 = sld [smem:[#allocation40_spill]] (!%p10746_p9) }
 0x132   : > { %s10755_s21 = smov (!%p808_p12, %s807_s21), 25 }
 0x133   : > { %s6974_s4 = sshll.u32 %s10755_s21, 3 }
 0x134   : > { %s9816_s19 = scalar_lea.vmem %s10745_s11, %s6974_s4 }
 0x136   : > { %v851_v0 = vld [vmem:[#allocation7 + $0x38] sm:$0xff]  ;;  %v850_v1 = vld [vmem:[#allocation7 + $0x30] sm:$0xff]  ;;  %vm826_vm0 = vcmask 523264   ;;  %v9408_v2 = vmov 0.0   ;;  %v849_v3 = vld [vmem:[#allocation7 + $0x28] sm:$0xff]  ;;  %vm1279_vm1 = vcmask 516096  }
 0x137   : > { %7733 = vmatprep.subr.mxu0 %v851_v0  ;;  %820 = vst [vmem:[#allocation4 + $0x10] sm:$0xff] %v9408_v2  ;;  %821 = vst [vmem:[#allocation4] sm:$0xff] %v9408_v2  ;;  %v830_v4 = vld [vmem:[%s10747_s7] sm:$0xff]  ;;  %v847_v6 = vld [vmem:[#allocation7 + $0x18] sm:$0xff]  ;;  %vm9409_vm2 = vmmov 0   ;;  %vm1251_vm3 = vcmask 398336  }
 0x138   : > { %822 = vst [vmem:[#allocation4 + $0x18] sm:$0xff] %v9408_v2  ;;  %823 = vst [vmem:[#allocation4 + $0x8] sm:$0xff] %v9408_v2  ;;  %7734 = vmatpush3.msra.mxu0 %v851_v0  ;;  %7749 = vmatprep.mubr.msk.f32.mxu0 %vm826_vm0, %v830_v4  ;;  %v848_v5 = vld [vmem:[#allocation7 + $0x20] sm:$0xff]  ;;  %v1056_v8 = vld [vmem:[#allocation10 + $0x30] sm:$0xff]  ;;  %vm824_vm4 = vcmask 400384   ;;  %vm1270_vm5 = vcmask 393216  }
 0x139   : > { %827 = vst.msk [vmem:[#allocation3] sm:$0xff] %vm826_vm0, %v9408_v2  ;;  %7735 = vmatprep.subr.mxu0 %v850_v1  ;;  %v1057_v7 = vld [vmem:[#allocation10 + $0x38] sm:$0xff]  ;;  %v846_v9 = vld [vmem:[#allocation7 + $0x10] sm:$0xff]  ;;  %v845_v11 = vld [vmem:[#allocation7 + $0x8] sm:$0xff] }
 0x13a   : > { %7736 = vmatpush3.msra.mxu0 %v850_v1  ;;  %7770 = vmatprep.subr.mxu1 %v1057_v7  ;;  %v1055_v10 = vld [vmem:[#allocation10 + $0x28] sm:$0xff]  ;;  %v1054_v12 = vld [vmem:[#allocation10 + $0x20] sm:$0xff]  ;;  %v1053_v18 = vld [vmem:[#allocation10 + $0x18] sm:$0xff]  ;;  %825 = vst.msk [vmem:[#allocation2] sm:$0xff] %vm824_vm4, %v9408_v2 }
 0x13b   : > { %7737 = vmatprep.subr.mxu0 %v849_v3  ;;  %7771 = vmatpush3.msra.mxu1 %v1057_v7  ;;  %v828_v13 = vld [vmem:[%s10748_s20] sm:$0xff]  ;;  %v829_v14 = vld [vmem:[%s10748_s20 + $0x8] sm:$0xff]  ;;  %v1052_v22 = vld [vmem:[#allocation10 + $0x10] sm:$0xff] }
 0x13c   : > { %7738 = vmatpush3.msra.mxu0 %v849_v3  ;;  %7772 = vmatprep.subr.mxu1 %v1056_v8  ;;  %v1272_v15 = vsel %vm826_vm0, %v828_v13, 0.0  ;;  %v1394_v16 = vsel %vm826_vm0, %v829_v14, 0.0  ;;  %v844_v17 = vld [vmem:[#allocation7] sm:$0xff]  ;;  %v831_v21 = vld [vmem:[%s10747_s7 + $0x8] sm:$0xff]  ;;  %v832_v25 = vld [vmem:[%s10747_s7 + $0x10] sm:$0xff] }
 0x13d   : > { %7739 = vmatprep.subr.mxu0 %v848_v5  ;;  %7773 = vmatpush3.msra.mxu1 %v1056_v8  ;;  %v1273_v19 = vrot.slane %v1272_v15, 4  ;;  %v1395_v20 = vrot.slane %v1394_v16, 4  ;;  %v1051_v26 = vld [vmem:[#allocation10 + $0x8] sm:$0xff]  ;;  %v833_v29 = vld [vmem:[%s10747_s7 + $0x18] sm:$0xff]  ;;  %v1050_v30 = vld [vmem:[#allocation10] sm:$0xff] }
 0x13e   : > { %7740 = vmatpush3.msra.mxu0 %v848_v5  ;;  %7774 = vmatprep.subr.mxu1 %v1055_v10  ;;  %v834_v33 = vld [vmem:[%s10747_s7 + $0x20] sm:$0xff]  ;;  %v835_v36 = vld [vmem:[%s10747_s7 + $0x28] sm:$0xff]  ;;  %v836_v39 = vld [vmem:[%s10747_s7 + $0x30] sm:$0xff] }
 0x13f   : > { %7741 = vmatprep.subr.mxu0 %v847_v6  ;;  %7775 = vmatpush3.msra.mxu1 %v1055_v10  ;;  %v1274_v23 = vadd.f32 %v1273_v19, %v1272_v15  ;;  %v1396_v24 = vadd.f32 %v1395_v20, %v1394_v16  ;;  %v837_v40 = vld [vmem:[%s10747_s7 + $0x38] sm:$0xff]  ;;  %v838_v41 = vld [vmem:[%s10747_s7 + $0x40] sm:$0xff]  ;;  %v839_v42 = vld [vmem:[%s10747_s7 + $0x48] sm:$0xff] }
 0x140   : > { %7742 = vmatpush3.msra.mxu0 %v847_v6  ;;  %7776 = vmatprep.subr.mxu1 %v1054_v12  ;;  %v840_v43 = vld [vmem:[%s10747_s7 + $0x50] sm:$0xff]  ;;  %v841_v44 = vld [vmem:[%s10747_s7 + $0x58] sm:$0xff]  ;;  %v842_v45 = vld [vmem:[%s10747_s7 + $0x60] sm:$0xff] }
 0x141   : > { %7743 = vmatprep.subr.mxu0 %v846_v9  ;;  %7777 = vmatpush3.msra.mxu1 %v1054_v12  ;;  %v1275_v27 = vrot.slane %v1274_v23, 2  ;;  %v1397_v28 = vrot.slane %v1396_v24, 2  ;;  %v843_v46 = vld [vmem:[%s10747_s7 + $0x68] sm:$0xff]  ;;  %v9898_v54 = vld [vmem:[#allocation9] ss:$0 sm:$0xff] }
 0x142   : > { %7744 = vmatpush3.msra.mxu0 %v846_v9  ;;  %7778 = vmatprep.subr.mxu1 %v1053_v18 }
 0x143   : > { %7745 = vmatprep.subr.mxu0 %v845_v11  ;;  %7779 = vmatpush3.msra.mxu1 %v1053_v18  ;;  %v1276_v31 = vadd.f32 %v1275_v27, %v1274_v23  ;;  %v1398_v32 = vadd.f32 %v1397_v28, %v1396_v24 }
 0x144   : > { %7746 = vmatpush3.msra.mxu0 %v845_v11  ;;  %7780 = vmatprep.subr.mxu1 %v1052_v22 }
 0x145   : > { %7747 = vmatprep.subr.mxu0 %v844_v17  ;;  %7781 = vmatpush3.msra.mxu1 %v1052_v22  ;;  %v1277_v34 = vrot.slane %v1276_v31, 1  ;;  %v1399_v35 = vrot.slane %v1398_v32, 1 }
 0x146   : > { %7748 = vmatpush3.msra.mxu0 %v844_v17  ;;  %7782 = vmatprep.subr.mxu1 %v1051_v26 }
 0x147   : > { %7750 = vmatmul.mubr.msk.f32.vlgmr.msra.gmra.mxu0 %vm826_vm0, %v831_v21  ;;  %7786 = vmatprep.mubr.msk.f32.mxu1 %vm826_vm0, %v828_v13  ;;  %v1278_v37 = vadd.f32 %v1277_v34, %v1276_v31  ;;  %v1400_v38 = vadd.f32 %v1399_v35, %v1398_v32 }
 0x148   : > { %7752 = vmatprep.mubr.msk.f32.mxu0 %vm826_vm0, %v832_v25  ;;  %7783 = vmatpush3.msra.mxu1 %v1051_v26  ;;  %v6994_v26 = vld [vmem:[#allocation13] ss:$0 sm:$0xff] }
 0x149   : > { %7789 = vmatprep.subr.mxu0 %v9408_v2  ;;  %7784 = vmatprep.subr.mxu1 %v1050_v30  ;;  %1280 = vst.msk [vmem:[#allocation3] sm:$0x1] %vm1279_vm1, %v1278_v37  ;;  %1401 = vst.msk [vmem:[#allocation3 + $0x1] sm:$0x1] %vm1279_vm1, %v1400_v38 }
 0x14a   : > { %7785 = vmatpush3.msra.mxu1 %v1050_v30 }
 0x14b   : > { %7753 = vmatmul.mubr.msk.f32.gmra.mxu0 %vm826_vm0, %v833_v29  ;;  %7787 = vmatmul.mubr.msk.f32.vlgmr.msra.gmra.mxu1 %vm826_vm0, %v829_v14  ;;  %v6991_v14 = vld [vmem:[#allocation12] ss:$0 sm:$0xff] }
 0x14c   : > { %7755 = vmatprep.mubr.msk.f32.mxu0 %vm826_vm0, %v834_v33  ;;  %7806 = vmatprep.subr.mxu1 %v9408_v2 }
 0x14d   : > { %7820 = vmatprep.mubr.msk.f32.mxu1 %vm9409_vm2, %v9408_v2 }
 0x14f   : > { %7756 = vmatmul.mubr.msk.f32.gmra.mxu0 %vm826_vm0, %v835_v36 }
 0x150   : > { %7758 = vmatprep.mubr.msk.f32.mxu0 %vm826_vm0, %v836_v39 }
 0x153   : > { %7759 = vmatmul.mubr.msk.f32.gmra.mxu0 %vm826_vm0, %v837_v40 }
 0x154   : > { %7761 = vmatprep.mubr.msk.f32.mxu0 %vm826_vm0, %v838_v41 }
 0x157   : > { %7762 = vmatmul.mubr.msk.f32.gmra.mxu0 %vm826_vm0, %v839_v42 }
 0x158   : > { %7764 = vmatprep.mubr.msk.f32.mxu0 %vm826_vm0, %v840_v43 }
 0x15b   : > { %7765 = vmatmul.mubr.msk.f32.gmra.mxu0 %vm826_vm0, %v841_v44 }
 0x15c   : > { %7767 = vmatprep.mubr.msk.f32.mxu0 %vm826_vm0, %v842_v45 }
 0x15f   : > { %7768 = vmatmul.mubr.msk.f32.gmra.mxu0 %vm826_vm0, %v843_v46 }
 0x160   : > { %7803 = vmatprep.mubr.msk.f32.mxu0 %vm9409_vm2, %v9408_v2 }
 0x207   : > { %v7751_v47 = vpop.f32.mrf.mxu0 }
 0x208   : > { %v973_v16 = vadd.f32 %v7751_v47, %v9898_v54 }
 0x209   : > { %v967_v48 = vpop.f32.mrf.mxu0 }
 0x20a   : > { %v1037_v21 = vmax.f32 %v973_v16, 0.0  ;;  %v968_v22 = vadd.f32 %v9898_v54, %v967_v48 }
 0x20b   : > { %v7754_v49 = vpop.f32.mrf.mxu0  ;;  %v7788_v9 = vpop.f32.mrf.mxu1 }
 0x20c   : > { %v983_v3 = vadd.f32 %v7754_v49, %v9898_v54  ;;  %v1036_v27 = vmax.f32 %v968_v22, 0.0  ;;  %v1143_v31 = vadd.f32 %v7788_v9, %v6991_v14 }
 0x20d   : > { %v977_v50 = vpop.f32.mrf.mxu0  ;;  %v1137_v15 = vpop.f32.mrf.mxu1 }
 0x20e   : > { %v1039_v10 = vmax.f32 %v983_v3, 0.0  ;;  %v978_v11 = vadd.f32 %v9898_v54, %v977_v50  ;;  %v1138_v18 = vadd.f32 %v6991_v14, %v1137_v15  ;;  %v1147_v34 = vmax.f32 %v1143_v31, 0.0 }
 0x20f   : > { %v7757_v51 = vpop.f32.mrf.mxu0 }
 0x210   : > { %v993_v58 = vadd.f32 %v7757_v51, %v9898_v54  ;;  %v1038_v17 = vmax.f32 %v978_v11, 0.0  ;;  %v1146_v23 = vmax.f32 %v1138_v18, 0.0  ;;  %v1156_v36 = vmul.f32 %v6994_v26, %v1147_v34 }
 0x211   : > { %v987_v52 = vpop.f32.mrf.mxu0 }
 0x212   : > { %v1041_v62 = vmax.f32 %v993_v58, 0.0  ;;  %v988_v63 = vadd.f32 %v9898_v54, %v987_v52  ;;  %v1155_v28 = vmul.f32 %v6994_v26, %v1146_v23 }
 0x213   : > { %v9896_v53 = vpop.f32.mrf.mxu0 }
 0x214   : > { %v1040_v4 = vmax.f32 %v988_v63, 0.0  ;;  %v1003_v32 = vadd.f32 %v9896_v53, %v9898_v54 }
 0x215   : > { %v997_v55 = vpop.f32.mrf.mxu0 }
 0x216   : > { %v998_v56 = vadd.f32 %v9898_v54, %v997_v55  ;;  %v1043_v35 = vmax.f32 %v1003_v32, 0.0 }
 0x217   : > { %v7763_v57 = vpop.f32.mrf.mxu0 }
 0x218   : > { %v1042_v59 = vmax.f32 %v998_v56, 0.0  ;;  %v1013_v24 = vadd.f32 %v7763_v57, %v9898_v54 }
 0x219   : > { %v1007_v60 = vpop.f32.mrf.mxu0 }
 0x21a   : > { %7790 = vmatpush3.xpose.msk.msra.mxu0 %vm826_vm0, %v1042_v59  ;;  %v1045_v29 = vmax.f32 %v1013_v24, 0.0  ;;  %v1008_v30 = vadd.f32 %v9898_v54, %v1007_v60 }
 0x21b   : > { %v7766_v61 = vpop.f32.mrf.mxu0  ;;  %7791 = vmatprep.subr.mxu0 %v9408_v2 }
 0x21c   : > { %v1023_v12 = vadd.f32 %v7766_v61, %v9898_v54  ;;  %v1044_v33 = vmax.f32 %v1008_v30, 0.0 }
 0x21d   : > { %v1017_v0 = vpop.f32.mrf.mxu0 }
 0x21e   : > { %7792 = vmatpush3.xpose.msk.msra.mxu0 %vm826_vm0, %v1041_v62  ;;  %v1047_v19 = vmax.f32 %v1023_v12, 0.0  ;;  %v1018_v20 = vadd.f32 %v9898_v54, %v1017_v0 }
 0x21f   : > { %v7769_v1 = vpop.f32.mrf.mxu0  ;;  %7793 = vmatprep.subr.mxu0 %v9408_v2 }
 0x220   : > { %v1033_v5 = vadd.f32 %v7769_v1, %v9898_v54  ;;  %v1046_v25 = vmax.f32 %v1018_v20, 0.0 }
 0x221   : > { %v1027_v6 = vpop.f32.mrf.mxu0 }
 0x222   : > { %v1049_v7 = vmax.f32 %v1033_v5, 0.0  ;;  %v1028_v8 = vadd.f32 %v9898_v54, %v1027_v6  ;;  %7794 = vmatpush3.xpose.msk.msra.mxu0 %vm826_vm0, %v1040_v4 }
 0x223   : > { %7795 = vmatprep.subr.mxu0 %v9408_v2 }
 0x224   : > { %7807 = vmatpush3.xpose.msk.msra.mxu1 %vm826_vm0, %v1049_v7  ;;  %v1048_v13 = vmax.f32 %v1028_v8, 0.0 }
 0x225   : > { %7808 = vmatprep.subr.mxu1 %v9408_v2 }
 0x226   : > { %7796 = vmatpush3.xpose.msk.msra.mxu0 %vm826_vm0, %v1039_v10 }
 0x227   : > { %7797 = vmatprep.subr.mxu0 %v9408_v2 }
 0x228   : > { %7809 = vmatpush3.xpose.msk.msra.mxu1 %vm826_vm0, %v1048_v13 }
 0x229   : > { %7810 = vmatprep.subr.mxu1 %v9408_v2 }
 0x22a   : > { %7798 = vmatpush3.xpose.msk.msra.mxu0 %vm826_vm0, %v1038_v17 }
 0x22b   : > { %7799 = vmatprep.subr.mxu0 %v9408_v2 }
 0x22c   : > { %7811 = vmatpush3.xpose.msk.msra.mxu1 %vm826_vm0, %v1047_v19 }
 0x22d   : > { %7812 = vmatprep.subr.mxu1 %v9408_v2 }
 0x22e   : > { %7800 = vmatpush3.xpose.msk.msra.mxu0 %vm826_vm0, %v1037_v21 }
 0x22f   : > { %7801 = vmatprep.subr.mxu0 %v9408_v2 }
 0x230   : > { %7813 = vmatpush3.xpose.msk.msra.mxu1 %vm826_vm0, %v1046_v25 }
 0x231   : > { %7814 = vmatprep.subr.mxu1 %v9408_v2 }
 0x232   : > { %7802 = vmatpush3.xpose.msk.msra.mxu0 %vm826_vm0, %v1036_v27 }
 0x234   : > { %7815 = vmatpush3.xpose.msk.msra.mxu1 %vm826_vm0, %v1045_v29 }
 0x235   : > { %7804 = vmatmul.mubr.msk.f32.vlgmr.msra.gmra.mxu0 %vm826_vm0, %v1155_v28  ;;  %7816 = vmatprep.subr.mxu1 %v9408_v2 }
 0x238   : > { %7817 = vmatpush3.xpose.msk.msra.mxu1 %vm826_vm0, %v1044_v33 }
 0x239   : > { %7818 = vmatprep.subr.mxu1 %v9408_v2 }
 0x23c   : > { %7819 = vmatpush3.xpose.msk.msra.mxu1 %vm826_vm0, %v1043_v35 }
 0x23f   : > { %7821 = vmatmul.mubr.msk.f32.vlgmr.msra.gmra.mxu1 %vm826_vm0, %v1156_v36 }
 0x2f5   : > { %v1247_v37 = vpop.f32.mrf.mxu0 }
 0x2f6   : > { %v1252_v38 = vsel %vm1251_vm3, %v1247_v37, -inf }
 0x2f7   : > { %1253 = vmax.xlane.f32.xlu0 %v1252_v38  ;;  %v7805_v39 = vpop.f32.mrf.mxu0 }
 0x2ff   : > { %v1371_v40 = vpop.f32.mrf.mxu1 }
 0x300   : > { %v1375_v41 = vsel %vm1251_vm3, %v1371_v40, -inf }
 0x301   : > { %v7822_v42 = vpop.f32.mrf.mxu1  ;;  %1376 = vmax.xlane.f32.xlu0 %v1375_v41 }
 0x380   : > { %v1254_v43 = vpop.xlane.xlu0 %1253 }
 0x381   : > { %v1255_v44 = vsub.f32 %v1247_v37, %v1254_v43 }
 0x383   : > { %v1256_v45 = vmul.f32 1.442695, %v1255_v44 }
 0x385   : > { %8034 = vpow2.f32 %v1256_v45 }
 0x38a   : > { %v1377_v46 = vpop.xlane.xlu0 %1376 }
 0x38b   : > { %v1378_v47 = vsub.f32 %v1371_v40, %v1377_v46 }
 0x38d   : > { %v1379_v48 = vmul.f32 1.442695, %v1378_v47 }
 0x38f   : > { %8036 = vpow2.f32 %v1379_v48 }
 0x392   : > { %v8035_v49 = vpop.eup %8034 }
 0x393   : > { %v1258_v50 = vsel %vm1251_vm3, %v8035_v49, 0.0 }
 0x394   : > { %1259 = vadd.xlane.f32.xlu1 %v1258_v50 }
 0x39c   : > { %v8037_v51 = vpop.eup %8036 }
 0x39d   : > { %v1381_v52 = vsel %vm1251_vm3, %v8037_v51, 0.0 }
 0x39e   : > { %1382 = vadd.xlane.f32.xlu1 %v1381_v52 }
 0x41d   : > { %v1260_v53 = vpop.xlane.xlu1 %1259 }
 0x41e   : > { %8038 = vrcp.f32 %v1260_v53 }
 0x427   : > { %v1383_v54 = vpop.xlane.xlu1 %1382 }
 0x428   : > { %8040 = vrcp.f32 %v1383_v54 }
 0x42b   : > { %v8039_v2 = vpop.eup %8038 }
 0x42c   : > { %v1262_v55 = vmul.f32 %v8039_v2, %v8035_v49 }
 0x42e   : > { %v1263_v56 = vsel %vm1251_vm3, %v1262_v55, 0.0 }
 0x42f   : > { %v1264_v57 = vrot.slane %v1263_v56, 4 }
 0x431   : > { %v1265_v58 = vadd.f32 %v1264_v57, %v1263_v56 }
 0x433   : > { %v1266_v59 = vrot.slane %v1265_v58, 2 }
 0x435   : > { %v8041_v60 = vpop.eup %8040  ;;  %v1267_v61 = vadd.f32 %v1266_v59, %v1265_v58 }
 0x436   : > { %v1385_v62 = vmul.f32 %v8041_v60, %v8037_v51 }
 0x437   : > { %v1268_v63 = vrot.slane %v1267_v61, 1 }
 0x438   : > { %v1386_v0 = vsel %vm1251_vm3, %v1385_v62, 0.0 }
 0x439   : > { %v1269_v1 = vadd.f32 %v1268_v63, %v1267_v61  ;;  %v1387_v3 = vrot.slane %v1386_v0, 4 }
 0x43b   : > { %1271 = vst.msk [vmem:[#allocation2] sm:$0x1] %vm1270_vm5, %v1269_v1  ;;  %v1388_v4 = vadd.f32 %v1387_v3, %v1386_v0 }
 0x43d   : > { %v1389_v5 = vrot.slane %v1388_v4, 2 }
 0x43f   : > { %v1390_v6 = vadd.f32 %v1389_v5, %v1388_v4 }
 0x441   : > { %v1391_v7 = vrot.slane %v1390_v6, 1 }
 0x443   : > { %v1392_v8 = vadd.f32 %v1391_v7, %v1390_v6 }
 0x445   : > { %1393 = vst.msk [vmem:[#allocation2 + $0x1] sm:$0x1] %vm1270_vm5, %v1392_v8 }
 0x446 PF: > { %v1482_v9 = vld [vmem:[%s9764_s27 + $0x278] sm:$0x1]  ;;  %vm1498_vm6 = vcmask 1040384   ;;  %v1484_v10 = vld [vmem:[%s9764_s27 + $0x288] sm:$0x1]  ;;  %v1469_v11 = vld [vmem:[%s9764_s27 + $0x210] sm:$0xff] }
 0x447   : > { %7011 = vmatprep.subr.msk.mxu0 %vm1498_vm6, %v1482_v9  ;;  %7014 = vmatprep.subr.msk.mxu1 %vm1498_vm6, %v1484_v10  ;;  %v1481_v12 = vld [vmem:[%s9764_s27 + $0x270] sm:$0x1]  ;;  %v1483_v13 = vld [vmem:[%s9764_s27 + $0x280] sm:$0x1]  ;;  %v1468_v15 = vld [vmem:[%s9764_s27 + $0x208] sm:$0xff]  ;;  %vm1494_vm7 = vcmask 400384  }
 0x448   : > { %v1471_v14 = vld [vmem:[%s9764_s27 + $0x220] sm:$0xff]  ;;  %7012 = vmatpush1.msk.msra.mxu0 %vm1498_vm6, %v1481_v12  ;;  %7015 = vmatpush1.msk.msra.mxu1 %vm1498_vm6, %v1483_v13  ;;  %v1470_v16 = vld [vmem:[%s9764_s27 + $0x218] sm:$0xff]  ;;  %v1456_v17 = vld [vmem:[%s9764_s27 + $0x1a8] sm:$0xff]  ;;  %v9410_v38 = vmov 0.0   ;;  %vm9411_vm8 = vmmov 0   ;;  %p7447_p10 = scmp.ne.s32.totalorder %s9530_s1, 1 }
 0x449   : > { %1558 = vmatprep.subr.mxu0 %v1469_v11  ;;  %1629 = vmatprep.subr.mxu1 %v1471_v14  ;;  %v1458_v18 = vld [vmem:[%s9764_s27 + $0x1b8] sm:$0xff]  ;;  %v1455_v19 = vld [vmem:[%s9764_s27 + $0x1a0] sm:$0xff]  ;;  %v1457_v20 = vld [vmem:[%s9764_s27 + $0x1b0] sm:$0xff] }
 0x44a   : > { %1559 = vmatpush1.msra.mxu0 %v1468_v15  ;;  %1630 = vmatpush1.msra.mxu1 %v1470_v16  ;;  %v1443_v21 = vld [vmem:[%s9764_s27 + $0x140] sm:$0xff]  ;;  %v1445_v22 = vld [vmem:[%s9764_s27 + $0x150] sm:$0xff]  ;;  %v1442_v23 = vld [vmem:[%s9764_s27 + $0x138] sm:$0xff] }
 0x44b   : > { %1560 = vmatprep.subr.mxu0 %v1456_v17  ;;  %1631 = vmatprep.subr.mxu1 %v1458_v18  ;;  %v1444_v24 = vld [vmem:[%s9764_s27 + $0x148] sm:$0xff]  ;;  %v1430_v25 = vld [vmem:[%s9764_s27 + $0xd8] sm:$0xff]  ;;  %v1429_v27 = vld [vmem:[%s9764_s27 + $0xd0] sm:$0xff] }
 0x44c   : > { %1561 = vmatpush1.msra.mxu0 %v1455_v19  ;;  %1632 = vmatpush1.msra.mxu1 %v1457_v20  ;;  %v1432_v26 = vld [vmem:[%s9764_s27 + $0xe8] sm:$0xff]  ;;  %v1431_v28 = vld [vmem:[%s9764_s27 + $0xe0] sm:$0xff]  ;;  %v1417_v29 = vld [vmem:[%s9764_s27 + $0x70] sm:$0xff] }
 0x44d   : > { %1562 = vmatprep.subr.mxu0 %v1443_v21  ;;  %1633 = vmatprep.subr.mxu1 %v1445_v22  ;;  %v1419_v30 = vld [vmem:[%s9764_s27 + $0x80] sm:$0xff]  ;;  %v1416_v31 = vld [vmem:[%s9764_s27 + $0x68] sm:$0xff]  ;;  %v1418_v32 = vld [vmem:[%s9764_s27 + $0x78] sm:$0xff] }
 0x44e   : > { %1563 = vmatpush1.msra.mxu0 %v1442_v23  ;;  %1634 = vmatpush1.msra.mxu1 %v1444_v24  ;;  %v1404_v33 = vld [vmem:[%s9764_s27 + $0x8] sm:$0xff]  ;;  %v1406_v34 = vld [vmem:[%s9764_s27 + $0x18] sm:$0xff]  ;;  %v1403_v35 = vld [vmem:[%s9764_s27] sm:$0xff] }
 0x44f   : > { %1564 = vmatprep.subr.mxu0 %v1430_v25  ;;  %1635 = vmatprep.subr.mxu1 %v1432_v26  ;;  %v1405_v36 = vld [vmem:[%s9764_s27 + $0x10] sm:$0xff]  ;;  %v1486_v39 = vld [vmem:[%s9764_s27 + $0x298] sm:$0x1]  ;;  %v1488_v40 = vld [vmem:[%s9764_s27 + $0x2a8] sm:$0x1] }
 0x450   : > { %1565 = vmatpush1.msra.mxu0 %v1429_v27  ;;  %1636 = vmatpush1.msra.mxu1 %v1431_v28  ;;  %v9982_v37 = vld [vmem:[#allocation2] sm:$0xff]  ;;  %v1487_v42 = vld [vmem:[%s9764_s27 + $0x2a0] sm:$0x1]  ;;  %v1472_v45 = vld [vmem:[%s9764_s27 + $0x228] sm:$0xff] }
 0x451   : > { %1566 = vmatprep.subr.mxu0 %v1417_v29  ;;  %1637 = vmatprep.subr.mxu1 %v1419_v30  ;;  %v1485_v41 = vld [vmem:[%s9764_s27 + $0x290] sm:$0x1]  ;;  %v1475_v44 = vld [vmem:[%s9764_s27 + $0x240] sm:$0xff]  ;;  %v1474_v46 = vld [vmem:[%s9764_s27 + $0x238] sm:$0xff] }
 0x452   : > { %1567 = vmatpush1.msra.mxu0 %v1416_v31  ;;  %1638 = vmatpush1.msra.mxu1 %v1418_v32  ;;  %v1473_v43 = vld [vmem:[%s9764_s27 + $0x230] sm:$0xff]  ;;  %v1460_v47 = vld [vmem:[%s9764_s27 + $0x1c8] sm:$0xff]  ;;  %v1462_v48 = vld [vmem:[%s9764_s27 + $0x1d8] sm:$0xff] }
 0x453   : > { %1568 = vmatprep.subr.mxu0 %v1404_v33  ;;  %1639 = vmatprep.subr.mxu1 %v1406_v34  ;;  %v1459_v49 = vld [vmem:[%s9764_s27 + $0x1c0] sm:$0xff]  ;;  %v1461_v50 = vld [vmem:[%s9764_s27 + $0x1d0] sm:$0xff]  ;;  %v1446_v53 = vld [vmem:[%s9764_s27 + $0x158] sm:$0xff] }
 0x454   : > { %1569 = vmatpush1.msra.mxu0 %v1403_v35  ;;  %1602 = vmatprep.mubr.f32.mxu0 %v9410_v38  ;;  %v1447_v51 = vld [vmem:[%s9764_s27 + $0x160] sm:$0xff]  ;;  %v1449_v52 = vld [vmem:[%s9764_s27 + $0x170] sm:$0xff]  ;;  %v1448_v54 = vld [vmem:[%s9764_s27 + $0x168] sm:$0xff] }
 0x455   : > { %1640 = vmatpush1.msra.mxu1 %v1405_v36  ;;  %1673 = vmatprep.mubr.f32.mxu1 %v9410_v38  ;;  %v1434_v2 = vld [vmem:[%s9764_s27 + $0xf8] sm:$0xff]  ;;  %v1436_v55 = vld [vmem:[%s9764_s27 + $0x108] sm:$0xff]  ;;  %v1433_v56 = vld [vmem:[%s9764_s27 + $0xf0] sm:$0xff] }
 0x456   : > { %7013 = vmatmul.mubr.msk.f32.vlgmr.msra.gmra.mxu0 %vm1494_vm7, %v9982_v37  ;;  %7016 = vmatmul.mubr.msk.f32.vlgmr.msra.gmra.mxu1 %vm1494_vm7, %v9982_v37  ;;  %v1435_v57 = vld [vmem:[%s9764_s27 + $0x100] sm:$0xff]  ;;  %v1421_v58 = vld [vmem:[%s9764_s27 + $0x90] sm:$0xff]  ;;  %v1420_v60 = vld [vmem:[%s9764_s27 + $0x88] sm:$0xff] }
 0x457   : > { %7017 = vmatprep.subr.msk.mxu0 %vm1498_vm6, %v1486_v39  ;;  %7020 = vmatprep.subr.msk.mxu1 %vm1498_vm6, %v1488_v40  ;;  %v1423_v59 = vld [vmem:[%s9764_s27 + $0xa0] sm:$0xff]  ;;  %v1422_v61 = vld [vmem:[%s9764_s27 + $0x98] sm:$0xff]  ;;  %v1408_v62 = vld [vmem:[%s9764_s27 + $0x28] sm:$0xff] }
 0x458   : > { %7018 = vmatpush1.msk.msra.mxu0 %vm1498_vm6, %v1485_v41  ;;  %7021 = vmatpush1.msk.msra.mxu1 %vm1498_vm6, %v1487_v42  ;;  %v1407_v63 = vld [vmem:[%s9764_s27 + $0x20] sm:$0xff]  ;;  %v1410_v0 = vld [vmem:[%s9764_s27 + $0x38] sm:$0xff]  ;;  %v1409_v1 = vld [vmem:[%s9764_s27 + $0x30] sm:$0xff] }
 0x459   : > { %1700 = vmatprep.subr.mxu0 %v1473_v43  ;;  %1771 = vmatprep.subr.mxu1 %v1475_v44  ;;  %v1490_v3 = vld [vmem:[%s9764_s27 + $0x2b8] sm:$0x1]  ;;  %v1489_v4 = vld [vmem:[%s9764_s27 + $0x2b0] sm:$0x1]  ;;  %v1476_v6 = vld [vmem:[%s9764_s27 + $0x248] sm:$0xff] }
 0x45a   : > { %1701 = vmatpush1.msra.mxu0 %v1472_v45  ;;  %1772 = vmatpush1.msra.mxu1 %v1474_v46  ;;  %v1477_v5 = vld [vmem:[%s9764_s27 + $0x250] sm:$0xff]  ;;  %v1464_v7 = vld [vmem:[%s9764_s27 + $0x1e8] sm:$0xff]  ;;  %v1463_v9 = vld [vmem:[%s9764_s27 + $0x1e0] sm:$0xff] }
 0x45b   : > { %1702 = vmatprep.subr.mxu0 %v1460_v47  ;;  %1773 = vmatprep.subr.mxu1 %v1462_v48  ;;  %v1492_v8 = vld [vmem:[%s9764_s27 + $0x2c8] sm:$0x1]  ;;  %v1491_v10 = vld [vmem:[%s9764_s27 + $0x2c0] sm:$0x1]  ;;  %v1450_v13 = vld [vmem:[%s9764_s27 + $0x178] sm:$0xff] }
 0x45c   : > { %1703 = vmatpush1.msra.mxu0 %v1459_v49  ;;  %1774 = vmatpush1.msra.mxu1 %v1461_v50  ;;  %v1451_v11 = vld [vmem:[%s9764_s27 + $0x180] sm:$0xff]  ;;  %v1478_v14 = vld [vmem:[%s9764_s27 + $0x258] sm:$0xff]  ;;  %v1437_v17 = vld [vmem:[%s9764_s27 + $0x110] sm:$0xff] }
 0x45d   : > { %1704 = vmatprep.subr.mxu0 %v1447_v51  ;;  %1775 = vmatprep.subr.mxu1 %v1449_v52  ;;  %v1479_v12 = vld [vmem:[%s9764_s27 + $0x260] sm:$0xff]  ;;  %v1438_v15 = vld [vmem:[%s9764_s27 + $0x118] sm:$0xff]  ;;  %v1465_v18 = vld [vmem:[%s9764_s27 + $0x1f0] sm:$0xff] }
 0x45e   : > { %1705 = vmatpush1.msra.mxu0 %v1446_v53  ;;  %1776 = vmatpush1.msra.mxu1 %v1448_v54  ;;  %v1466_v16 = vld [vmem:[%s9764_s27 + $0x1f8] sm:$0xff]  ;;  %v1453_v19 = vld [vmem:[%s9764_s27 + $0x190] sm:$0xff]  ;;  %v1452_v21 = vld [vmem:[%s9764_s27 + $0x188] sm:$0xff] }
 0x45f   : > { %1706 = vmatprep.subr.mxu0 %v1434_v2  ;;  %1777 = vmatprep.subr.mxu1 %v1436_v55  ;;  %v1425_v20 = vld [vmem:[%s9764_s27 + $0xb0] sm:$0xff]  ;;  %v1424_v22 = vld [vmem:[%s9764_s27 + $0xa8] sm:$0xff]  ;;  %v1439_v25 = vld [vmem:[%s9764_s27 + $0x120] sm:$0xff] }
 0x460   : > { %1707 = vmatpush1.msra.mxu0 %v1433_v56  ;;  %1778 = vmatpush1.msra.mxu1 %v1435_v57  ;;  %v1412_v23 = vld [vmem:[%s9764_s27 + $0x48] sm:$0xff]  ;;  %v1411_v26 = vld [vmem:[%s9764_s27 + $0x40] sm:$0xff]  ;;  %v1493_v28 = vld [vmem:[%s9764_s27 + $0x2d0] sm:$0x1] }
 0x461   : > { %1708 = vmatprep.subr.mxu0 %v1421_v58  ;;  %1779 = vmatprep.subr.mxu1 %v1423_v59  ;;  %v1440_v24 = vld [vmem:[%s9764_s27 + $0x128] sm:$0xff]  ;;  %v1427_v27 = vld [vmem:[%s9764_s27 + $0xc0] sm:$0xff]  ;;  %v1426_v29 = vld [vmem:[%s9764_s27 + $0xb8] sm:$0xff] }
 0x462   : > { %1709 = vmatpush1.msra.mxu0 %v1420_v60  ;;  %1780 = vmatpush1.msra.mxu1 %v1422_v61  ;;  %v1414_v30 = vld [vmem:[%s9764_s27 + $0x58] sm:$0xff]  ;;  %v1480_v31 = vld [vmem:[%s9764_s27 + $0x268] sm:$0xff]  ;;  %v1413_v32 = vld [vmem:[%s9764_s27 + $0x50] sm:$0xff] }
 0x463   : > { %1710 = vmatprep.subr.mxu0 %v1408_v62  ;;  %1744 = vmatprep.mubr.f32.mxu0 %v9410_v38  ;;  %v1467_v33 = vld [vmem:[%s9764_s27 + $0x200] sm:$0xff]  ;;  %v1454_v35 = vld [vmem:[%s9764_s27 + $0x198] sm:$0xff]  ;;  %v1441_v40 = vld [vmem:[%s9764_s27 + $0x130] sm:$0xff] }
 0x464   : > { %1711 = vmatpush1.msra.mxu0 %v1407_v63  ;;  %1781 = vmatprep.subr.mxu1 %v1410_v0  ;;  %v8044_v34 = vld [vmem:[%s9782_s0 + $0xe4] ss:$16 sps:$4 sm:$0xff]   ;;  %v8042_v36 = vld [vmem:[%s9782_s0 + $0xe0] ss:$16 sps:$4 sm:$0xff]  }
 0x465   : > { %7019 = vmatmul.mubr.msk.f32.vlgmr.msra.gmra.mxu0 %vm1494_vm7, %v9982_v37  ;;  %1782 = vmatpush1.msra.mxu1 %v1409_v1  ;;  %v8050_v39 = vld [vmem:[%s9782_s0 + $0xc4] ss:$16 sps:$4 sm:$0xff]   ;;  %v8048_v42 = vld [vmem:[%s9782_s0 + $0xc0] ss:$16 sps:$4 sm:$0xff]  }
 0x466   : > { %1815 = vmatprep.mubr.f32.mxu1 %v9410_v38  ;;  %7023 = vmatprep.subr.msk.mxu0 %vm1498_vm6, %v1490_v3  ;;  %v1428_v41 = vld [vmem:[%s9764_s27 + $0xc8] sm:$0xff]  ;;  %v1415_v43 = vld [vmem:[%s9764_s27 + $0x60] sm:$0xff] }
 0x467   : > { %7022 = vmatmul.mubr.msk.f32.vlgmr.msra.gmra.mxu1 %vm1494_vm7, %v9982_v37  ;;  %7024 = vmatpush1.msk.msra.mxu0 %vm1498_vm6, %v1489_v4  ;;  %v8056_v44 = vld [vmem:[%s9782_s0 + $0xa4] ss:$16 sps:$4 sm:$0xff]   ;;  %v8045_v46 = vld [vmem:[%s9782_s0 + $0x2e0] ss:$16 sps:$4 sm:$0xff]  }
 0x468   : > { %1842 = vmatprep.subr.mxu0 %v1477_v5  ;;  %7026 = vmatprep.subr.msk.mxu1 %vm1498_vm6, %v1492_v8  ;;  %v8047_v45 = vld [vmem:[%s9782_s0 + $0x2e4] ss:$16 sps:$4 sm:$0xff]   ;;  %v8054_v48 = vld [vmem:[%s9782_s0 + $0xa0] ss:$16 sps:$4 sm:$0xff]  }
 0x469   : > { %1843 = vmatpush1.msra.mxu0 %v1476_v6  ;;  %7027 = vmatpush1.msk.msra.mxu1 %vm1498_vm6, %v1491_v10  ;;  %v8053_v47 = vld [vmem:[%s9782_s0 + $0x2c4] ss:$16 sps:$4 sm:$0xff]   ;;  %v8051_v50 = vld [vmem:[%s9782_s0 + $0x2c0] ss:$16 sps:$4 sm:$0xff]  }
 0x46a   : > { %1844 = vmatprep.subr.mxu0 %v1464_v7  ;;  %1913 = vmatprep.subr.mxu1 %v1479_v12  ;;  %v8062_v49 = vld [vmem:[%s9782_s0 + $0x84] ss:$16 sps:$4 sm:$0xff]   ;;  %v8060_v51 = vld [vmem:[%s9782_s0 + $0x80] ss:$16 sps:$4 sm:$0xff]  }
 0x46b   : > { %1845 = vmatpush1.msra.mxu0 %v1463_v9  ;;  %1914 = vmatpush1.msra.mxu1 %v1478_v14  ;;  %v8068_v52 = vld [vmem:[%s9782_s0 + $0x64] ss:$16 sps:$4 sm:$0xff]   ;;  %v8057_v53 = vld [vmem:[%s9782_s0 + $0x2a0] ss:$16 sps:$4 sm:$0xff]  }
 0x46c   : > { %1846 = vmatprep.subr.mxu0 %v1451_v11  ;;  %1915 = vmatprep.subr.mxu1 %v1466_v16  ;;  %v8066_v54 = vld [vmem:[%s9782_s0 + $0x60] ss:$16 sps:$4 sm:$0xff]   ;;  %v8074_v2 = vld [vmem:[%s9782_s0 + $0x44] ss:$16 sps:$4 sm:$0xff]  }
 0x46d   : > { %1847 = vmatpush1.msra.mxu0 %v1450_v13  ;;  %1916 = vmatpush1.msra.mxu1 %v1465_v18  ;;  %v8063_v55 = vld [vmem:[%s9782_s0 + $0x280] ss:$16 sps:$4 sm:$0xff]   ;;  %v8071_v56 = vld [vmem:[%s9782_s0 + $0x264] ss:$16 sps:$4 sm:$0xff]  }
 0x46e   : > { %1848 = vmatprep.subr.mxu0 %v1438_v15  ;;  %1917 = vmatprep.subr.mxu1 %v1453_v19  ;;  %v8072_v57 = vld [vmem:[%s9782_s0 + $0x40] ss:$16 sps:$4 sm:$0xff]   ;;  %v8080_v58 = vld [vmem:[%s9782_s0 + $0x24] ss:$16 sps:$4 sm:$0xff]  }
 0x46f   : > { %1849 = vmatpush1.msra.mxu0 %v1437_v17  ;;  %1918 = vmatpush1.msra.mxu1 %v1452_v21  ;;  %v8069_v59 = vld [vmem:[%s9782_s0 + $0x260] ss:$16 sps:$4 sm:$0xff]   ;;  %v8077_v60 = vld [vmem:[%s9782_s0 + $0x244] ss:$16 sps:$4 sm:$0xff]  }
 0x470   : > { %1850 = vmatprep.subr.mxu0 %v1425_v20  ;;  %1886 = vmatprep.mubr.f32.mxu0 %v9410_v38  ;;  %v8078_v61 = vld [vmem:[%s9782_s0 + $0x20] ss:$16 sps:$4 sm:$0xff]   ;;  %v8086_v62 = vld [vmem:[%s9782_s0 + $0x4] ss:$16 sps:$4 sm:$0xff]  }
 0x471   : > { %1851 = vmatpush1.msra.mxu0 %v1424_v22  ;;  %1919 = vmatprep.subr.mxu1 %v1440_v24  ;;  %v8075_v63 = vld [vmem:[%s9782_s0 + $0x240] ss:$16 sps:$4 sm:$0xff]   ;;  %v8083_v0 = vld [vmem:[%s9782_s0 + $0x224] ss:$16 sps:$4 sm:$0xff]  }
 0x472   : > { %1852 = vmatprep.subr.mxu0 %v1412_v23  ;;  %1920 = vmatpush1.msra.mxu1 %v1439_v25  ;;  %v8084_v1 = vld [vmem:[%s9782_s0] ss:$16 sps:$4 sm:$0xff]   ;;  %v8092_v3 = vld [vmem:[%s9782_s0 + $0x1e4] ss:$16 sps:$4 sm:$0xff]  }
 0x473   : > { %1853 = vmatpush1.msra.mxu0 %v1411_v26  ;;  %1921 = vmatprep.subr.mxu1 %v1427_v27  ;;  %v8081_v4 = vld [vmem:[%s9782_s0 + $0x220] ss:$16 sps:$4 sm:$0xff]   ;;  %v8089_v5 = vld [vmem:[%s9782_s0 + $0x204] ss:$16 sps:$4 sm:$0xff]  }
 0x474   : > { %7823 = vmatprep.subr.mxu0 %v9410_v38  ;;  %7025 = vmatmul.mubr.msk.f32.vlgmr.msra.gmra.mxu0 %vm1494_vm7, %v9982_v37  ;;  %v8090_v6 = vld [vmem:[%s9782_s0 + $0x1e0] ss:$16 sps:$4 sm:$0xff]   ;;  %v8098_v7 = vld [vmem:[%s9782_s0 + $0x1c4] ss:$16 sps:$4 sm:$0xff]  }
 0x475   : > { %7824 = vmatpush3.msk.msra.mxu0 %vm1498_vm6, %v1493_v28  ;;  %1922 = vmatpush1.msra.mxu1 %v1426_v29  ;;  %v8087_v8 = vld [vmem:[%s9782_s0 + $0x200] ss:$16 sps:$4 sm:$0xff]   ;;  %v8095_v9 = vld [vmem:[%s9782_s0 + $0x3e4] ss:$16 sps:$4 sm:$0xff]  }
 0x476   : > { %7825 = vmatprep.subr.mxu0 %v9410_v38  ;;  %1923 = vmatprep.subr.mxu1 %v1414_v30  ;;  %v8096_v10 = vld [vmem:[%s9782_s0 + $0x1c0] ss:$16 sps:$4 sm:$0xff]   ;;  %v8104_v11 = vld [vmem:[%s9782_s0 + $0x1a4] ss:$16 sps:$4 sm:$0xff]  }
 0x477   : > { %7826 = vmatpush3.msra.mxu0 %v1480_v31  ;;  %1924 = vmatpush1.msra.mxu1 %v1413_v32  ;;  %v8093_v12 = vld [vmem:[%s9782_s0 + $0x3e0] ss:$16 sps:$4 sm:$0xff]   ;;  %v8101_v13 = vld [vmem:[%s9782_s0 + $0x3c4] ss:$16 sps:$4 sm:$0xff]  }
 0x478   : > { %7827 = vmatprep.subr.mxu0 %v9410_v38  ;;  %1957 = vmatprep.mubr.f32.mxu1 %v9410_v38  ;;  %v8102_v14 = vld [vmem:[%s9782_s0 + $0x1a0] ss:$16 sps:$4 sm:$0xff]   ;;  %v8110_v15 = vld [vmem:[%s9782_s0 + $0x184] ss:$16 sps:$4 sm:$0xff]  }
 0x479   : > { %7828 = vmatpush3.msra.mxu0 %v1467_v33  ;;  %7028 = vmatmul.mubr.msk.f32.vlgmr.msra.gmra.mxu1 %vm1494_vm7, %v9982_v37  ;;  %v8099_v16 = vld [vmem:[%s9782_s0 + $0x3c0] ss:$16 sps:$4 sm:$0xff]   ;;  %v8107_v17 = vld [vmem:[%s9782_s0 + $0x3a4] ss:$16 sps:$4 sm:$0xff]  }
 0x47a   : > { %7829 = vmatprep.subr.mxu0 %v9410_v38  ;;  %7837 = vmatprep.mubr.msk.f32.mxu0 %vm9411_vm8, %v9410_v38  ;;  %v8108_v18 = vld [vmem:[%s9782_s0 + $0x180] ss:$16 sps:$4 sm:$0xff]   ;;  %v8116_v19 = vld [vmem:[%s9782_s0 + $0x164] ss:$16 sps:$4 sm:$0xff]  }
 0x47b   : > { %7830 = vmatpush3.msra.mxu0 %v1454_v35  ;;  %4573 = vmatprep.subr.bf16.mxu1 %v8044_v34  ;;  %v8105_v20 = vld [vmem:[%s9782_s0 + $0x3a0] ss:$16 sps:$4 sm:$0xff]   ;;  %v8113_v21 = vld [vmem:[%s9782_s0 + $0x384] ss:$16 sps:$4 sm:$0xff]  }
 0x47c   : > { %7831 = vmatprep.subr.mxu0 %v9410_v38  ;;  %4574 = vmatpush1.bf16.msra.mxu1 %v8042_v36  ;;  %v8114_v22 = vld [vmem:[%s9782_s0 + $0x160] ss:$16 sps:$4 sm:$0xff]   ;;  %v8122_v23 = vld [vmem:[%s9782_s0 + $0x144] ss:$16 sps:$4 sm:$0xff]  }
 0x47d   : > { %7832 = vmatpush3.msra.mxu0 %v1441_v40  ;;  %4575 = vmatprep.subr.bf16.mxu1 %v8050_v39  ;;  %v8111_v24 = vld [vmem:[%s9782_s0 + $0x380] ss:$16 sps:$4 sm:$0xff]   ;;  %v8119_v25 = vld [vmem:[%s9782_s0 + $0x364] ss:$16 sps:$4 sm:$0xff]  }
 0x47e   : > { %7833 = vmatprep.subr.mxu0 %v9410_v38  ;;  %v8120_v26 = vld [vmem:[%s9782_s0 + $0x140] ss:$16 sps:$4 sm:$0xff]   ;;  %v8128_v27 = vld [vmem:[%s9782_s0 + $0x124] ss:$16 sps:$4 sm:$0xff]  }
 0x47f   : > { %7834 = vmatpush3.msra.mxu0 %v1428_v41  ;;  %v8117_v28 = vld [vmem:[%s9782_s0 + $0x360] ss:$16 sps:$4 sm:$0xff]   ;;  %v8125_v29 = vld [vmem:[%s9782_s0 + $0x344] ss:$16 sps:$4 sm:$0xff]  }
 0x480   : > { %7835 = vmatprep.subr.mxu0 %v9410_v38  ;;  %4576 = vmatpush1.bf16.msra.mxu1 %v8048_v42  ;;  %v8059_v38 = vld [vmem:[%s9782_s0 + $0x2a4] ss:$16 sps:$4 sm:$0xff]   ;;  %v8126_v30 = vld [vmem:[%s9782_s0 + $0x120] ss:$16 sps:$4 sm:$0xff]  }
 0x481   : > { %7836 = vmatpush3.msra.mxu0 %v1415_v43  ;;  %4577 = vmatprep.subr.bf16.mxu1 %v8056_v44  ;;  %v8134_v31 = vld [vmem:[%s9782_s0 + $0x104] ss:$16 sps:$4 sm:$0xff]   ;;  %v8123_v32 = vld [vmem:[%s9782_s0 + $0x340] ss:$16 sps:$4 sm:$0xff]  }
 0x482   : > { %4614 = vmatprep.subr.bf16.mxu0 %v8047_v45  ;;  %7838 = vmatmul.mubr.msk.f32.vlgmr.msra.gmra.mxu0 %vm1494_vm7, %v9982_v37  ;;  %v8065_v37 = vld [vmem:[%s9782_s0 + $0x284] ss:$16 sps:$4 sm:$0xff]   ;;  %v8132_v34 = vld [vmem:[%s9782_s0 + $0x100] ss:$16 sps:$4 sm:$0xff]  }
 0x483   : > { %4615 = vmatpush1.bf16.msra.mxu0 %v8045_v46  ;;  %v8131_v33 = vld [vmem:[%s9782_s0 + $0x324] ss:$16 sps:$4 sm:$0xff]   ;;  %v8129_v36 = vld [vmem:[%s9782_s0 + $0x320] ss:$16 sps:$4 sm:$0xff]  }
 0x484   : > { %4616 = vmatprep.subr.bf16.mxu0 %v8053_v47  ;;  %4578 = vmatpush1.bf16.msra.mxu1 %v8054_v48  ;;  %v8140_v35 = vld [vmem:[%s9782_s0 + $0x4e4] ss:$16 sps:$4 sm:$0xff]   ;;  %v8135_v40 = vld [vmem:[%s9782_s0 + $0x300] ss:$16 sps:$4 sm:$0xff]  }
 0x485   : > { %4579 = vmatprep.subr.bf16.mxu1 %v8062_v49  ;;  %v8137_v39 = vld [vmem:[%s9782_s0 + $0x304] ss:$16 sps:$4 sm:$0xff]   ;;  %v2034_v42 = vld [vmem:[%s9816_s19] sm:$0xff]  ;;  %v2036_v43 = vld [vmem:[%s9816_s19 + $0x10] sm:$0xff] }
 0x486   : > { %v8143_v41 = vld [vmem:[%s9782_s0 + $0x6e4] ss:$16 sps:$4 sm:$0xff]  }
 0x487   : > { %4617 = vmatpush1.bf16.msra.mxu0 %v8051_v50  ;;  %v2035_v44 = vld [vmem:[%s9816_s19 + $0x8] sm:$0xff]  ;;  %v2037_v45 = vld [vmem:[%s9816_s19 + $0x18] sm:$0xff] }
 0x488   : > { %4618 = vmatprep.subr.bf16.mxu0 %v8059_v38  ;;  %4580 = vmatpush1.bf16.msra.mxu1 %v8060_v51 }
 0x489   : > { %4581 = vmatprep.subr.bf16.mxu1 %v8068_v52 }
 0x48b   : > { %4619 = vmatpush1.bf16.msra.mxu0 %v8057_v53  ;;  %v8138_v53 = vld [vmem:[%s9782_s0 + $0x4e0] ss:$16 sps:$4 sm:$0xff]  }
 0x48c   : > { %4620 = vmatprep.subr.bf16.mxu0 %v8065_v37  ;;  %4582 = vmatpush1.bf16.msra.mxu1 %v8066_v54  ;;  %v8141_v37 = vld [vmem:[%s9782_s0 + $0x6e0] ss:$16 sps:$4 sm:$0xff]  }
 0x48d   : > { %4583 = vmatprep.subr.bf16.mxu1 %v8074_v2 }
 0x48f   : > { %4621 = vmatpush1.bf16.msra.mxu0 %v8063_v55 }
 0x490   : > { %4622 = vmatprep.subr.bf16.mxu0 %v8071_v56  ;;  %4584 = vmatpush1.bf16.msra.mxu1 %v8072_v57  ;;  %v8146_v57 = vld [vmem:[%s9782_s0 + $0x4c4] ss:$16 sps:$4 sm:$0xff]  }
 0x491   : > { %4585 = vmatprep.subr.bf16.mxu1 %v8080_v58  ;;  %v8149_v58 = vld [vmem:[%s9782_s0 + $0x6c4] ss:$16 sps:$4 sm:$0xff]  }
 0x493   : > { %4623 = vmatpush1.bf16.msra.mxu0 %v8069_v59  ;;  %v8144_v59 = vld [vmem:[%s9782_s0 + $0x4c0] ss:$16 sps:$4 sm:$0xff]  }
 0x494   : > { %4624 = vmatprep.subr.bf16.mxu0 %v8077_v60  ;;  %4586 = vmatpush1.bf16.msra.mxu1 %v8078_v61  ;;  %v8147_v60 = vld [vmem:[%s9782_s0 + $0x6c0] ss:$16 sps:$4 sm:$0xff]   ;;  %v8152_v61 = vld [vmem:[%s9782_s0 + $0x4a4] ss:$16 sps:$4 sm:$0xff]  }
 0x495   : > { %4587 = vmatprep.subr.bf16.mxu1 %v8086_v62  ;;  %v8155_v62 = vld [vmem:[%s9782_s0 + $0x6a4] ss:$16 sps:$4 sm:$0xff]  }
 0x497   : > { %4625 = vmatpush1.bf16.msra.mxu0 %v8075_v63  ;;  %v8150_v63 = vld [vmem:[%s9782_s0 + $0x4a0] ss:$16 sps:$4 sm:$0xff]  }
 0x498   : > { %4626 = vmatprep.subr.bf16.mxu0 %v8083_v0  ;;  %4588 = vmatpush1.bf16.msra.mxu1 %v8084_v1  ;;  %v8153_v0 = vld [vmem:[%s9782_s0 + $0x6a0] ss:$16 sps:$4 sm:$0xff]   ;;  %v8158_v1 = vld [vmem:[%s9782_s0 + $0x484] ss:$16 sps:$4 sm:$0xff]  }
 0x499   : > { %4589 = vmatprep.subr.bf16.mxu1 %v8092_v3  ;;  %v8161_v3 = vld [vmem:[%s9782_s0 + $0x684] ss:$16 sps:$4 sm:$0xff]  }
 0x49b   : > { %4627 = vmatpush1.bf16.msra.mxu0 %v8081_v4  ;;  %v2039_v4 = vld [vmem:[%s9816_s19 + $0x28] sm:$0xff] }
 0x49c   : > { %4628 = vmatprep.subr.bf16.mxu0 %v8089_v5  ;;  %4590 = vmatpush2.bf16.msra.mxu1 %v8090_v6  ;;  %v8156_v5 = vld [vmem:[%s9782_s0 + $0x480] ss:$16 sps:$4 sm:$0xff]  }
 0x49d   : > { %4591 = vmatprep.subr.bf16.mxu1 %v8098_v7  ;;  %v8159_v7 = vld [vmem:[%s9782_s0 + $0x680] ss:$16 sps:$4 sm:$0xff]  }
 0x49f   : > { %4629 = vmatpush1.bf16.msra.mxu0 %v8087_v8 }
 0x4a0   : > { %4630 = vmatprep.subr.bf16.mxu0 %v8095_v9  ;;  %4592 = vmatpush2.bf16.msra.mxu1 %v8096_v10  ;;  %v2041_v10 = vld [vmem:[%s9816_s19 + $0x38] sm:$0xff] }
 0x4a1   : > { %4593 = vmatprep.subr.bf16.mxu1 %v8104_v11  ;;  %v8164_v11 = vld [vmem:[%s9782_s0 + $0x464] ss:$16 sps:$4 sm:$0xff]  }
 0x4a3   : > { %4631 = vmatpush2.bf16.msra.mxu0 %v8093_v12  ;;  %v8167_v12 = vld [vmem:[%s9782_s0 + $0x664] ss:$16 sps:$4 sm:$0xff]  }
 0x4a4   : > { %4632 = vmatprep.subr.bf16.mxu0 %v8101_v13  ;;  %4594 = vmatpush2.bf16.msra.mxu1 %v8102_v14 }
 0x4a5   : > { %4595 = vmatprep.subr.bf16.mxu1 %v8110_v15 }
 0x4a7   : > { %4633 = vmatpush2.bf16.msra.mxu0 %v8099_v16 }
 0x4a8   : > { %4634 = vmatprep.subr.bf16.mxu0 %v8107_v17  ;;  %4596 = vmatpush2.bf16.msra.mxu1 %v8108_v18  ;;  %v8162_v17 = vld [vmem:[%s9782_s0 + $0x460] ss:$16 sps:$4 sm:$0xff]  }
 0x4a9   : > { %4597 = vmatprep.subr.bf16.mxu1 %v8116_v19  ;;  %v8165_v18 = vld [vmem:[%s9782_s0 + $0x660] ss:$16 sps:$4 sm:$0xff]   ;;  %v8170_v19 = vld [vmem:[%s9782_s0 + $0x444] ss:$16 sps:$4 sm:$0xff]  }
 0x4ab   : > { %4635 = vmatpush2.bf16.msra.mxu0 %v8105_v20  ;;  %v8173_v20 = vld [vmem:[%s9782_s0 + $0x644] ss:$16 sps:$4 sm:$0xff]  }
 0x4ac   : > { %4636 = vmatprep.subr.bf16.mxu0 %v8113_v21  ;;  %4598 = vmatpush2.bf16.msra.mxu1 %v8114_v22  ;;  %v8168_v22 = vld [vmem:[%s9782_s0 + $0x440] ss:$16 sps:$4 sm:$0xff]  }
 0x4ad   : > { %4599 = vmatprep.subr.bf16.mxu1 %v8122_v23  ;;  %v8171_v23 = vld [vmem:[%s9782_s0 + $0x640] ss:$16 sps:$4 sm:$0xff]  }
 0x4af   : > { %4637 = vmatpush2.bf16.msra.mxu0 %v8111_v24  ;;  %v8176_v24 = vld [vmem:[%s9782_s0 + $0x424] ss:$16 sps:$4 sm:$0xff]  }
 0x4b0   : > { %4638 = vmatprep.subr.bf16.mxu0 %v8119_v25  ;;  %4600 = vmatpush2.bf16.msra.mxu1 %v8120_v26  ;;  %v8179_v25 = vld [vmem:[%s9782_s0 + $0x624] ss:$16 sps:$4 sm:$0xff]   ;;  %v8174_v26 = vld [vmem:[%s9782_s0 + $0x420] ss:$16 sps:$4 sm:$0xff]  }
 0x4b1   : > { %4601 = vmatprep.subr.bf16.mxu1 %v8128_v27  ;;  %v8177_v27 = vld [vmem:[%s9782_s0 + $0x620] ss:$16 sps:$4 sm:$0xff]  }
 0x4b3   : > { %4639 = vmatpush2.bf16.msra.mxu0 %v8117_v28  ;;  %v8182_v28 = vld [vmem:[%s9782_s0 + $0x404] ss:$16 sps:$4 sm:$0xff]  }
 0x4b4   : > { %4640 = vmatprep.subr.bf16.mxu0 %v8125_v29  ;;  %4602 = vmatpush2.bf16.msra.mxu1 %v8126_v30  ;;  %v8185_v29 = vld [vmem:[%s9782_s0 + $0x604] ss:$16 sps:$4 sm:$0xff]   ;;  %v8180_v30 = vld [vmem:[%s9782_s0 + $0x400] ss:$16 sps:$4 sm:$0xff]  }
 0x4b5   : > { %4603 = vmatprep.subr.bf16.mxu1 %v8134_v31  ;;  %v8183_v31 = vld [vmem:[%s9782_s0 + $0x600] ss:$16 sps:$4 sm:$0xff]  }
 0x4b7   : > { %4641 = vmatpush2.bf16.msra.mxu0 %v8123_v32  ;;  %v8188_v32 = vld [vmem:[%s9782_s0 + $0x5e4] ss:$16 sps:$4 sm:$0xff]  }
 0x4b8   : > { %4642 = vmatprep.subr.bf16.mxu0 %v8131_v33  ;;  %4604 = vmatpush2.bf16.msra.mxu1 %v8132_v34  ;;  %v8191_v33 = vld [vmem:[%s9782_s0 + $0x7e4] ss:$16 sps:$4 sm:$0xff]   ;;  %v8186_v34 = vld [vmem:[%s9782_s0 + $0x5e0] ss:$16 sps:$4 sm:$0xff]  }
 0x4b9   : > { %4655 = vmatprep.subr.bf16.mxu1 %v8140_v35  ;;  %v8189_v35 = vld [vmem:[%s9782_s0 + $0x7e0] ss:$16 sps:$4 sm:$0xff]  }
 0x4bb   : > { %4643 = vmatpush2.bf16.msra.mxu0 %v8129_v36  ;;  %v8194_v36 = vld [vmem:[%s9782_s0 + $0x5c4] ss:$16 sps:$4 sm:$0xff]  }
 0x4bc   : > { %4644 = vmatprep.subr.bf16.mxu0 %v8137_v39  ;;  %v8197_v39 = vld [vmem:[%s9782_s0 + $0x7c4] ss:$16 sps:$4 sm:$0xff]  }
 0x4bf   : > { %4645 = vmatpush2.bf16.msra.mxu0 %v8135_v40 }
 0x4c0   : > { %4696 = vmatprep.subr.bf16.mxu0 %v8143_v41  ;;  %v8192_v41 = vld [vmem:[%s9782_s0 + $0x5c0] ss:$16 sps:$4 sm:$0xff]  }
 0x516   : > { %v1604_v46 = vpop.f32.mrf.mxu0  ;;  %v1675_v47 = vpop.f32.mrf.mxu1 }
 0x517   : > { %v2049_v48 = vmul.f32 %v2036_v43, %v1675_v47  ;;  %v2047_v49 = vmul.f32 %v2034_v42, %v1604_v46  ;;  %v8195_v42 = vld [vmem:[%s9782_s0 + $0x7c0] ss:$16 sps:$4 sm:$0xff]   ;;  %v8200_v43 = vld [vmem:[%s9782_s0 + $0x5a4] ss:$16 sps:$4 sm:$0xff]  }
 0x518   : > { %v1606_v50 = vpop.f32.mrf.mxu0  ;;  %v1677_v38 = vpop.f32.mrf.mxu1  ;;  %v8198_v47 = vld [vmem:[%s9782_s0 + $0x5a0] ss:$16 sps:$4 sm:$0xff]  }
 0x519   : > { %v2048_v51 = vmul.f32 %v2035_v44, %v1606_v50  ;;  %v2050_v52 = vmul.f32 %v2037_v45, %v1677_v38  ;;  %v10156_v54 = vpack.c.bf16 %v2049_v48, %v2049_v48  ;;  %v10162_v56 = vpack.c.bf16 %v2047_v49, %v2047_v49  ;;  %v8203_v44 = vld [vmem:[%s9782_s0 + $0x7a4] ss:$16 sps:$4 sm:$0xff]   ;;  %v8201_v48 = vld [vmem:[%s9782_s0 + $0x7a0] ss:$16 sps:$4 sm:$0xff]  }
 0x51a   : > { %v8206_v49 = vld [vmem:[%s9782_s0 + $0x584] ss:$16 sps:$4 sm:$0xff]  }
 0x51b   : > { %v10158_v2 = vpack.c.bf16 %v2048_v51, %v2048_v51  ;;  %v10160_v55 = vpack.c.bf16 %v2050_v52, %v2050_v52  ;;  %v8209_v50 = vld [vmem:[%s9782_s0 + $0x784] ss:$16 sps:$4 sm:$0xff]   ;;  %v8204_v51 = vld [vmem:[%s9782_s0 + $0x580] ss:$16 sps:$4 sm:$0xff]  }
 0x51c   : > { %v8207_v52 = vld [vmem:[%s9782_s0 + $0x780] ss:$16 sps:$4 sm:$0xff]  }
 0x51d   : > { %4605 = vmatprep.mubr.bf16.mxu1 %v10158_v2  ;;  %4646 = vmatprep.mubr.bf16.mxu0 %v10160_v55 }
 0x51e   : > { %4606 = vmatmul.mubr.bf16.vlgmr.msra.gmra.mxu1 %v10162_v56  ;;  %4647 = vmatmul.mubr.bf16.vlgmr.msra.gmra.mxu0 %v10156_v54 }
 0x51f   : > { %4656 = vmatpush1.bf16.msra.mxu1 %v8138_v53  ;;  %4697 = vmatpush1.bf16.msra.mxu0 %v8141_v37  ;;  %v8212_v53 = vld [vmem:[%s9782_s0 + $0x564] ss:$16 sps:$4 sm:$0xff]  }
 0x520   : > { %4657 = vmatprep.subr.bf16.mxu1 %v8146_v57  ;;  %4698 = vmatprep.subr.bf16.mxu0 %v8149_v58  ;;  %v8215_v37 = vld [vmem:[%s9782_s0 + $0x764] ss:$16 sps:$4 sm:$0xff]   ;;  %v8210_v57 = vld [vmem:[%s9782_s0 + $0x560] ss:$16 sps:$4 sm:$0xff]  }
 0x521   : > { %v8213_v58 = vld [vmem:[%s9782_s0 + $0x760] ss:$16 sps:$4 sm:$0xff]  }
 0x523   : > { %4658 = vmatpush1.bf16.msra.mxu1 %v8144_v59  ;;  %4699 = vmatpush1.bf16.msra.mxu0 %v8147_v60  ;;  %v8218_v59 = vld [vmem:[%s9782_s0 + $0x544] ss:$16 sps:$4 sm:$0xff]  }
 0x524   : > { %4659 = vmatprep.subr.bf16.mxu1 %v8152_v61  ;;  %4700 = vmatprep.subr.bf16.mxu0 %v8155_v62  ;;  %v8221_v60 = vld [vmem:[%s9782_s0 + $0x744] ss:$16 sps:$4 sm:$0xff]   ;;  %v8216_v61 = vld [vmem:[%s9782_s0 + $0x540] ss:$16 sps:$4 sm:$0xff]  }
 0x525   : > { %v10180_v6 = vpop.f32.mrf.mxu0  ;;  %v8219_v62 = vld [vmem:[%s9782_s0 + $0x740] ss:$16 sps:$4 sm:$0xff]  }
 0x527   : > { %4660 = vmatpush1.bf16.msra.mxu1 %v8150_v63  ;;  %4701 = vmatpush1.bf16.msra.mxu0 %v8153_v0  ;;  %v10183_v8 = vpop.f32.mrf.mxu1  ;;  %v1748_v9 = vpop.f32.mrf.mxu0  ;;  %v8224_v63 = vld [vmem:[%s9782_s0 + $0x524] ss:$16 sps:$4 sm:$0xff]  }
 0x528   : > { %4661 = vmatprep.subr.bf16.mxu1 %v8158_v1  ;;  %4702 = vmatprep.subr.bf16.mxu0 %v8161_v3  ;;  %v2052_v13 = vmul.f32 %v2039_v4, %v1748_v9  ;;  %v8227_v0 = vld [vmem:[%s9782_s0 + $0x724] ss:$16 sps:$4 sm:$0xff]   ;;  %v2040_v3 = vld [vmem:[%s9816_s19 + $0x30] sm:$0xff] }
 0x529   : > { %v1819_v14 = vpop.f32.mrf.mxu1  ;;  %v8222_v4 = vld [vmem:[%s9782_s0 + $0x520] ss:$16 sps:$4 sm:$0xff]   ;;  %v8233_v9 = vld [vmem:[%s9782_s0 + $0x704] ss:$16 sps:$4 sm:$0xff]  }
 0x52a   : > { %v10188_v15 = vpack.c.bf16 %v2052_v13, %v2052_v13  ;;  %v2054_v16 = vmul.f32 %v2041_v10, %v1819_v14  ;;  %v2038_v10 = vld [vmem:[%s9816_s19 + $0x20] sm:$0xff]  ;;  %v2045_v14 = vld [vmem:[%s9816_s19 + $0x58] sm:$0xff] }
 0x52b   : > { %4662 = vmatpush1.bf16.msra.mxu1 %v8156_v5  ;;  %4703 = vmatpush1.bf16.msra.mxu0 %v8159_v7  ;;  %v8225_v5 = vld [vmem:[%s9782_s0 + $0x720] ss:$16 sps:$4 sm:$0xff]   ;;  %v8230_v7 = vld [vmem:[%s9782_s0 + $0x504] ss:$16 sps:$4 sm:$0xff]  }
 0x52c   : > { %4663 = vmatprep.subr.bf16.mxu1 %v8164_v11  ;;  %4704 = vmatprep.subr.bf16.mxu0 %v8167_v12  ;;  %v10194_v21 = vpack.c.bf16 %v2054_v16, %v2054_v16  ;;  %v2053_v11 = vmul.f32 %v2040_v3, %v10183_v8  ;;  %v2043_v12 = vld [vmem:[%s9816_s19 + $0x48] sm:$0xff] }
 0x52d   : > { %4687 = vmatprep.mubr.bf16.mxu1 %v10188_v15  ;;  %v8228_v16 = vld [vmem:[%s9782_s0 + $0x500] ss:$16 sps:$4 sm:$0xff]   ;;  %v8290_v3 = vld [vmem:[%s9782_s0 + $0x9c4] ss:$16 sps:$4 sm:$0xff]  }
 0x52e   : > { %4728 = vmatprep.mubr.bf16.mxu0 %v10194_v21  ;;  %v10254_v8 = vpack.c.bf16 %v2053_v11, %v2053_v11  ;;  %v8294_v11 = vld [vmem:[%s9782_s0 + $0x9a0] ss:$16 sps:$4 sm:$0xff]  }
 0x52f   : > { %4664 = vmatpush1.bf16.msra.mxu1 %v8162_v17  ;;  %4705 = vmatpush1.bf16.msra.mxu0 %v8165_v18  ;;  %v8231_v17 = vld [vmem:[%s9782_s0 + $0x700] ss:$16 sps:$4 sm:$0xff]   ;;  %v2051_v18 = vmul.f32 %v2038_v10, %v10180_v6  ;;  %v8242_v6 = vld [vmem:[%s9782_s0 + $0x8c4] ss:$16 sps:$4 sm:$0xff]  }
 0x530   : > { %4665 = vmatprep.subr.bf16.mxu1 %v8170_v19  ;;  %4706 = vmatprep.subr.bf16.mxu0 %v8173_v20  ;;  %v8236_v19 = vld [vmem:[%s9782_s0 + $0x8e4] ss:$16 sps:$4 sm:$0xff]  }
 0x531   : > { %v8239_v20 = vld [vmem:[%s9782_s0 + $0xae4] ss:$16 sps:$4 sm:$0xff]  }
 0x532   : > { %v8299_v10 = vld [vmem:[%s9782_s0 + $0xba4] ss:$16 sps:$4 sm:$0xff]  }
 0x533   : > { %4666 = vmatpush1.bf16.msra.mxu1 %v8168_v22  ;;  %4707 = vmatpush1.bf16.msra.mxu0 %v8171_v23 }
 0x534   : > { %4667 = vmatprep.subr.bf16.mxu1 %v8176_v24  ;;  %4708 = vmatprep.subr.bf16.mxu0 %v8179_v25  ;;  %v10214_v40 = vpop.f32.mrf.mxu0  ;;  %v8234_v24 = vld [vmem:[%s9782_s0 + $0x8e0] ss:$16 sps:$4 sm:$0xff]  }
 0x535   : > { %v8237_v25 = vld [vmem:[%s9782_s0 + $0xae0] ss:$16 sps:$4 sm:$0xff]  }
 0x536   : > { %v1890_v45 = vpop.f32.mrf.mxu0 }
 0x537   : > { %4668 = vmatpush1.bf16.msra.mxu1 %v8174_v26  ;;  %4709 = vmatpush1.bf16.msra.mxu0 %v8177_v27  ;;  %v2056_v22 = vmul.f32 %v2043_v12, %v1890_v45  ;;  %v10258_v26 = vpack.c.bf16 %v2051_v18, %v2051_v18  ;;  %v8245_v27 = vld [vmem:[%s9782_s0 + $0xac4] ss:$16 sps:$4 sm:$0xff]   ;;  %v8258_v45 = vld [vmem:[%s9782_s0 + $0x860] ss:$16 sps:$4 sm:$0xff]  }
 0x538   : > { %4669 = vmatprep.subr.bf16.mxu1 %v8182_v28  ;;  %4710 = vmatprep.subr.bf16.mxu0 %v8185_v29  ;;  %v8297_v12 = vld [vmem:[%s9782_s0 + $0xba0] ss:$16 sps:$4 sm:$0xff]   ;;  %v8308_v18 = vld [vmem:[%s9782_s0 + $0x964] ss:$16 sps:$4 sm:$0xff]  }
 0x539   : > { %v10238_v1 = vpop.f32.mrf.mxu1  ;;  %v10262_v28 = vpack.c.bf16 %v2056_v22, %v2056_v22  ;;  %v8309_v22 = vld [vmem:[%s9782_s0 + $0xb60] ss:$16 sps:$4 sm:$0xff]  }
 0x53b   : > { %4670 = vmatpush1.bf16.msra.mxu1 %v8180_v30  ;;  %4711 = vmatpush1.bf16.msra.mxu0 %v8183_v31  ;;  %v1961_v13 = vpop.f32.mrf.mxu1  ;;  %v8240_v30 = vld [vmem:[%s9782_s0 + $0x8c0] ss:$16 sps:$4 sm:$0xff]  }
 0x53c   : > { %4671 = vmatprep.subr.bf16.mxu1 %v8188_v32  ;;  %4712 = vmatprep.subr.bf16.mxu0 %v8191_v33  ;;  %v2058_v23 = vmul.f32 %v2045_v14, %v1961_v13  ;;  %v8243_v31 = vld [vmem:[%s9782_s0 + $0xac0] ss:$16 sps:$4 sm:$0xff]   ;;  %v8248_v32 = vld [vmem:[%s9782_s0 + $0x8a4] ss:$16 sps:$4 sm:$0xff]  }
 0x53d   : > { %v8251_v33 = vld [vmem:[%s9782_s0 + $0xaa4] ss:$16 sps:$4 sm:$0xff]  }
 0x53e   : > { %v10264_v29 = vpack.c.bf16 %v2058_v23, %v2058_v23  ;;  %v8302_v13 = vld [vmem:[%s9782_s0 + $0x984] ss:$16 sps:$4 sm:$0xff]  }
 0x53f   : > { %4672 = vmatpush2.bf16.msra.mxu1 %v8186_v34  ;;  %4713 = vmatpush2.bf16.msra.mxu0 %v8189_v35  ;;  %v8246_v34 = vld [vmem:[%s9782_s0 + $0x8a0] ss:$16 sps:$4 sm:$0xff]   ;;  %v8305_v14 = vld [vmem:[%s9782_s0 + $0xb84] ss:$16 sps:$4 sm:$0xff]  }
 0x540   : > { %4673 = vmatprep.subr.bf16.mxu1 %v8194_v36  ;;  %4714 = vmatprep.subr.bf16.mxu0 %v8197_v39  ;;  %v8249_v35 = vld [vmem:[%s9782_s0 + $0xaa0] ss:$16 sps:$4 sm:$0xff]   ;;  %v8254_v36 = vld [vmem:[%s9782_s0 + $0x884] ss:$16 sps:$4 sm:$0xff]  }
 0x541   : > { %v8257_v39 = vld [vmem:[%s9782_s0 + $0xa84] ss:$16 sps:$4 sm:$0xff]  }
 0x542   : > { %v10220_v46 = vpop.f32.mrf.mxu0  ;;  %v8314_v23 = vld [vmem:[%s9782_s0 + $0x944] ss:$16 sps:$4 sm:$0xff]  }
 0x543   : > { %4674 = vmatpush2.bf16.msra.mxu1 %v8192_v41  ;;  %4715 = vmatpush2.bf16.msra.mxu0 %v8195_v42  ;;  %v8252_v41 = vld [vmem:[%s9782_s0 + $0x880] ss:$16 sps:$4 sm:$0xff]  }
 0x544   : > { %4675 = vmatprep.subr.bf16.mxu1 %v8200_v43  ;;  %4716 = vmatprep.subr.bf16.mxu0 %v8203_v44  ;;  %v7839_v38 = vpop.f32.mrf.mxu0  ;;  %v8255_v42 = vld [vmem:[%s9782_s0 + $0xa80] ss:$16 sps:$4 sm:$0xff]   ;;  %v8260_v43 = vld [vmem:[%s9782_s0 + $0x864] ss:$16 sps:$4 sm:$0xff]  }
 0x545   : > { %v8263_v44 = vld [vmem:[%s9782_s0 + $0xa64] ss:$16 sps:$4 sm:$0xff]   ;;  %v8267_v38 = vld [vmem:[%s9782_s0 + $0xa40] ss:$16 sps:$4 sm:$0xff]  }
 0x547   : > { %4676 = vmatpush2.bf16.msra.mxu1 %v8198_v47  ;;  %4717 = vmatpush2.bf16.msra.mxu0 %v8201_v48  ;;  %v8261_v47 = vld [vmem:[%s9782_s0 + $0xa60] ss:$16 sps:$4 sm:$0xff]   ;;  %v8266_v48 = vld [vmem:[%s9782_s0 + $0x844] ss:$16 sps:$4 sm:$0xff]  }
 0x548   : > { %4677 = vmatprep.subr.bf16.mxu1 %v8206_v49  ;;  %4718 = vmatprep.subr.bf16.mxu0 %v8209_v50  ;;  %v8269_v49 = vld [vmem:[%s9782_s0 + $0xa44] ss:$16 sps:$4 sm:$0xff]   ;;  %v8264_v50 = vld [vmem:[%s9782_s0 + $0x840] ss:$16 sps:$4 sm:$0xff]  }
 0x54b   : > { %4678 = vmatpush2.bf16.msra.mxu1 %v8204_v51  ;;  %4719 = vmatpush2.bf16.msra.mxu0 %v8207_v52  ;;  %v8272_v51 = vld [vmem:[%s9782_s0 + $0x824] ss:$16 sps:$4 sm:$0xff]  }
 0x54c   : > { %4679 = vmatprep.subr.bf16.mxu1 %v8212_v53  ;;  %4720 = vmatprep.subr.bf16.mxu0 %v8215_v37  ;;  %v8275_v52 = vld [vmem:[%s9782_s0 + $0xa24] ss:$16 sps:$4 sm:$0xff]   ;;  %v8270_v53 = vld [vmem:[%s9782_s0 + $0x820] ss:$16 sps:$4 sm:$0xff]  }
 0x54d   : > { %v8273_v37 = vld [vmem:[%s9782_s0 + $0xa20] ss:$16 sps:$4 sm:$0xff]  }
 0x54f   : > { %4680 = vmatpush2.bf16.msra.mxu1 %v8210_v57  ;;  %4721 = vmatpush2.bf16.msra.mxu0 %v8213_v58  ;;  %v8278_v57 = vld [vmem:[%s9782_s0 + $0x804] ss:$16 sps:$4 sm:$0xff]  }
 0x550   : > { %4681 = vmatprep.subr.bf16.mxu1 %v8218_v59  ;;  %4722 = vmatprep.subr.bf16.mxu0 %v8221_v60  ;;  %v8281_v58 = vld [vmem:[%s9782_s0 + $0xa04] ss:$16 sps:$4 sm:$0xff]   ;;  %v8276_v59 = vld [vmem:[%s9782_s0 + $0x800] ss:$16 sps:$4 sm:$0xff]  }
 0x551   : > { %v8279_v60 = vld [vmem:[%s9782_s0 + $0xa00] ss:$16 sps:$4 sm:$0xff]  }
 0x553   : > { %4682 = vmatpush2.bf16.msra.mxu1 %v8216_v61  ;;  %4723 = vmatpush2.bf16.msra.mxu0 %v8219_v62  ;;  %v8284_v61 = vld [vmem:[%s9782_s0 + $0x9e4] ss:$16 sps:$4 sm:$0xff]  }
 0x554   : > { %4683 = vmatprep.subr.bf16.mxu1 %v8224_v63  ;;  %4724 = vmatprep.subr.bf16.mxu0 %v8227_v0  ;;  %v8287_v62 = vld [vmem:[%s9782_s0 + $0xbe4] ss:$16 sps:$4 sm:$0xff]   ;;  %v8282_v63 = vld [vmem:[%s9782_s0 + $0x9e0] ss:$16 sps:$4 sm:$0xff]  }
 0x555   : > { %v8285_v0 = vld [vmem:[%s9782_s0 + $0xbe0] ss:$16 sps:$4 sm:$0xff]  }
 0x557   : > { %4684 = vmatpush2.bf16.msra.mxu1 %v8222_v4  ;;  %4725 = vmatpush2.bf16.msra.mxu0 %v8225_v5  ;;  %v8293_v4 = vld [vmem:[%s9782_s0 + $0xbc4] ss:$16 sps:$4 sm:$0xff]   ;;  %v8288_v5 = vld [vmem:[%s9782_s0 + $0x9c0] ss:$16 sps:$4 sm:$0xff]  }
 0x558   : > { %4685 = vmatprep.subr.bf16.mxu1 %v8230_v7  ;;  %4726 = vmatprep.subr.bf16.mxu0 %v8233_v9  ;;  %v8291_v7 = vld [vmem:[%s9782_s0 + $0xbc0] ss:$16 sps:$4 sm:$0xff]   ;;  %v8296_v9 = vld [vmem:[%s9782_s0 + $0x9a4] ss:$16 sps:$4 sm:$0xff]  }
 0x55b   : > { %4686 = vmatpush2.bf16.msra.mxu1 %v8228_v16  ;;  %4727 = vmatpush2.bf16.msra.mxu0 %v8231_v17  ;;  %v8300_v16 = vld [vmem:[%s9782_s0 + $0x980] ss:$16 sps:$4 sm:$0xff]  }
 0x55c   : > { %4737 = vmatprep.subr.bf16.mxu1 %v8236_v19  ;;  %4778 = vmatprep.subr.bf16.mxu0 %v8239_v20  ;;  %v8303_v17 = vld [vmem:[%s9782_s0 + $0xb80] ss:$16 sps:$4 sm:$0xff]   ;;  %v8311_v19 = vld [vmem:[%s9782_s0 + $0xb64] ss:$16 sps:$4 sm:$0xff]  }
 0x55d   : > { %v8306_v20 = vld [vmem:[%s9782_s0 + $0x960] ss:$16 sps:$4 sm:$0xff]  }
 0x55e   : > { %4688 = vmatmul.mubr.bf16.vlgmr.msra.gmra.mxu1 %v10258_v26  ;;  %4729 = vmatmul.mubr.bf16.vlgmr.msra.gmra.mxu0 %v10254_v8 }
 0x55f   : > { %4738 = vmatpush1.bf16.msra.mxu1 %v8234_v24  ;;  %4779 = vmatpush1.bf16.msra.mxu0 %v8237_v25  ;;  %v8317_v24 = vld [vmem:[%s9782_s0 + $0xb44] ss:$16 sps:$4 sm:$0xff]   ;;  %v8312_v25 = vld [vmem:[%s9782_s0 + $0x940] ss:$16 sps:$4 sm:$0xff]  }
 0x560   : > { %4739 = vmatprep.subr.bf16.mxu1 %v8242_v6  ;;  %4780 = vmatprep.subr.bf16.mxu0 %v8245_v27  ;;  %v8315_v6 = vld [vmem:[%s9782_s0 + $0xb40] ss:$16 sps:$4 sm:$0xff]   ;;  %v8320_v27 = vld [vmem:[%s9782_s0 + $0x924] ss:$16 sps:$4 sm:$0xff]  }
 0x561   : > { %4769 = vmatprep.mubr.bf16.mxu1 %v10262_v28  ;;  %4810 = vmatprep.mubr.bf16.mxu0 %v10264_v29 }
 0x563   : > { %4740 = vmatpush1.bf16.msra.mxu1 %v8240_v30  ;;  %4781 = vmatpush1.bf16.msra.mxu0 %v8243_v31  ;;  %v8323_v30 = vld [vmem:[%s9782_s0 + $0xb24] ss:$16 sps:$4 sm:$0xff]   ;;  %v2044_v31 = vld [vmem:[%s9816_s19 + $0x50] sm:$0xff] }
 0x564   : > { %4741 = vmatprep.subr.bf16.mxu1 %v8248_v32  ;;  %4782 = vmatprep.subr.bf16.mxu0 %v8251_v33  ;;  %v8318_v32 = vld [vmem:[%s9782_s0 + $0x920] ss:$16 sps:$4 sm:$0xff]  }
 0x565   : > { %v8321_v33 = vld [vmem:[%s9782_s0 + $0xb20] ss:$16 sps:$4 sm:$0xff]  }
 0x567   : > { %4742 = vmatpush1.bf16.msra.mxu1 %v8246_v34  ;;  %4783 = vmatpush1.bf16.msra.mxu0 %v8249_v35  ;;  %v8326_v34 = vld [vmem:[%s9782_s0 + $0x904] ss:$16 sps:$4 sm:$0xff]  }
 0x568   : > { %4743 = vmatprep.subr.bf16.mxu1 %v8254_v36  ;;  %4784 = vmatprep.subr.bf16.mxu0 %v8257_v39  ;;  %v8329_v35 = vld [vmem:[%s9782_s0 + $0xb04] ss:$16 sps:$4 sm:$0xff]   ;;  %v2042_v36 = vld [vmem:[%s9816_s19 + $0x40] sm:$0xff]  ;;  %v2057_v39 = vmul.f32 %v2044_v31, %v10238_v1 }
 0x569   : > { %v8330_v1 = vld [vmem:[%s9782_s0 + $0xce0] ss:$16 sps:$4 sm:$0xff]   ;;  %v8387_v31 = vld [vmem:[%s9782_s0 + $0x2c8] ss:$16 sps:$4 sm:$0xff]  }
 0x56b   : > { %4744 = vmatpush1.bf16.msra.mxu1 %v8252_v41  ;;  %4785 = vmatpush1.bf16.msra.mxu0 %v8255_v42  ;;  %v8324_v41 = vld [vmem:[%s9782_s0 + $0x900] ss:$16 sps:$4 sm:$0xff]  }
 0x56c   : > { %4745 = vmatprep.subr.bf16.mxu1 %v8260_v43  ;;  %4786 = vmatprep.subr.bf16.mxu0 %v8263_v44  ;;  %v8327_v42 = vld [vmem:[%s9782_s0 + $0xb00] ss:$16 sps:$4 sm:$0xff]   ;;  %v2055_v43 = vmul.f32 %v2042_v36, %v10214_v40  ;;  %v8332_v44 = vld [vmem:[%s9782_s0 + $0xce4] ss:$16 sps:$4 sm:$0xff]   ;;  %v8341_v40 = vld [vmem:[%s9782_s0 + $0xcc] ss:$16 sps:$4 sm:$0xff]  }
 0x56d   : > { %v8398_v36 = vld [vmem:[%s9782_s0 + $0x18c] ss:$16 sps:$4 sm:$0xff]  }
 0x56f   : > { %4746 = vmatpush1.bf16.msra.mxu1 %v8258_v45  ;;  %4787 = vmatpush1.bf16.msra.mxu0 %v8261_v47  ;;  %v8335_v45 = vld [vmem:[%s9782_s0 + $0xec] ss:$16 sps:$4 sm:$0xff]   ;;  %v10334_v47 = vpack.c.bf16 %v2057_v39, %v2057_v39 }
 0x570   : > { %4747 = vmatprep.subr.bf16.mxu1 %v8266_v48  ;;  %4788 = vmatprep.subr.bf16.mxu0 %v8269_v49  ;;  %v8333_v48 = vld [vmem:[%s9782_s0 + $0xe8] ss:$16 sps:$4 sm:$0xff]   ;;  %v10338_v49 = vpack.c.bf16 %v2055_v43, %v2055_v43  ;;  %v8401_v39 = vld [vmem:[%s9782_s0 + $0x28c] ss:$16 sps:$4 sm:$0xff]  }
 0x571   : > { %v8407_v43 = vld [vmem:[%s9782_s0 + $0x26c] ss:$16 sps:$4 sm:$0xff]  }
 0x573   : > { %4748 = vmatpush1.bf16.msra.mxu1 %v8264_v50  ;;  %4789 = vmatpush1.bf16.msra.mxu0 %v8267_v38  ;;  %v8338_v50 = vld [vmem:[%s9782_s0 + $0xcc4] ss:$16 sps:$4 sm:$0xff]   ;;  %v8336_v38 = vld [vmem:[%s9782_s0 + $0xcc0] ss:$16 sps:$4 sm:$0xff]  }
 0x574   : > { %4749 = vmatprep.subr.bf16.mxu1 %v8272_v51  ;;  %4790 = vmatprep.subr.bf16.mxu0 %v8275_v52  ;;  %v8339_v51 = vld [vmem:[%s9782_s0 + $0xc8] ss:$16 sps:$4 sm:$0xff]   ;;  %v8344_v52 = vld [vmem:[%s9782_s0 + $0xca4] ss:$16 sps:$4 sm:$0xff]  }
 0x577   : > { %4750 = vmatpush1.bf16.msra.mxu1 %v8270_v53  ;;  %4791 = vmatpush1.bf16.msra.mxu0 %v8273_v37  ;;  %v8347_v53 = vld [vmem:[%s9782_s0 + $0xac] ss:$16 sps:$4 sm:$0xff]   ;;  %v9412_v37 = vmov 0  }
 0x578   : > { %4751 = vmatprep.subr.bf16.mxu1 %v8278_v57  ;;  %4792 = vmatprep.subr.bf16.mxu0 %v8281_v58  ;;  %v8342_v57 = vld [vmem:[%s9782_s0 + $0xca0] ss:$16 sps:$4 sm:$0xff]   ;;  %v8345_v58 = vld [vmem:[%s9782_s0 + $0xa8] ss:$16 sps:$4 sm:$0xff]  }
 0x57b   : > { %4752 = vmatpush1.bf16.msra.mxu1 %v8276_v59  ;;  %4793 = vmatpush1.bf16.msra.mxu0 %v8279_v60  ;;  %v8353_v59 = vld [vmem:[%s9782_s0 + $0x8c] ss:$16 sps:$4 sm:$0xff]   ;;  %v8348_v60 = vld [vmem:[%s9782_s0 + $0xc80] ss:$16 sps:$4 sm:$0xff]  }
 0x57c   : > { %4753 = vmatprep.subr.bf16.mxu1 %v8284_v61  ;;  %4794 = vmatprep.subr.bf16.mxu0 %v8287_v62  ;;  %v8351_v61 = vld [vmem:[%s9782_s0 + $0x88] ss:$16 sps:$4 sm:$0xff]   ;;  %v8356_v62 = vld [vmem:[%s9782_s0 + $0xc64] ss:$16 sps:$4 sm:$0xff]  }
 0x57f   : > { %4754 = vmatpush2.bf16.msra.mxu1 %v8282_v63  ;;  %4795 = vmatpush2.bf16.msra.mxu0 %v8285_v0  ;;  %v8359_v63 = vld [vmem:[%s9782_s0 + $0x6c] ss:$16 sps:$4 sm:$0xff]   ;;  %v8354_v0 = vld [vmem:[%s9782_s0 + $0xc60] ss:$16 sps:$4 sm:$0xff]  }
 0x580   : > { %4755 = vmatprep.subr.bf16.mxu1 %v8290_v3  ;;  %4796 = vmatprep.subr.bf16.mxu0 %v8293_v4  ;;  %v8357_v3 = vld [vmem:[%s9782_s0 + $0x68] ss:$16 sps:$4 sm:$0xff]   ;;  %v8362_v4 = vld [vmem:[%s9782_s0 + $0xc44] ss:$16 sps:$4 sm:$0xff]  }
 0x583   : > { %4756 = vmatpush2.bf16.msra.mxu1 %v8288_v5  ;;  %4797 = vmatpush2.bf16.msra.mxu0 %v8291_v7  ;;  %v8365_v5 = vld [vmem:[%s9782_s0 + $0x4c] ss:$16 sps:$4 sm:$0xff]   ;;  %v8360_v7 = vld [vmem:[%s9782_s0 + $0xc40] ss:$16 sps:$4 sm:$0xff]  }
 0x584   : > { %4757 = vmatprep.subr.bf16.mxu1 %v8296_v9  ;;  %4798 = vmatprep.subr.bf16.mxu0 %v8299_v10  ;;  %v8363_v9 = vld [vmem:[%s9782_s0 + $0x48] ss:$16 sps:$4 sm:$0xff]   ;;  %v8368_v10 = vld [vmem:[%s9782_s0 + $0xc24] ss:$16 sps:$4 sm:$0xff]  }
 0x587   : > { %4758 = vmatpush2.bf16.msra.mxu1 %v8294_v11  ;;  %4799 = vmatpush2.bf16.msra.mxu0 %v8297_v12  ;;  %v8371_v11 = vld [vmem:[%s9782_s0 + $0x2c] ss:$16 sps:$4 sm:$0xff]   ;;  %v8366_v12 = vld [vmem:[%s9782_s0 + $0xc20] ss:$16 sps:$4 sm:$0xff]  }
 0x588   : > { %4759 = vmatprep.subr.bf16.mxu1 %v8302_v13  ;;  %4800 = vmatprep.subr.bf16.mxu0 %v8305_v14  ;;  %v8369_v13 = vld [vmem:[%s9782_s0 + $0x28] ss:$16 sps:$4 sm:$0xff]   ;;  %v8374_v14 = vld [vmem:[%s9782_s0 + $0xc04] ss:$16 sps:$4 sm:$0xff]  }
 0x58b   : > { %4760 = vmatpush2.bf16.msra.mxu1 %v8300_v16  ;;  %4801 = vmatpush2.bf16.msra.mxu0 %v8303_v17  ;;  %v8377_v16 = vld [vmem:[%s9782_s0 + $0xc] ss:$16 sps:$4 sm:$0xff]  }
 0x58c   : > { %4761 = vmatprep.subr.bf16.mxu1 %v8308_v18  ;;  %4802 = vmatprep.subr.bf16.mxu0 %v8311_v19  ;;  %v2046_v17 = vld [vmem:[%s9816_s19 + $0x60] sm:$0xff] }
 0x58d   : > { %v8372_v18 = vld [vmem:[%s9782_s0 + $0xc00] ss:$16 sps:$4 sm:$0xff]   ;;  %v8375_v19 = vld [vmem:[%s9782_s0 + $0x8] ss:$16 sps:$4 sm:$0xff]  }
 0x58f   : > { %4762 = vmatpush2.bf16.msra.mxu1 %v8306_v20  ;;  %4803 = vmatpush2.bf16.msra.mxu0 %v8309_v22  ;;  %v2059_v20 = vmul.f32 %v2046_v17, %v10220_v46  ;;  %v8380_v22 = vld [vmem:[%s9782_s0 + $0x1ec] ss:$16 sps:$4 sm:$0xff]  }
 0x590   : > { %4763 = vmatprep.subr.bf16.mxu1 %v8314_v23  ;;  %4804 = vmatprep.subr.bf16.mxu0 %v8317_v24  ;;  %v8383_v23 = vld [vmem:[%s9782_s0 + $0x2ec] ss:$16 sps:$4 sm:$0xff]   ;;  %v8378_v24 = vld [vmem:[%s9782_s0 + $0x1e8] ss:$16 sps:$4 sm:$0xff]  }
 0x591   : > { %v8389_v46 = vld [vmem:[%s9782_s0 + $0x2cc] ss:$16 sps:$4 sm:$0xff]  }
 0x593   : > { %4764 = vmatpush2.bf16.msra.mxu1 %v8312_v25  ;;  %4805 = vmatpush2.bf16.msra.mxu0 %v8315_v6  ;;  %v8381_v25 = vld [vmem:[%s9782_s0 + $0x2e8] ss:$16 sps:$4 sm:$0xff]   ;;  %v10378_v6 = vpack.c.bf16 %v2059_v20, %v2059_v20 }
 0x594   : > { %4765 = vmatprep.subr.bf16.mxu1 %v8320_v27  ;;  %4806 = vmatprep.subr.bf16.mxu0 %v8323_v30  ;;  %v8386_v27 = vld [vmem:[%s9782_s0 + $0x1cc] ss:$16 sps:$4 sm:$0xff]   ;;  %v8384_v30 = vld [vmem:[%s9782_s0 + $0x1c8] ss:$16 sps:$4 sm:$0xff]  }
 0x597   : > { %4766 = vmatpush2.bf16.msra.mxu1 %v8318_v32  ;;  %4807 = vmatpush2.bf16.msra.mxu0 %v8321_v33  ;;  %v8392_v32 = vld [vmem:[%s9782_s0 + $0x1ac] ss:$16 sps:$4 sm:$0xff]  }
 0x598   : > { %4767 = vmatprep.subr.bf16.mxu1 %v8326_v34  ;;  %4808 = vmatprep.subr.bf16.mxu0 %v8329_v35  ;;  %v8395_v33 = vld [vmem:[%s9782_s0 + $0x2ac] ss:$16 sps:$4 sm:$0xff]   ;;  %v8390_v34 = vld [vmem:[%s9782_s0 + $0x1a8] ss:$16 sps:$4 sm:$0xff]  }
 0x599   : > { %v8393_v35 = vld [vmem:[%s9782_s0 + $0x2a8] ss:$16 sps:$4 sm:$0xff]  }
 0x59b   : > { %4768 = vmatpush2.bf16.msra.mxu1 %v8324_v41  ;;  %4809 = vmatpush2.bf16.msra.mxu0 %v8327_v42  ;;  %v8399_v41 = vld [vmem:[%s9782_s0 + $0x288] ss:$16 sps:$4 sm:$0xff]   ;;  %v8404_v42 = vld [vmem:[%s9782_s0 + $0x16c] ss:$16 sps:$4 sm:$0xff]  }
 0x59c   : > { %4819 = vmatprep.subr.bf16.mxu1 %v8332_v44  ;;  %4860 = vmatprep.subr.bf16.mxu0 %v8335_v45  ;;  %v8402_v44 = vld [vmem:[%s9782_s0 + $0x168] ss:$16 sps:$4 sm:$0xff]  }
 0x59d   : > { %v8405_v45 = vld [vmem:[%s9782_s0 + $0x268] ss:$16 sps:$4 sm:$0xff]  }
 0x59e   : > { %4770 = vmatmul.mubr.bf16.vlgmr.msra.gmra.mxu1 %v10338_v49  ;;  %4811 = vmatmul.mubr.bf16.vlgmr.msra.gmra.mxu0 %v10334_v47 }
 0x59f   : > { %4820 = vmatpush1.bf16.msra.mxu1 %v8330_v1  ;;  %4861 = vmatpush1.bf16.msra.mxu0 %v8333_v48  ;;  %v8410_v1 = vld [vmem:[%s9782_s0 + $0x14c] ss:$16 sps:$4 sm:$0xff]  }
 0x5a0   : > { %4892 = vmatprep.mubr.bf16.mxu0 %v10158_v2  ;;  %4821 = vmatprep.subr.bf16.mxu1 %v8338_v50  ;;  %v8350_v2 = vld [vmem:[%s9782_s0 + $0xc84] ss:$16 sps:$4 sm:$0xff]   ;;  %v8413_v48 = vld [vmem:[%s9782_s0 + $0x24c] ss:$16 sps:$4 sm:$0xff]   ;;  %v8408_v50 = vld [vmem:[%s9782_s0 + $0x148] ss:$16 sps:$4 sm:$0xff]  }
 0x5a1   : > { %4862 = vmatprep.subr.bf16.mxu0 %v8341_v40  ;;  %4851 = vmatprep.mubr.bf16.mxu1 %v9412_v37  ;;  %v8411_v40 = vld [vmem:[%s9782_s0 + $0x248] ss:$16 sps:$4 sm:$0xff]  }
 0x5a3   : > { %4822 = vmatpush1.bf16.msra.mxu1 %v8336_v38  ;;  %4863 = vmatpush1.bf16.msra.mxu0 %v8339_v51  ;;  %v8416_v38 = vld [vmem:[%s9782_s0 + $0x12c] ss:$16 sps:$4 sm:$0xff]  }
 0x5a4   : > { %4823 = vmatprep.subr.bf16.mxu1 %v8344_v52  ;;  %4864 = vmatprep.subr.bf16.mxu0 %v8347_v53  ;;  %v8419_v51 = vld [vmem:[%s9782_s0 + $0x22c] ss:$16 sps:$4 sm:$0xff]   ;;  %v8414_v52 = vld [vmem:[%s9782_s0 + $0x128] ss:$16 sps:$4 sm:$0xff]  }
 0x5a5   : > { %v8417_v53 = vld [vmem:[%s9782_s0 + $0x228] ss:$16 sps:$4 sm:$0xff]  }
 0x5a7   : > { %4824 = vmatpush1.bf16.msra.mxu1 %v8342_v57  ;;  %4865 = vmatpush1.bf16.msra.mxu0 %v8345_v58  ;;  %v8422_v57 = vld [vmem:[%s9782_s0 + $0x10c] ss:$16 sps:$4 sm:$0xff]  }
 0x5a8   : > { %4825 = vmatprep.subr.bf16.mxu1 %v8350_v2  ;;  %4866 = vmatprep.subr.bf16.mxu0 %v8353_v59  ;;  %v8425_v58 = vld [vmem:[%s9782_s0 + $0x20c] ss:$16 sps:$4 sm:$0xff]   ;;  %v8420_v2 = vld [vmem:[%s9782_s0 + $0x108] ss:$16 sps:$4 sm:$0xff]  }
 0x5a9   : > { %v8423_v59 = vld [vmem:[%s9782_s0 + $0x208] ss:$16 sps:$4 sm:$0xff]  }
 0x5ab   : > { %4826 = vmatpush1.bf16.msra.mxu1 %v8348_v60  ;;  %4867 = vmatpush1.bf16.msra.mxu0 %v8351_v61  ;;  %v8428_v60 = vld [vmem:[%s9782_s0 + $0x3ec] ss:$16 sps:$4 sm:$0xff]  }
 0x5ac   : > { %4827 = vmatprep.subr.bf16.mxu1 %v8356_v62  ;;  %4868 = vmatprep.subr.bf16.mxu0 %v8359_v63  ;;  %v8431_v61 = vld [vmem:[%s9782_s0 + $0x4ec] ss:$16 sps:$4 sm:$0xff]   ;;  %v8426_v62 = vld [vmem:[%s9782_s0 + $0x3e8] ss:$16 sps:$4 sm:$0xff]  }
 0x5ad   : > { %v8429_v63 = vld [vmem:[%s9782_s0 + $0x4e8] ss:$16 sps:$4 sm:$0xff]  }
 0x5af   : > { %4828 = vmatpush1.bf16.msra.mxu1 %v8354_v0  ;;  %4869 = vmatpush1.bf16.msra.mxu0 %v8357_v3  ;;  %v8434_v0 = vld [vmem:[%s9782_s0 + $0x3cc] ss:$16 sps:$4 sm:$0xff]  }
 0x5b0   : > { %4829 = vmatprep.subr.bf16.mxu1 %v8362_v4  ;;  %4870 = vmatprep.subr.bf16.mxu0 %v8365_v5  ;;  %v8437_v3 = vld [vmem:[%s9782_s0 + $0x4cc] ss:$16 sps:$4 sm:$0xff]  }
 0x5b3   : > { %4830 = vmatpush1.bf16.msra.mxu1 %v8360_v7  ;;  %4871 = vmatpush1.bf16.msra.mxu0 %v8363_v9  ;;  %v8432_v9 = vld [vmem:[%s9782_s0 + $0x3c8] ss:$16 sps:$4 sm:$0xff]  }
 0x5b4   : > { %4831 = vmatprep.subr.bf16.mxu1 %v8368_v10  ;;  %4872 = vmatprep.subr.bf16.mxu0 %v8371_v11  ;;  %v8435_v10 = vld [vmem:[%s9782_s0 + $0x4c8] ss:$16 sps:$4 sm:$0xff]  }
 0x5b7   : > { %4832 = vmatpush1.bf16.msra.mxu1 %v8366_v12  ;;  %4873 = vmatpush1.bf16.msra.mxu0 %v8369_v13  ;;  %v8440_v13 = vld [vmem:[%s9782_s0 + $0x3ac] ss:$16 sps:$4 sm:$0xff]  }
 0x5b8   : > { %4833 = vmatprep.subr.bf16.mxu1 %v8374_v14  ;;  %4874 = vmatprep.subr.bf16.mxu0 %v8377_v16  ;;  %v8443_v14 = vld [vmem:[%s9782_s0 + $0x4ac] ss:$16 sps:$4 sm:$0xff]  }
 0x5bb   : > { %4834 = vmatpush1.bf16.msra.mxu1 %v8372_v18  ;;  %4875 = vmatpush1.bf16.msra.mxu0 %v8375_v19  ;;  %v8438_v18 = vld [vmem:[%s9782_s0 + $0x3a8] ss:$16 sps:$4 sm:$0xff]  }
 0x5bc   : > { %4876 = vmatprep.subr.bf16.mxu0 %v8380_v22  ;;  %4901 = vmatprep.subr.bf16.mxu1 %v8383_v23  ;;  %v8446_v22 = vld [vmem:[%s9782_s0 + $0x38c] ss:$16 sps:$4 sm:$0xff]  }
 0x5bd   : > { %v8449_v23 = vld [vmem:[%s9782_s0 + $0x48c] ss:$16 sps:$4 sm:$0xff]  }
 0x5be   : > { %4852 = vmatmul.mubr.bf16.vlgmr.msra.gmra.mxu1 %v10378_v6 }
 0x5bf   : > { %4877 = vmatpush2.bf16.msra.mxu0 %v8378_v24  ;;  %4902 = vmatpush1.bf16.msra.mxu1 %v8381_v25  ;;  %v8444_v24 = vld [vmem:[%s9782_s0 + $0x388] ss:$16 sps:$4 sm:$0xff]  }
 0x5c0   : > { %4933 = vmatprep.mubr.bf16.mxu1 %v10160_v55  ;;  %4878 = vmatprep.subr.bf16.mxu0 %v8386_v27  ;;  %v8396_v55 = vld [vmem:[%s9782_s0 + $0x188] ss:$16 sps:$4 sm:$0xff]   ;;  %v8452_v27 = vld [vmem:[%s9782_s0 + $0x36c] ss:$16 sps:$4 sm:$0xff]  }
 0x5c1   : > { %4903 = vmatprep.subr.bf16.mxu1 %v8389_v46  ;;  %v8447_v25 = vld [vmem:[%s9782_s0 + $0x488] ss:$16 sps:$4 sm:$0xff]   ;;  %v8455_v46 = vld [vmem:[%s9782_s0 + $0x46c] ss:$16 sps:$4 sm:$0xff]  }
 0x5c3   : > { %4879 = vmatpush2.bf16.msra.mxu0 %v8384_v30  ;;  %4904 = vmatpush1.bf16.msra.mxu1 %v8387_v31  ;;  %v8450_v30 = vld [vmem:[%s9782_s0 + $0x368] ss:$16 sps:$4 sm:$0xff]  }
 0x5c4   : > { %4880 = vmatprep.subr.bf16.mxu0 %v8392_v32  ;;  %4905 = vmatprep.subr.bf16.mxu1 %v8395_v33  ;;  %v8453_v31 = vld [vmem:[%s9782_s0 + $0x468] ss:$16 sps:$4 sm:$0xff]   ;;  %v8458_v32 = vld [vmem:[%s9782_s0 + $0x34c] ss:$16 sps:$4 sm:$0xff]  }
 0x5c5   : > { %v8461_v33 = vld [vmem:[%s9782_s0 + $0x44c] ss:$16 sps:$4 sm:$0xff]  }
 0x5c7   : > { %4881 = vmatpush2.bf16.msra.mxu0 %v8390_v34  ;;  %4906 = vmatpush1.bf16.msra.mxu1 %v8393_v35  ;;  %v8456_v34 = vld [vmem:[%s9782_s0 + $0x348] ss:$16 sps:$4 sm:$0xff]  }
 0x5c8   : > { %4882 = vmatprep.subr.bf16.mxu0 %v8398_v36  ;;  %4907 = vmatprep.subr.bf16.mxu1 %v8401_v39  ;;  %v8459_v35 = vld [vmem:[%s9782_s0 + $0x448] ss:$16 sps:$4 sm:$0xff]   ;;  %v8464_v36 = vld [vmem:[%s9782_s0 + $0x32c] ss:$16 sps:$4 sm:$0xff]  }
 0x5c9   : > { %v8467_v39 = vld [vmem:[%s9782_s0 + $0x42c] ss:$16 sps:$4 sm:$0xff]  }
 0x5cb   : > { %4883 = vmatpush2.bf16.msra.mxu0 %v8396_v55  ;;  %4908 = vmatpush1.bf16.msra.mxu1 %v8399_v41  ;;  %v8462_v55 = vld [vmem:[%s9782_s0 + $0x328] ss:$16 sps:$4 sm:$0xff]  }
 0x5cc   : > { %4884 = vmatprep.subr.bf16.mxu0 %v8404_v42  ;;  %4909 = vmatprep.subr.bf16.mxu1 %v8407_v43  ;;  %v8465_v41 = vld [vmem:[%s9782_s0 + $0x428] ss:$16 sps:$4 sm:$0xff]   ;;  %v8470_v42 = vld [vmem:[%s9782_s0 + $0x30c] ss:$16 sps:$4 sm:$0xff]  }
 0x5cd   : > { %v8473_v43 = vld [vmem:[%s9782_s0 + $0x40c] ss:$16 sps:$4 sm:$0xff]  }
 0x5cf   : > { %4885 = vmatpush2.bf16.msra.mxu0 %v8402_v44  ;;  %4910 = vmatpush1.bf16.msra.mxu1 %v8405_v45  ;;  %v8468_v44 = vld [vmem:[%s9782_s0 + $0x308] ss:$16 sps:$4 sm:$0xff]  }
 0x5d0   : > { %4886 = vmatprep.subr.bf16.mxu0 %v8410_v1  ;;  %4911 = vmatprep.subr.bf16.mxu1 %v8413_v48  ;;  %v8471_v45 = vld [vmem:[%s9782_s0 + $0x408] ss:$16 sps:$4 sm:$0xff]   ;;  %v8476_v1 = vld [vmem:[%s9782_s0 + $0x5ec] ss:$16 sps:$4 sm:$0xff]  }
 0x5d1   : > { %v8479_v48 = vld [vmem:[%s9782_s0 + $0x6ec] ss:$16 sps:$4 sm:$0xff]  }
 0x5d3   : > { %4887 = vmatpush2.bf16.msra.mxu0 %v8408_v50  ;;  %4912 = vmatpush1.bf16.msra.mxu1 %v8411_v40  ;;  %v8474_v50 = vld [vmem:[%s9782_s0 + $0x5e8] ss:$16 sps:$4 sm:$0xff]  }
 0x5d4   : > { %4888 = vmatprep.subr.bf16.mxu0 %v8416_v38  ;;  %4913 = vmatprep.subr.bf16.mxu1 %v8419_v51  ;;  %v8477_v40 = vld [vmem:[%s9782_s0 + $0x6e8] ss:$16 sps:$4 sm:$0xff]   ;;  %v8482_v38 = vld [vmem:[%s9782_s0 + $0x5cc] ss:$16 sps:$4 sm:$0xff]  }
 0x5d5   : > { %v8485_v51 = vld [vmem:[%s9782_s0 + $0x6cc] ss:$16 sps:$4 sm:$0xff]  }
 0x5d7   : > { %4889 = vmatpush2.bf16.msra.mxu0 %v8414_v52  ;;  %4914 = vmatpush1.bf16.msra.mxu1 %v8417_v53  ;;  %v8480_v52 = vld [vmem:[%s9782_s0 + $0x5c8] ss:$16 sps:$4 sm:$0xff]  }
 0x5d8   : > { %4890 = vmatprep.subr.bf16.mxu0 %v8422_v57  ;;  %4915 = vmatprep.subr.bf16.mxu1 %v8425_v58  ;;  %v8483_v53 = vld [vmem:[%s9782_s0 + $0x6c8] ss:$16 sps:$4 sm:$0xff]   ;;  %v8488_v57 = vld [vmem:[%s9782_s0 + $0x5ac] ss:$16 sps:$4 sm:$0xff]  }
 0x5d9   : > { %v8491_v58 = vld [vmem:[%s9782_s0 + $0x6ac] ss:$16 sps:$4 sm:$0xff]  }
 0x5db   : > { %4891 = vmatpush2.bf16.msra.mxu0 %v8420_v2  ;;  %4916 = vmatpush1.bf16.msra.mxu1 %v8423_v59  ;;  %v8486_v2 = vld [vmem:[%s9782_s0 + $0x5a8] ss:$16 sps:$4 sm:$0xff]   ;;  %v8494_v59 = vld [vmem:[%s9782_s0 + $0x58c] ss:$16 sps:$4 sm:$0xff]  }
 0x5dc   : > { %4917 = vmatprep.subr.bf16.mxu1 %v8428_v60  ;;  %4942 = vmatprep.subr.bf16.mxu0 %v8431_v61  ;;  %v8497_v60 = vld [vmem:[%s9782_s0 + $0x68c] ss:$16 sps:$4 sm:$0xff]   ;;  %v8495_v61 = vld [vmem:[%s9782_s0 + $0x688] ss:$16 sps:$4 sm:$0xff]  }
 0x5de   : > { %4893 = vmatmul.mubr.bf16.vlgmr.msra.gmra.mxu0 %v10162_v56  ;;  %v4607_v4 = vpop.f32.mrf.mxu1  ;;  %v4648_v5 = vpop.f32.mrf.mxu0 }
 0x5df   : > { %v10417_v7 = vadd.f32 %v4648_v5, %v4607_v4  ;;  %4918 = vmatpush2.bf16.msra.mxu1 %v8426_v62  ;;  %4943 = vmatpush1.bf16.msra.mxu0 %v8429_v63  ;;  %v8500_v62 = vld [vmem:[%s9782_s0 + $0x56c] ss:$16 sps:$4 sm:$0xff]  }
 0x5e0   : > { %4974 = vmatprep.mubr.bf16.mxu0 %v10188_v15  ;;  %v4609_v11 = vpop.f32.mrf.mxu1  ;;  %v4650_v12 = vpop.f32.mrf.mxu0  ;;  %4919 = vmatprep.subr.bf16.mxu1 %v8434_v0  ;;  %v8441_v15 = vld [vmem:[%s9782_s0 + $0x4a8] ss:$16 sps:$4 sm:$0xff]   ;;  %v8503_v63 = vld [vmem:[%s9782_s0 + $0x66c] ss:$16 sps:$4 sm:$0xff]  }
 0x5e1   : > { %v10424_v56 = vadd.f32 %v4650_v12, %v4609_v11  ;;  %4944 = vmatprep.subr.bf16.mxu0 %v8437_v3  ;;  %v8498_v0 = vld [vmem:[%s9782_s0 + $0x568] ss:$16 sps:$4 sm:$0xff]   ;;  %v8506_v4 = vld [vmem:[%s9782_s0 + $0x54c] ss:$16 sps:$4 sm:$0xff]  }
 0x5e2   : > { %v4611_v16 = vpop.f32.mrf.mxu1  ;;  %v4652_v17 = vpop.f32.mrf.mxu0  ;;  %v8501_v3 = vld [vmem:[%s9782_s0 + $0x668] ss:$16 sps:$4 sm:$0xff]   ;;  %v8509_v5 = vld [vmem:[%s9782_s0 + $0x64c] ss:$16 sps:$4 sm:$0xff]  }
 0x5e3   : > { %4920 = vmatpush2.bf16.msra.mxu1 %v8432_v9  ;;  %4945 = vmatpush1.bf16.msra.mxu0 %v8435_v10  ;;  %v8504_v9 = vld [vmem:[%s9782_s0 + $0x548] ss:$16 sps:$4 sm:$0xff]   ;;  %v8512_v11 = vld [vmem:[%s9782_s0 + $0x52c] ss:$16 sps:$4 sm:$0xff]  }
 0x5e4   : > { %v4612_v19 = vpop.f32.mrf.mxu1  ;;  %v4653_v20 = vpop.f32.mrf.mxu0  ;;  %4921 = vmatprep.subr.bf16.mxu1 %v8440_v13  ;;  %4946 = vmatprep.subr.bf16.mxu0 %v8443_v14  ;;  %v8507_v10 = vld [vmem:[%s9782_s0 + $0x648] ss:$16 sps:$4 sm:$0xff]   ;;  %v8515_v12 = vld [vmem:[%s9782_s0 + $0x62c] ss:$16 sps:$4 sm:$0xff]  }
 0x5e5   : > { %v8510_v13 = vld [vmem:[%s9782_s0 + $0x528] ss:$16 sps:$4 sm:$0xff]   ;;  %v8518_v16 = vld [vmem:[%s9782_s0 + $0x50c] ss:$16 sps:$4 sm:$0xff]  }
 0x5e6   : > { %v8513_v14 = vld [vmem:[%s9782_s0 + $0x628] ss:$16 sps:$4 sm:$0xff]   ;;  %v8521_v17 = vld [vmem:[%s9782_s0 + $0x60c] ss:$16 sps:$4 sm:$0xff]  }
 0x5e7   : > { %4922 = vmatpush2.bf16.msra.mxu1 %v8438_v18  ;;  %4947 = vmatpush1.bf16.msra.mxu0 %v8441_v15  ;;  %v8516_v18 = vld [vmem:[%s9782_s0 + $0x508] ss:$16 sps:$4 sm:$0xff]   ;;  %v8524_v19 = vld [vmem:[%s9782_s0 + $0x7ec] ss:$16 sps:$4 sm:$0xff]  }
 0x5e8   : > { %4923 = vmatprep.subr.bf16.mxu1 %v8446_v22  ;;  %4948 = vmatprep.subr.bf16.mxu0 %v8449_v23  ;;  %v8519_v15 = vld [vmem:[%s9782_s0 + $0x608] ss:$16 sps:$4 sm:$0xff]   ;;  %v8527_v20 = vld [vmem:[%s9782_s0 + $0x8ec] ss:$16 sps:$4 sm:$0xff]  }
 0x5e9   : > { %v8522_v22 = vld [vmem:[%s9782_s0 + $0x7e8] ss:$16 sps:$4 sm:$0xff]  }
 0x5ea   : > { %v8525_v23 = vld [vmem:[%s9782_s0 + $0x8e8] ss:$16 sps:$4 sm:$0xff]  }
 0x5eb   : > { %4924 = vmatpush2.bf16.msra.mxu1 %v8444_v24  ;;  %4949 = vmatpush1.bf16.msra.mxu0 %v8447_v25  ;;  %v8530_v24 = vld [vmem:[%s9782_s0 + $0x7cc] ss:$16 sps:$4 sm:$0xff]  }
 0x5ec   : > { %4925 = vmatprep.subr.bf16.mxu1 %v8452_v27  ;;  %4950 = vmatprep.subr.bf16.mxu0 %v8455_v46  ;;  %v8533_v25 = vld [vmem:[%s9782_s0 + $0x8cc] ss:$16 sps:$4 sm:$0xff]  }
 0x5ef   : > { %4926 = vmatpush2.bf16.msra.mxu1 %v8450_v30  ;;  %4951 = vmatpush1.bf16.msra.mxu0 %v8453_v31  ;;  %v8528_v31 = vld [vmem:[%s9782_s0 + $0x7c8] ss:$16 sps:$4 sm:$0xff]  }
 0x5f0   : > { %4927 = vmatprep.subr.bf16.mxu1 %v8458_v32  ;;  %4952 = vmatprep.subr.bf16.mxu0 %v8461_v33  ;;  %v8531_v32 = vld [vmem:[%s9782_s0 + $0x8c8] ss:$16 sps:$4 sm:$0xff]  }
 0x5f3   : > { %4928 = vmatpush2.bf16.msra.mxu1 %v8456_v34  ;;  %4953 = vmatpush1.bf16.msra.mxu0 %v8459_v35  ;;  %v8536_v35 = vld [vmem:[%s9782_s0 + $0x7ac] ss:$16 sps:$4 sm:$0xff]  }
 0x5f4   : > { %4929 = vmatprep.subr.bf16.mxu1 %v8464_v36  ;;  %4954 = vmatprep.subr.bf16.mxu0 %v8467_v39  ;;  %v8539_v36 = vld [vmem:[%s9782_s0 + $0x8ac] ss:$16 sps:$4 sm:$0xff]  }
 0x5f7   : > { %4930 = vmatpush2.bf16.msra.mxu1 %v8462_v55  ;;  %4955 = vmatpush1.bf16.msra.mxu0 %v8465_v41 }
 0x5f8   : > { %4931 = vmatprep.subr.bf16.mxu1 %v8470_v42  ;;  %4956 = vmatprep.subr.bf16.mxu0 %v8473_v43  ;;  %v8537_v42 = vld [vmem:[%s9782_s0 + $0x8a8] ss:$16 sps:$4 sm:$0xff]  }
 0x5fb   : > { %4932 = vmatpush2.bf16.msra.mxu1 %v8468_v44  ;;  %4957 = vmatpush1.bf16.msra.mxu0 %v8471_v45  ;;  %v8545_v45 = vld [vmem:[%s9782_s0 + $0x88c] ss:$16 sps:$4 sm:$0xff]  }
 0x5fc   : > { %4958 = vmatprep.subr.bf16.mxu0 %v8476_v1  ;;  %4983 = vmatprep.subr.bf16.mxu1 %v8479_v48  ;;  %v8540_v1 = vld [vmem:[%s9782_s0 + $0x788] ss:$16 sps:$4 sm:$0xff]  }
 0x5fd   : > { %v8543_v48 = vld [vmem:[%s9782_s0 + $0x888] ss:$16 sps:$4 sm:$0xff]  }
 0x5fe   : > { %4934 = vmatmul.mubr.bf16.vlgmr.msra.gmra.mxu1 %v10156_v54  ;;  %v8489_v54 = vld [vmem:[%s9782_s0 + $0x6a8] ss:$16 sps:$4 sm:$0xff]  }
 0x5ff   : > { %4959 = vmatpush2.bf16.msra.mxu0 %v8474_v50  ;;  %4984 = vmatpush1.bf16.msra.mxu1 %v8477_v40  ;;  %v8548_v50 = vld [vmem:[%s9782_s0 + $0x76c] ss:$16 sps:$4 sm:$0xff]  }
 0x600   : > { %5015 = vmatprep.mubr.bf16.mxu1 %v10194_v21  ;;  %4960 = vmatprep.subr.bf16.mxu0 %v8482_v38  ;;  %v8492_v21 = vld [vmem:[%s9782_s0 + $0x588] ss:$16 sps:$4 sm:$0xff]   ;;  %v8551_v40 = vld [vmem:[%s9782_s0 + $0x86c] ss:$16 sps:$4 sm:$0xff]  }
 0x601   : > { %4985 = vmatprep.subr.bf16.mxu1 %v8485_v51  ;;  %v8546_v38 = vld [vmem:[%s9782_s0 + $0x768] ss:$16 sps:$4 sm:$0xff]  }
 0x602   : > { %v8549_v51 = vld [vmem:[%s9782_s0 + $0x868] ss:$16 sps:$4 sm:$0xff]  }
 0x603   : > { %4961 = vmatpush2.bf16.msra.mxu0 %v8480_v52  ;;  %4986 = vmatpush1.bf16.msra.mxu1 %v8483_v53  ;;  %v8554_v52 = vld [vmem:[%s9782_s0 + $0x74c] ss:$16 sps:$4 sm:$0xff]  }
 0x604   : > { %4962 = vmatprep.subr.bf16.mxu0 %v8488_v57  ;;  %4987 = vmatprep.subr.bf16.mxu1 %v8491_v58  ;;  %v8557_v53 = vld [vmem:[%s9782_s0 + $0x84c] ss:$16 sps:$4 sm:$0xff]   ;;  %v8552_v57 = vld [vmem:[%s9782_s0 + $0x748] ss:$16 sps:$4 sm:$0xff]  }
 0x605   : > { %v8555_v58 = vld [vmem:[%s9782_s0 + $0x848] ss:$16 sps:$4 sm:$0xff]  }
 0x607   : > { %4963 = vmatpush2.bf16.msra.mxu0 %v8486_v2  ;;  %4988 = vmatpush1.bf16.msra.mxu1 %v8489_v54  ;;  %v8560_v2 = vld [vmem:[%s9782_s0 + $0x72c] ss:$16 sps:$4 sm:$0xff]  }
 0x608   : > { %4964 = vmatprep.subr.bf16.mxu0 %v8494_v59  ;;  %4989 = vmatprep.subr.bf16.mxu1 %v8497_v60  ;;  %v8563_v54 = vld [vmem:[%s9782_s0 + $0x82c] ss:$16 sps:$4 sm:$0xff]   ;;  %v8558_v59 = vld [vmem:[%s9782_s0 + $0x728] ss:$16 sps:$4 sm:$0xff]  }
 0x609   : > { %v8561_v60 = vld [vmem:[%s9782_s0 + $0x828] ss:$16 sps:$4 sm:$0xff]  }
 0x60b   : > { %4965 = vmatpush2.bf16.msra.mxu0 %v8492_v21  ;;  %4990 = vmatpush1.bf16.msra.mxu1 %v8495_v61  ;;  %v8566_v21 = vld [vmem:[%s9782_s0 + $0x70c] ss:$16 sps:$4 sm:$0xff]  }
 0x60c   : > { %4966 = vmatprep.subr.bf16.mxu0 %v8500_v62  ;;  %4991 = vmatprep.subr.bf16.mxu1 %v8503_v63  ;;  %v8569_v61 = vld [vmem:[%s9782_s0 + $0x80c] ss:$16 sps:$4 sm:$0xff]   ;;  %v8564_v62 = vld [vmem:[%s9782_s0 + $0x708] ss:$16 sps:$4 sm:$0xff]  }
 0x60d   : > { %v8567_v63 = vld [vmem:[%s9782_s0 + $0x808] ss:$16 sps:$4 sm:$0xff]  }
 0x60f   : > { %4967 = vmatpush2.bf16.msra.mxu0 %v8498_v0  ;;  %4992 = vmatpush1.bf16.msra.mxu1 %v8501_v3  ;;  %v8572_v0 = vld [vmem:[%s9782_s0 + $0x9ec] ss:$16 sps:$4 sm:$0xff]  }
 0x610   : > { %4968 = vmatprep.subr.bf16.mxu0 %v8506_v4  ;;  %4993 = vmatprep.subr.bf16.mxu1 %v8509_v5  ;;  %v8575_v3 = vld [vmem:[%s9782_s0 + $0xaec] ss:$16 sps:$4 sm:$0xff]   ;;  %v8570_v4 = vld [vmem:[%s9782_s0 + $0x9e8] ss:$16 sps:$4 sm:$0xff]  }
 0x611   : > { %v8573_v5 = vld [vmem:[%s9782_s0 + $0xae8] ss:$16 sps:$4 sm:$0xff]  }
 0x613   : > { %4969 = vmatpush2.bf16.msra.mxu0 %v8504_v9  ;;  %4994 = vmatpush1.bf16.msra.mxu1 %v8507_v10  ;;  %v8578_v9 = vld [vmem:[%s9782_s0 + $0x9cc] ss:$16 sps:$4 sm:$0xff]  }
 0x614   : > { %4970 = vmatprep.subr.bf16.mxu0 %v8512_v11  ;;  %4995 = vmatprep.subr.bf16.mxu1 %v8515_v12  ;;  %v8581_v10 = vld [vmem:[%s9782_s0 + $0xacc] ss:$16 sps:$4 sm:$0xff]   ;;  %v8576_v11 = vld [vmem:[%s9782_s0 + $0x9c8] ss:$16 sps:$4 sm:$0xff]  }
 0x615   : > { %v8579_v12 = vld [vmem:[%s9782_s0 + $0xac8] ss:$16 sps:$4 sm:$0xff]  }
 0x617   : > { %4971 = vmatpush2.bf16.msra.mxu0 %v8510_v13  ;;  %4996 = vmatpush1.bf16.msra.mxu1 %v8513_v14  ;;  %v8584_v13 = vld [vmem:[%s9782_s0 + $0x9ac] ss:$16 sps:$4 sm:$0xff]  }
 0x618   : > { %4972 = vmatprep.subr.bf16.mxu0 %v8518_v16  ;;  %4997 = vmatprep.subr.bf16.mxu1 %v8521_v17  ;;  %v8587_v14 = vld [vmem:[%s9782_s0 + $0xaac] ss:$16 sps:$4 sm:$0xff]   ;;  %v8582_v16 = vld [vmem:[%s9782_s0 + $0x9a8] ss:$16 sps:$4 sm:$0xff]  }
 0x619   : > { %v8590_v17 = vld [vmem:[%s9782_s0 + $0x98c] ss:$16 sps:$4 sm:$0xff]  }
 0x61b   : > { %4973 = vmatpush2.bf16.msra.mxu0 %v8516_v18  ;;  %4998 = vmatpush1.bf16.msra.mxu1 %v8519_v15  ;;  %v8593_v18 = vld [vmem:[%s9782_s0 + $0xa8c] ss:$16 sps:$4 sm:$0xff]   ;;  %v8591_v15 = vld [vmem:[%s9782_s0 + $0xa88] ss:$16 sps:$4 sm:$0xff]  }
 0x61c   : > { %4999 = vmatprep.subr.bf16.mxu1 %v8524_v19  ;;  %5024 = vmatprep.subr.bf16.mxu0 %v8527_v20  ;;  %v8596_v19 = vld [vmem:[%s9782_s0 + $0x96c] ss:$16 sps:$4 sm:$0xff]  }
 0x61d   : > { %v8599_v20 = vld [vmem:[%s9782_s0 + $0xa6c] ss:$16 sps:$4 sm:$0xff]  }
 0x61e   : > { %v4689_v27 = vpop.f32.mrf.mxu1  ;;  %v4730_v46 = vpop.f32.mrf.mxu0  ;;  %4975 = vmatmul.mubr.bf16.vlgmr.msra.gmra.mxu0 %v10258_v26 }
 0x61f   : > { %v4690_v30 = vadd.f32 %v4689_v27, %v10417_v7  ;;  %5000 = vmatpush2.bf16.msra.mxu1 %v8522_v22  ;;  %5025 = vmatpush1.bf16.msra.mxu0 %v8525_v23  ;;  %v8594_v22 = vld [vmem:[%s9782_s0 + $0x968] ss:$16 sps:$4 sm:$0xff]  }
 0x620   : > { %5056 = vmatprep.mubr.bf16.mxu0 %v10262_v28  ;;  %v4691_v33 = vpop.f32.mrf.mxu1  ;;  %v4732_v34 = vpop.f32.mrf.mxu0  ;;  %5001 = vmatprep.subr.bf16.mxu1 %v8530_v24  ;;  %v8534_v28 = vld [vmem:[%s9782_s0 + $0x7a8] ss:$16 sps:$4 sm:$0xff]   ;;  %v8602_v24 = vld [vmem:[%s9782_s0 + $0x94c] ss:$16 sps:$4 sm:$0xff]  }
 0x621   : > { %v10495_v39 = vadd.f32 %v4730_v46, %v4690_v30  ;;  %v4692_v26 = vadd.f32 %v4691_v33, %v10424_v56  ;;  %5026 = vmatprep.subr.bf16.mxu0 %v8533_v25  ;;  %v8542_v56 = vld [vmem:[%s9782_s0 + $0x78c] ss:$16 sps:$4 sm:$0xff]   ;;  %v8597_v23 = vld [vmem:[%s9782_s0 + $0xa68] ss:$16 sps:$4 sm:$0xff]  }
 0x622   : > { %v4693_v7 = vpop.f32.mrf.mxu1  ;;  %v4734_v55 = vpop.f32.mrf.mxu0  ;;  %v8605_v25 = vld [vmem:[%s9782_s0 + $0xa4c] ss:$16 sps:$4 sm:$0xff]   ;;  %v8600_v27 = vld [vmem:[%s9782_s0 + $0x948] ss:$16 sps:$4 sm:$0xff]  }
 0x623   : > { %v10498_v41 = vadd.f32 %v4732_v34, %v4692_v26  ;;  %5002 = vmatpush2.bf16.msra.mxu1 %v8528_v31  ;;  %5027 = vmatpush1.bf16.msra.mxu0 %v8531_v32  ;;  %v8603_v46 = vld [vmem:[%s9782_s0 + $0xa48] ss:$16 sps:$4 sm:$0xff]   ;;  %v8608_v30 = vld [vmem:[%s9782_s0 + $0x92c] ss:$16 sps:$4 sm:$0xff]  }
 0x624   : > { %v4694_v43 = vpop.f32.mrf.mxu1  ;;  %v4735_v44 = vpop.f32.mrf.mxu0  ;;  %5003 = vmatprep.subr.bf16.mxu1 %v8536_v35  ;;  %5028 = vmatprep.subr.bf16.mxu0 %v8539_v36  ;;  %v8611_v31 = vld [vmem:[%s9782_s0 + $0xa2c] ss:$16 sps:$4 sm:$0xff]   ;;  %v8606_v32 = vld [vmem:[%s9782_s0 + $0x928] ss:$16 sps:$4 sm:$0xff]  }
 0x625   : > { %v8609_v33 = vld [vmem:[%s9782_s0 + $0xa28] ss:$16 sps:$4 sm:$0xff]   ;;  %v8614_v34 = vld [vmem:[%s9782_s0 + $0x90c] ss:$16 sps:$4 sm:$0xff]  }
 0x626   : > { %v8617_v35 = vld [vmem:[%s9782_s0 + $0xa0c] ss:$16 sps:$4 sm:$0xff]   ;;  %v8612_v36 = vld [vmem:[%s9782_s0 + $0x908] ss:$16 sps:$4 sm:$0xff]  }
 0x627   : > { %5004 = vmatpush2.bf16.msra.mxu1 %v8534_v28  ;;  %5029 = vmatpush1.bf16.msra.mxu0 %v8537_v42  ;;  %v8615_v26 = vld [vmem:[%s9782_s0 + $0xa08] ss:$16 sps:$4 sm:$0xff]   ;;  %v8620_v7 = vld [vmem:[%s9782_s0 + $0xbec] ss:$16 sps:$4 sm:$0xff]  }
 0x628   : > { %5005 = vmatprep.subr.bf16.mxu1 %v8542_v56  ;;  %5030 = vmatprep.subr.bf16.mxu0 %v8545_v45  ;;  %v8623_v55 = vld [vmem:[%s9782_s0 + $0xcec] ss:$16 sps:$4 sm:$0xff]   ;;  %v8618_v28 = vld [vmem:[%s9782_s0 + $0xbe8] ss:$16 sps:$4 sm:$0xff]  }
 0x629   : > { %v8621_v42 = vld [vmem:[%s9782_s0 + $0xce8] ss:$16 sps:$4 sm:$0xff]   ;;  %v8626_v43 = vld [vmem:[%s9782_s0 + $0xbcc] ss:$16 sps:$4 sm:$0xff]  }
 0x62a   : > { %v8629_v44 = vld [vmem:[%s9782_s0 + $0xccc] ss:$16 sps:$4 sm:$0xff]  }
 0x62b   : > { %5006 = vmatpush2.bf16.msra.mxu1 %v8540_v1  ;;  %5031 = vmatpush1.bf16.msra.mxu0 %v8543_v48  ;;  %v8624_v1 = vld [vmem:[%s9782_s0 + $0xbc8] ss:$16 sps:$4 sm:$0xff]  }
 0x62c   : > { %5007 = vmatprep.subr.bf16.mxu1 %v8548_v50  ;;  %5032 = vmatprep.subr.bf16.mxu0 %v8551_v40  ;;  %v8627_v48 = vld [vmem:[%s9782_s0 + $0xcc8] ss:$16 sps:$4 sm:$0xff]  }
 0x62f   : > { %5008 = vmatpush2.bf16.msra.mxu1 %v8546_v38  ;;  %5033 = vmatpush1.bf16.msra.mxu0 %v8549_v51  ;;  %v8632_v38 = vld [vmem:[%s9782_s0 + $0xbac] ss:$16 sps:$4 sm:$0xff]  }
 0x630   : > { %5009 = vmatprep.subr.bf16.mxu1 %v8554_v52  ;;  %5034 = vmatprep.subr.bf16.mxu0 %v8557_v53  ;;  %v8635_v51 = vld [vmem:[%s9782_s0 + $0xcac] ss:$16 sps:$4 sm:$0xff]   ;;  %v8630_v53 = vld [vmem:[%s9782_s0 + $0xba8] ss:$16 sps:$4 sm:$0xff]  }
 0x633   : > { %5010 = vmatpush2.bf16.msra.mxu1 %v8552_v57  ;;  %5035 = vmatpush1.bf16.msra.mxu0 %v8555_v58  ;;  %v8633_v57 = vld [vmem:[%s9782_s0 + $0xca8] ss:$16 sps:$4 sm:$0xff]  }
 0x634   : > { %5011 = vmatprep.subr.bf16.mxu1 %v8560_v2  ;;  %5036 = vmatprep.subr.bf16.mxu0 %v8563_v54  ;;  %v8638_v54 = vld [vmem:[%s9782_s0 + $0xb8c] ss:$16 sps:$4 sm:$0xff]  }
 0x637   : > { %5012 = vmatpush2.bf16.msra.mxu1 %v8558_v59  ;;  %5037 = vmatpush1.bf16.msra.mxu0 %v8561_v60  ;;  %v8641_v59 = vld [vmem:[%s9782_s0 + $0xc8c] ss:$16 sps:$4 sm:$0xff]   ;;  %v8639_v60 = vld [vmem:[%s9782_s0 + $0xc88] ss:$16 sps:$4 sm:$0xff]  }
 0x638   : > { %5013 = vmatprep.subr.bf16.mxu1 %v8566_v21  ;;  %5038 = vmatprep.subr.bf16.mxu0 %v8569_v61  ;;  %v8644_v21 = vld [vmem:[%s9782_s0 + $0xb6c] ss:$16 sps:$4 sm:$0xff]  }
 0x639   : > { %v8647_v61 = vld [vmem:[%s9782_s0 + $0xc6c] ss:$16 sps:$4 sm:$0xff]  }
 0x63b   : > { %5014 = vmatpush2.bf16.msra.mxu1 %v8564_v62  ;;  %5039 = vmatpush1.bf16.msra.mxu0 %v8567_v63  ;;  %v8642_v62 = vld [vmem:[%s9782_s0 + $0xb68] ss:$16 sps:$4 sm:$0xff]  }
 0x63c   : > { %5040 = vmatprep.subr.bf16.mxu0 %v8572_v0  ;;  %5065 = vmatprep.subr.bf16.mxu1 %v8575_v3  ;;  %v8645_v63 = vld [vmem:[%s9782_s0 + $0xc68] ss:$16 sps:$4 sm:$0xff]   ;;  %v8650_v0 = vld [vmem:[%s9782_s0 + $0xb4c] ss:$16 sps:$4 sm:$0xff]  }
 0x63d   : > { %v8653_v3 = vld [vmem:[%s9782_s0 + $0xc4c] ss:$16 sps:$4 sm:$0xff]  }
 0x63e   : > { %5016 = vmatmul.mubr.bf16.vlgmr.msra.gmra.mxu1 %v10254_v8  ;;  %v8585_v8 = vld [vmem:[%s9782_s0 + $0xaa8] ss:$16 sps:$4 sm:$0xff]  }
 0x63f   : > { %5041 = vmatpush2.bf16.msra.mxu0 %v8570_v4  ;;  %5066 = vmatpush1.bf16.msra.mxu1 %v8573_v5  ;;  %v8648_v4 = vld [vmem:[%s9782_s0 + $0xb48] ss:$16 sps:$4 sm:$0xff]  }
 0x640   : > { %5097 = vmatprep.mubr.bf16.mxu1 %v10264_v29  ;;  %5042 = vmatprep.subr.bf16.mxu0 %v8578_v9  ;;  %v8588_v29 = vld [vmem:[%s9782_s0 + $0x988] ss:$16 sps:$4 sm:$0xff]   ;;  %v8656_v9 = vld [vmem:[%s9782_s0 + $0xb2c] ss:$16 sps:$4 sm:$0xff]  }
 0x641   : > { %5067 = vmatprep.subr.bf16.mxu1 %v8581_v10  ;;  %v8651_v5 = vld [vmem:[%s9782_s0 + $0xc48] ss:$16 sps:$4 sm:$0xff]   ;;  %v8659_v10 = vld [vmem:[%s9782_s0 + $0xc2c] ss:$16 sps:$4 sm:$0xff]  }
 0x643   : > { %5043 = vmatpush2.bf16.msra.mxu0 %v8576_v11  ;;  %5068 = vmatpush1.bf16.msra.mxu1 %v8579_v12  ;;  %v8654_v11 = vld [vmem:[%s9782_s0 + $0xb28] ss:$16 sps:$4 sm:$0xff]  }
 0x644   : > { %5044 = vmatprep.subr.bf16.mxu0 %v8584_v13  ;;  %5069 = vmatprep.subr.bf16.mxu1 %v8587_v14  ;;  %v8657_v12 = vld [vmem:[%s9782_s0 + $0xc28] ss:$16 sps:$4 sm:$0xff]   ;;  %v8662_v13 = vld [vmem:[%s9782_s0 + $0xb0c] ss:$16 sps:$4 sm:$0xff]  }
 0x645   : > { %v8665_v14 = vld [vmem:[%s9782_s0 + $0xc0c] ss:$16 sps:$4 sm:$0xff]  }
 0x647   : > { %5045 = vmatpush2.bf16.msra.mxu0 %v8582_v16  ;;  %5070 = vmatpush1.bf16.msra.mxu1 %v8585_v8  ;;  %v8660_v16 = vld [vmem:[%s9782_s0 + $0xb08] ss:$16 sps:$4 sm:$0xff]  }
 0x648   : > { %5046 = vmatprep.subr.bf16.mxu0 %v8590_v17  ;;  %5071 = vmatprep.subr.bf16.mxu1 %v8593_v18  ;;  %v8663_v8 = vld [vmem:[%s9782_s0 + $0xc08] ss:$16 sps:$4 sm:$0xff]  }
 0x64b   : > { %5047 = vmatpush2.bf16.msra.mxu0 %v8588_v29  ;;  %5072 = vmatpush1.bf16.msra.mxu1 %v8591_v15  ;;  %v2073_v15 = vld [vmem:[#allocation4 + $0x10] sm:$0xff] }
 0x64c   : > { %5048 = vmatprep.subr.bf16.mxu0 %v8596_v19  ;;  %5073 = vmatprep.subr.bf16.mxu1 %v8599_v20 }
 0x64f   : > { %5049 = vmatpush2.bf16.msra.mxu0 %v8594_v22  ;;  %5074 = vmatpush1.bf16.msra.mxu1 %v8597_v23  ;;  %v2074_v23 = vld [vmem:[#allocation4] sm:$0xff] }
 0x650   : > { %5050 = vmatprep.subr.bf16.mxu0 %v8602_v24  ;;  %5075 = vmatprep.subr.bf16.mxu1 %v8605_v25 }
 0x653   : > { %5051 = vmatpush2.bf16.msra.mxu0 %v8600_v27  ;;  %5076 = vmatpush1.bf16.msra.mxu1 %v8603_v46 }
 0x654   : > { %5052 = vmatprep.subr.bf16.mxu0 %v8608_v30  ;;  %5077 = vmatprep.subr.bf16.mxu1 %v8611_v31 }
 0x657   : > { %5053 = vmatpush2.bf16.msra.mxu0 %v8606_v32  ;;  %5078 = vmatpush1.bf16.msra.mxu1 %v8609_v33 }
 0x658   : > { %5054 = vmatprep.subr.bf16.mxu0 %v8614_v34  ;;  %5079 = vmatprep.subr.bf16.mxu1 %v8617_v35 }
 0x65b   : > { %5055 = vmatpush2.bf16.msra.mxu0 %v8612_v36  ;;  %5080 = vmatpush1.bf16.msra.mxu1 %v8615_v26 }
 0x65c   : > { %5081 = vmatprep.subr.bf16.mxu1 %v8620_v7  ;;  %5106 = vmatprep.subr.bf16.mxu0 %v8623_v55 }
 0x65e   : > { %v10562_v56 = vpop.f32.mrf.mxu1  ;;  %v10564_v45 = vpop.f32.mrf.mxu0  ;;  %5057 = vmatmul.mubr.bf16.vlgmr.msra.gmra.mxu0 %v10338_v49 }
 0x65f   : > { %5082 = vmatpush2.bf16.msra.mxu1 %v8618_v28  ;;  %5107 = vmatpush1.bf16.msra.mxu0 %v8621_v42  ;;  %v4772_v17 = vadd.f32 %v10562_v56, %v10495_v39 }
 0x660   : > { %v4773_v50 = vpop.f32.mrf.mxu1  ;;  %v10569_v40 = vpop.f32.mrf.mxu0  ;;  %5083 = vmatprep.subr.bf16.mxu1 %v8626_v43  ;;  %5108 = vmatprep.subr.bf16.mxu0 %v8629_v44 }
 0x661   : > { %5138 = vmatprep.mubr.bf16.mxu0 %v9412_v37  ;;  %v8636_v37 = vld [vmem:[%s9782_s0 + $0xb88] ss:$16 sps:$4 sm:$0xff]   ;;  %v4774_v18 = vadd.f32 %v4773_v50, %v10498_v41  ;;  %v4813_v29 = vadd.f32 %v10564_v45, %v4772_v17  ;;  %s10749_s0 = sld [smem:[#allocation51_spill]] (!%p7447_p10) }
 0x662   : > { %v4775_v49 = vpop.f32.mrf.mxu1  ;;  %v4816_v52 = vpop.f32.mrf.mxu0 }
 0x663   : > { %5084 = vmatpush2.bf16.msra.mxu1 %v8624_v1  ;;  %5109 = vmatpush1.bf16.msra.mxu0 %v8627_v48  ;;  %v4815_v20 = vadd.f32 %v10569_v40, %v4774_v18 }
 0x664   : > { %v4776_v58 = vpop.f32.mrf.mxu1  ;;  %v4817_v2 = vpop.f32.mrf.mxu0  ;;  %5085 = vmatprep.subr.bf16.mxu1 %v8632_v38  ;;  %5110 = vmatprep.subr.bf16.mxu0 %v8635_v51 }
 0x667   : > { %5086 = vmatpush2.bf16.msra.mxu1 %v8630_v53  ;;  %5111 = vmatpush1.bf16.msra.mxu0 %v8633_v57 }
 0x668   : > { %5087 = vmatprep.subr.bf16.mxu1 %v8638_v54  ;;  %5112 = vmatprep.subr.bf16.mxu0 %v8641_v59  ;;  %v2075_v59 = vld [vmem:[#allocation4 + $0x18] sm:$0xff] }
 0x66b   : > { %5088 = vmatpush2.bf16.msra.mxu1 %v8636_v37  ;;  %5113 = vmatpush1.bf16.msra.mxu0 %v8639_v60 }
 0x66c   : > { %5089 = vmatprep.subr.bf16.mxu1 %v8644_v21  ;;  %5114 = vmatprep.subr.bf16.mxu0 %v8647_v61 }
 0x66f   : > { %5090 = vmatpush2.bf16.msra.mxu1 %v8642_v62  ;;  %5115 = vmatpush1.bf16.msra.mxu0 %v8645_v63  ;;  %v2076_v62 = vld [vmem:[#allocation4 + $0x8] sm:$0xff] }
 0x670   : > { %5091 = vmatprep.subr.bf16.mxu1 %v8650_v0  ;;  %5116 = vmatprep.subr.bf16.mxu0 %v8653_v3 }
 0x673   : > { %5092 = vmatpush2.bf16.msra.mxu1 %v8648_v4  ;;  %5117 = vmatpush1.bf16.msra.mxu0 %v8651_v5 }
 0x674   : > { %5093 = vmatprep.subr.bf16.mxu1 %v8656_v9  ;;  %5118 = vmatprep.subr.bf16.mxu0 %v8659_v10 }
 0x677   : > { %5094 = vmatpush2.bf16.msra.mxu1 %v8654_v11  ;;  %5119 = vmatpush1.bf16.msra.mxu0 %v8657_v12 }
 0x678   : > { %5095 = vmatprep.subr.bf16.mxu1 %v8662_v13  ;;  %5120 = vmatprep.subr.bf16.mxu0 %v8665_v14 }
 0x67b   : > { %5096 = vmatpush2.bf16.msra.mxu1 %v8660_v16  ;;  %5121 = vmatpush1.bf16.msra.mxu0 %v8663_v8 }
 0x67e   : > { %v4853_v19 = vpop.f32.mrf.mxu1  ;;  %5098 = vmatmul.mubr.bf16.vlgmr.msra.gmra.mxu1 %v10334_v47  ;;  %5139 = vmatmul.mubr.bf16.vlgmr.msra.gmra.mxu0 %v10378_v6 }
 0x67f   : > { %v4854_v22 = vadd.f32 %v4853_v19, %v4813_v29 }
 0x680   : > { %v4855_v24 = vpop.f32.mrf.mxu1 }
 0x681   : > { %v5147_v25 = vadd.f32 %v4854_v22, %v2073_v15  ;;  %v4856_v27 = vadd.f32 %v4855_v24, %v4815_v20 }
 0x682   : > { %v4857_v39 = vpop.f32.mrf.mxu1 }
 0x683   : > { %5151 = vst [vmem:[#allocation4 + $0x10] sm:$0xff] %v5147_v25  ;;  %v5148_v41 = vadd.f32 %v4856_v27, %v2074_v23 }
 0x684   : > { %v4858_v46 = vpop.f32.mrf.mxu1 }
 0x685   : > { %5152 = vst [vmem:[#allocation4] sm:$0xff] %v5148_v41 }
 0x69e   : > { %v4894_v30 = vpop.f32.mrf.mxu0 }
 0x6a0   : > { %v4896_v31 = vpop.f32.mrf.mxu0 }
 0x6a2   : > { %v4898_v32 = vpop.f32.mrf.mxu0 }
 0x6a4   : > { %v4899_v33 = vpop.f32.mrf.mxu0 }
 0x6be   : > { %v4935_v34 = vpop.f32.mrf.mxu1 }
 0x6bf   : > { %v4936_v47 = vadd.f32 %v4935_v34, %v4894_v30 }
 0x6c0   : > { %v4937_v35 = vpop.f32.mrf.mxu1 }
 0x6c1   : > { %v4938_v6 = vadd.f32 %v4937_v35, %v4896_v31 }
 0x6c2   : > { %v4939_v36 = vpop.f32.mrf.mxu1 }
 0x6c4   : > { %v4940_v26 = vpop.f32.mrf.mxu1 }
 0x6de   : > { %v4976_v7 = vpop.f32.mrf.mxu0 }
 0x6df   : > { %v4977_v55 = vadd.f32 %v4976_v7, %v4936_v47 }
 0x6e0   : > { %v4978_v28 = vpop.f32.mrf.mxu0 }
 0x6e1   : > { %v4979_v42 = vadd.f32 %v4978_v28, %v4938_v6 }
 0x6e2   : > { %v4980_v43 = vpop.f32.mrf.mxu0 }
 0x6e4   : > { %v4981_v44 = vpop.f32.mrf.mxu0 }
 0x6fe   : > { %v5017_v56 = vpop.f32.mrf.mxu1 }
 0x6ff   : > { %v5018_v49 = vadd.f32 %v5017_v56, %v4977_v55 }
 0x700   : > { %v5019_v45 = vpop.f32.mrf.mxu1 }
 0x701   : > { %v5020_v52 = vadd.f32 %v5019_v45, %v4979_v42 }
 0x702   : > { %v5021_v1 = vpop.f32.mrf.mxu1 }
 0x704   : > { %v5022_v48 = vpop.f32.mrf.mxu1 }
 0x71e   : > { %v5058_v50 = vpop.f32.mrf.mxu0 }
 0x71f   : > { %v5059_v53 = vadd.f32 %v5058_v50, %v5018_v49 }
 0x720   : > { %v5060_v40 = vpop.f32.mrf.mxu0 }
 0x721   : > { %v5061_v2 = vadd.f32 %v5060_v40, %v5020_v52 }
 0x722   : > { %v5062_v38 = vpop.f32.mrf.mxu0 }
 0x724   : > { %v5063_v51 = vpop.f32.mrf.mxu0 }
 0x73e   : > { %v5099_v57 = vpop.f32.mrf.mxu1  ;;  %v5140_v58 = vpop.f32.mrf.mxu0 }
 0x73f   : > { %v5100_v54 = vadd.f32 %v5099_v57, %v5059_v53 }
 0x740   : > { %v5101_v37 = vpop.f32.mrf.mxu1  ;;  %v5142_v60 = vpop.f32.mrf.mxu0 }
 0x741   : > { %v5141_v21 = vadd.f32 %v5140_v58, %v5100_v54  ;;  %v5102_v61 = vadd.f32 %v5101_v37, %v5061_v2 }
 0x742   : > { %v5103_v63 = vpop.f32.mrf.mxu1  ;;  %v5144_v0 = vpop.f32.mrf.mxu0 }
 0x743   : > { %v5149_v3 = vadd.f32 %v5141_v21, %v2075_v59  ;;  %v5143_v4 = vadd.f32 %v5142_v60, %v5102_v61  ;;  %5158 = sbr.rel (%p7447_p10) target bundleno = 2558 (0x9fe), region = 160 }
 0x744   : > { %v5104_v5 = vpop.f32.mrf.mxu1  ;;  %v5145_v9 = vpop.f32.mrf.mxu0 }
 0x745   : > { %5153 = vst [vmem:[#allocation4 + $0x18] sm:$0xff] %v5149_v3  ;;  %v5150_v10 = vadd.f32 %v5143_v4, %v2076_v62 }
 0x747   : > { %5154 = vst [vmem:[#allocation4 + $0x8] sm:$0xff] %v5150_v10 }
 0x748   : > { %v8666_v11 = vld [vmem:[#allocation16 + $0x64] ss:$16 sps:$4 sm:$0xff]   ;;  %v8668_v12 = vld [vmem:[#allocation16 + $0x6c] ss:$16 sps:$4 sm:$0xff]   ;;  %v9413_v13 = vmov 0   ;;  %vm5257_vm9 = vcmask 523264  }
 0x749   : > { %5293 = vmatprep.mubr.bf16.mxu0 %v9413_v13  ;;  %5334 = vmatprep.mubr.bf16.mxu1 %v9413_v13  ;;  %v8670_v14 = vld [vmem:[#allocation16 + $0x60] ss:$16 sps:$4 sm:$0xff]   ;;  %v8671_v16 = vld [vmem:[#allocation16 + $0x68] ss:$16 sps:$4 sm:$0xff]   ;;  %v8672_v8 = vld [vmem:[#allocation16 + $0x44] ss:$16 sps:$4 sm:$0xff]  }
 0x74a   : > { %5269 = vmatprep.subr.bf16.mxu0 %v8666_v11  ;;  %5310 = vmatprep.subr.bf16.mxu1 %v8668_v12  ;;  %v8674_v17 = vld [vmem:[#allocation16 + $0x4c] ss:$16 sps:$4 sm:$0xff]   ;;  %v8676_v18 = vld [vmem:[#allocation16 + $0x40] ss:$16 sps:$4 sm:$0xff]   ;;  %v8677_v29 = vld [vmem:[#allocation16 + $0x48] ss:$16 sps:$4 sm:$0xff]  }
 0x74b   : > { %5270 = vmatpush1.bf16.msra.mxu0 %v8670_v14  ;;  %5311 = vmatpush1.bf16.msra.mxu1 %v8671_v16  ;;  %v8678_v15 = vld [vmem:[#allocation16 + $0x24] ss:$16 sps:$4 sm:$0xff]   ;;  %v8680_v19 = vld [vmem:[#allocation16 + $0x2c] ss:$16 sps:$4 sm:$0xff]   ;;  %v8682_v20 = vld [vmem:[#allocation16 + $0x20] ss:$16 sps:$4 sm:$0xff]  }
 0x74c   : > { %5271 = vmatprep.subr.bf16.mxu0 %v8672_v8  ;;  %5312 = vmatprep.subr.bf16.mxu1 %v8674_v17  ;;  %v8683_v22 = vld [vmem:[#allocation16 + $0x28] ss:$16 sps:$4 sm:$0xff]   ;;  %v8684_v23 = vld [vmem:[#allocation16 + $0x4] ss:$16 sps:$4 sm:$0xff]   ;;  %v8686_v24 = vld [vmem:[#allocation16 + $0xc] ss:$16 sps:$4 sm:$0xff]  }
 0x74d   : > { %v8688_v25 = vld [vmem:[#allocation16] ss:$16 sps:$4 sm:$0xff]   ;;  %v8689_v27 = vld [vmem:[#allocation16 + $0x8] ss:$16 sps:$4 sm:$0xff]   ;;  %v8692_v41 = vld [vmem:[#allocation19 + $0xe4] ss:$16 sps:$4 sm:$0xff]  }
 0x74e   : > { %v5159_v39 = vld [vmem:[#allocation3] sm:$0xff]  ;;  %v8695_v46 = vld [vmem:[#allocation19 + $0x2e4] ss:$16 sps:$4 sm:$0xff]  }
 0x74f   : > { %5272 = vmatpush1.bf16.msra.mxu0 %v8676_v18  ;;  %5313 = vmatpush1.bf16.msra.mxu1 %v8677_v29  ;;  %v5160_v30 = vpack.c.bf16 %v5159_v39, %v5159_v39  ;;  %v8690_v31 = vld [vmem:[#allocation19 + $0xe0] ss:$16 sps:$4 sm:$0xff]   ;;  %v8698_v33 = vld [vmem:[#allocation19 + $0xc4] ss:$16 sps:$4 sm:$0xff]  }
 0x750   : > { %5273 = vmatprep.subr.bf16.mxu0 %v8678_v15  ;;  %5314 = vmatprep.subr.bf16.mxu1 %v8680_v19  ;;  %v8693_v32 = vld [vmem:[#allocation19 + $0x2e0] ss:$16 sps:$4 sm:$0xff]   ;;  %v8701_v34 = vld [vmem:[#allocation19 + $0x2c4] ss:$16 sps:$4 sm:$0xff]  }
 0x751   : > { %v8696_v47 = vld [vmem:[#allocation19 + $0xc0] ss:$16 sps:$4 sm:$0xff]   ;;  %v8704_v6 = vld [vmem:[#allocation19 + $0xa4] ss:$16 sps:$4 sm:$0xff]  }
 0x752   : > { %v8699_v35 = vld [vmem:[#allocation19 + $0x2c0] ss:$16 sps:$4 sm:$0xff]   ;;  %v8707_v36 = vld [vmem:[#allocation19 + $0x2a4] ss:$16 sps:$4 sm:$0xff]  }
 0x753   : > { %5274 = vmatpush1.bf16.msra.mxu0 %v8682_v20  ;;  %5315 = vmatpush1.bf16.msra.mxu1 %v8683_v22  ;;  %v8702_v26 = vld [vmem:[#allocation19 + $0xa0] ss:$16 sps:$4 sm:$0xff]   ;;  %v8710_v55 = vld [vmem:[#allocation19 + $0x84] ss:$16 sps:$4 sm:$0xff]  }
 0x754   : > { %5275 = vmatprep.subr.bf16.mxu0 %v8684_v23  ;;  %5316 = vmatprep.subr.bf16.mxu1 %v8686_v24  ;;  %v8705_v7 = vld [vmem:[#allocation19 + $0x2a0] ss:$16 sps:$4 sm:$0xff]   ;;  %v8713_v28 = vld [vmem:[#allocation19 + $0x284] ss:$16 sps:$4 sm:$0xff]  }
 0x755   : > { %v8708_v42 = vld [vmem:[#allocation19 + $0x80] ss:$16 sps:$4 sm:$0xff]   ;;  %v8716_v44 = vld [vmem:[#allocation19 + $0x64] ss:$16 sps:$4 sm:$0xff]  }
 0x756   : > { %v8711_v43 = vld [vmem:[#allocation19 + $0x280] ss:$16 sps:$4 sm:$0xff]   ;;  %v8719_v56 = vld [vmem:[#allocation19 + $0x264] ss:$16 sps:$4 sm:$0xff]  }
 0x757   : > { %5276 = vmatpush1.bf16.msra.mxu0 %v8688_v25  ;;  %5317 = vmatpush1.bf16.msra.mxu1 %v8689_v27  ;;  %v8714_v45 = vld [vmem:[#allocation19 + $0x60] ss:$16 sps:$4 sm:$0xff]   ;;  %v8722_v48 = vld [vmem:[#allocation19 + $0x44] ss:$16 sps:$4 sm:$0xff]  }
 0x758   : > { %6179 = vmatprep.subr.bf16.mxu0 %v8692_v41  ;;  %6220 = vmatprep.subr.bf16.mxu1 %v8695_v46  ;;  %v8717_v1 = vld [vmem:[#allocation19 + $0x260] ss:$16 sps:$4 sm:$0xff]   ;;  %v8725_v50 = vld [vmem:[#allocation19 + $0x244] ss:$16 sps:$4 sm:$0xff]   ;;  %v8788_v46 = vld [vmem:[#allocation19 + $0xec] ss:$16 sps:$4 sm:$0xff]  }
 0x759   : > { %v8720_v40 = vld [vmem:[#allocation19 + $0x40] ss:$16 sps:$4 sm:$0xff]   ;;  %v8728_v51 = vld [vmem:[#allocation19 + $0x24] ss:$16 sps:$4 sm:$0xff]  }
 0x75a   : > { %7464 = vmatmul.mubr.msk.bf16.vlgmr.msra.gmra.mxu0 %vm5257_vm9, %v5160_v30  ;;  %7465 = vmatmul.mubr.msk.bf16.vlgmr.msra.gmra.mxu1 %vm5257_vm9, %v5160_v30  ;;  %v8723_v38 = vld [vmem:[#allocation19 + $0x240] ss:$16 sps:$4 sm:$0xff]   ;;  %v8731_v49 = vld [vmem:[#allocation19 + $0x224] ss:$16 sps:$4 sm:$0xff]   ;;  %v8791_v30 = vld [vmem:[#allocation19 + $0x2ec] ss:$16 sps:$4 sm:$0xff]  }
 0x75b   : > { %6180 = vmatpush1.bf16.msra.mxu0 %v8690_v31  ;;  %6221 = vmatpush1.bf16.msra.mxu1 %v8693_v32  ;;  %v8726_v52 = vld [vmem:[#allocation19 + $0x20] ss:$16 sps:$4 sm:$0xff]   ;;  %v8734_v57 = vld [vmem:[#allocation19 + $0x4] ss:$16 sps:$4 sm:$0xff]   ;;  %v5353_v31 = vlaneseq }
 0x75c   : > { %6181 = vmatprep.subr.bf16.mxu0 %v8698_v33  ;;  %6222 = vmatprep.subr.bf16.mxu1 %v8701_v34  ;;  %v8729_v53 = vld [vmem:[#allocation19 + $0x220] ss:$16 sps:$4 sm:$0xff]   ;;  %v8737_v58 = vld [vmem:[#allocation19 + $0x204] ss:$16 sps:$4 sm:$0xff]  }
 0x75d   : > { %v8732_v2 = vld [vmem:[#allocation19] ss:$16 sps:$4 sm:$0xff]   ;;  %v8740_v59 = vld [vmem:[#allocation19 + $0x1e4] ss:$16 sps:$4 sm:$0xff]   ;;  %v5354_v32 = vshrl.u32 %v5353_v31, 7 }
 0x75e   : > { %v8735_v54 = vld [vmem:[#allocation19 + $0x200] ss:$16 sps:$4 sm:$0xff]   ;;  %v8743_v37 = vld [vmem:[#allocation19 + $0x3e4] ss:$16 sps:$4 sm:$0xff]   ;;  %v8810_v31 = vld [vmem:[#allocation19 + $0x68] ss:$16 sps:$4 sm:$0xff]  }
 0x75f   : > { %6182 = vmatpush1.bf16.msra.mxu0 %v8696_v47  ;;  %6223 = vmatpush1.bf16.msra.mxu1 %v8699_v35  ;;  %v8738_v60 = vld [vmem:[#allocation19 + $0x1e0] ss:$16 sps:$4 sm:$0xff]   ;;  %v8746_v61 = vld [vmem:[#allocation19 + $0x1c4] ss:$16 sps:$4 sm:$0xff]   ;;  %v10604_v33 = vsub.s32 0, %v5354_v32  ;;  %v10606_v34 = vsub.s32 2, %v5354_v32 }
 0x760   : > { %6183 = vmatprep.subr.bf16.mxu0 %v8704_v6  ;;  %6224 = vmatprep.subr.bf16.mxu1 %v8707_v36  ;;  %v8741_v21 = vld [vmem:[#allocation19 + $0x3e0] ss:$16 sps:$4 sm:$0xff]   ;;  %v8749_v62 = vld [vmem:[#allocation19 + $0x3c4] ss:$16 sps:$4 sm:$0xff]   ;;  %v5351_v47 = vld [vmem:[#allocation17] sm:$0xf] }
 0x761   : > { %v8744_v63 = vld [vmem:[#allocation19 + $0x1c0] ss:$16 sps:$4 sm:$0xff]   ;;  %v8752_v3 = vld [vmem:[#allocation19 + $0x1a4] ss:$16 sps:$4 sm:$0xff]   ;;  %v5377_v35 = vld [vmem:[#allocation18] sm:$0xf] }
 0x762   : > { %v8747_v0 = vld [vmem:[#allocation19 + $0x3c0] ss:$16 sps:$4 sm:$0xff]   ;;  %v8755_v4 = vld [vmem:[#allocation19 + $0x3a4] ss:$16 sps:$4 sm:$0xff]   ;;  %v10608_v6 = vsub.s32 1, %v5354_v32  ;;  %v10610_v36 = vsub.s32 3, %v5354_v32 }
 0x763   : > { %6184 = vmatpush1.bf16.msra.mxu0 %v8702_v26  ;;  %6225 = vmatpush1.bf16.msra.mxu1 %v8705_v7  ;;  %v8750_v5 = vld [vmem:[#allocation19 + $0x1a0] ss:$16 sps:$4 sm:$0xff]   ;;  %v8758_v10 = vld [vmem:[#allocation19 + $0x184] ss:$16 sps:$4 sm:$0xff]   ;;  %v8813_v32 = vld [vmem:[#allocation19 + $0x268] ss:$16 sps:$4 sm:$0xff]  }
 0x764   : > { %6185 = vmatprep.subr.bf16.mxu0 %v8710_v55  ;;  %6226 = vmatprep.subr.bf16.mxu1 %v8713_v28  ;;  %v8753_v9 = vld [vmem:[#allocation19 + $0x3a0] ss:$16 sps:$4 sm:$0xff]   ;;  %v8761_v11 = vld [vmem:[#allocation19 + $0x384] ss:$16 sps:$4 sm:$0xff]   ;;  %v5356_v55 = vrot.slane %v5351_v47, %v10604_v33  ;;  %v5364_v28 = vrot.slane %v5351_v47, %v10606_v34 }
 0x765   : > { %v8756_v12 = vld [vmem:[#allocation19 + $0x180] ss:$16 sps:$4 sm:$0xff]   ;;  %v8764_v14 = vld [vmem:[#allocation19 + $0x164] ss:$16 sps:$4 sm:$0xff]  }
 0x766   : > { %v8759_v13 = vld [vmem:[#allocation19 + $0x380] ss:$16 sps:$4 sm:$0xff]   ;;  %v8767_v16 = vld [vmem:[#allocation19 + $0x364] ss:$16 sps:$4 sm:$0xff]  }
 0x767   : > { %6186 = vmatpush1.bf16.msra.mxu0 %v8708_v42  ;;  %6227 = vmatpush1.bf16.msra.mxu1 %v8711_v43  ;;  %v8762_v8 = vld [vmem:[#allocation19 + $0x160] ss:$16 sps:$4 sm:$0xff]   ;;  %v8770_v18 = vld [vmem:[#allocation19 + $0x144] ss:$16 sps:$4 sm:$0xff]   ;;  %v5382_v43 = vrot.slane %v5377_v35, %v10604_v33 }
 0x768   : > { %6187 = vmatprep.subr.bf16.mxu0 %v8716_v44  ;;  %6228 = vmatprep.subr.bf16.mxu1 %v8719_v56  ;;  %v8765_v17 = vld [vmem:[#allocation19 + $0x360] ss:$16 sps:$4 sm:$0xff]   ;;  %v8773_v29 = vld [vmem:[#allocation19 + $0x344] ss:$16 sps:$4 sm:$0xff]   ;;  %v5390_v56 = vrot.slane %v5377_v35, %v10606_v34 }
 0x769   : > { %v8768_v15 = vld [vmem:[#allocation19 + $0x140] ss:$16 sps:$4 sm:$0xff]   ;;  %v8776_v20 = vld [vmem:[#allocation19 + $0x124] ss:$16 sps:$4 sm:$0xff]  }
 0x76a   : > { %v8771_v19 = vld [vmem:[#allocation19 + $0x340] ss:$16 sps:$4 sm:$0xff]   ;;  %v8779_v22 = vld [vmem:[#allocation19 + $0x324] ss:$16 sps:$4 sm:$0xff]  }
 0x76b   : > { %6188 = vmatpush1.bf16.msra.mxu0 %v8714_v45  ;;  %6229 = vmatpush1.bf16.msra.mxu1 %v8717_v1  ;;  %v8774_v23 = vld [vmem:[#allocation19 + $0x120] ss:$16 sps:$4 sm:$0xff]   ;;  %v8782_v25 = vld [vmem:[#allocation19 + $0x104] ss:$16 sps:$4 sm:$0xff]  }
 0x76c   : > { %6189 = vmatprep.subr.bf16.mxu0 %v8722_v48  ;;  %6230 = vmatprep.subr.bf16.mxu1 %v8725_v50  ;;  %v8777_v24 = vld [vmem:[#allocation19 + $0x320] ss:$16 sps:$4 sm:$0xff]   ;;  %v8785_v27 = vld [vmem:[#allocation19 + $0x304] ss:$16 sps:$4 sm:$0xff]  }
 0x76d   : > { %v8780_v39 = vld [vmem:[#allocation19 + $0x100] ss:$16 sps:$4 sm:$0xff]  }
 0x76e   : > { %v8783_v41 = vld [vmem:[#allocation19 + $0x300] ss:$16 sps:$4 sm:$0xff]  }
 0x76f   : > { %6190 = vmatpush1.bf16.msra.mxu0 %v8720_v40  ;;  %6231 = vmatpush1.bf16.msra.mxu1 %v8723_v38  ;;  %v5343_v26 = vld [vmem:[#allocation4 + $0x10] sm:$0xff]  ;;  %v5345_v7 = vld [vmem:[#allocation4 + $0x18] sm:$0xff]  ;;  %v5344_v45 = vld [vmem:[#allocation4] sm:$0xff]  ;;  %v5360_v40 = vrot.slane %v5351_v47, %v10608_v6  ;;  %v5368_v38 = vrot.slane %v5351_v47, %v10610_v36 }
 0x770   : > { %6191 = vmatprep.subr.bf16.mxu0 %v8728_v51  ;;  %6232 = vmatprep.subr.bf16.mxu1 %v8731_v49  ;;  %v5346_v1 = vld [vmem:[#allocation4 + $0x8] sm:$0xff]  ;;  %v5386_v49 = vrot.slane %v5377_v35, %v10608_v6 }
 0x771   : > { %v8818_v47 = vld [vmem:[#allocation19 + $0x4c] ss:$16 sps:$4 sm:$0xff]  }
 0x773   : > { %6192 = vmatpush1.bf16.msra.mxu0 %v8726_v52  ;;  %6233 = vmatpush1.bf16.msra.mxu1 %v8729_v53  ;;  %v5394_v53 = vrot.slane %v5377_v35, %v10610_v36  ;;  %v8821_v35 = vld [vmem:[#allocation19 + $0x24c] ss:$16 sps:$4 sm:$0xff]  }
 0x774   : > { %6193 = vmatprep.subr.bf16.mxu0 %v8734_v57  ;;  %6234 = vmatprep.subr.bf16.mxu1 %v8737_v58 }
 0x777   : > { %6194 = vmatpush1.bf16.msra.mxu0 %v8732_v2  ;;  %6235 = vmatpush1.bf16.msra.mxu1 %v8735_v54 }
 0x778   : > { %6195 = vmatprep.subr.bf16.mxu0 %v8740_v59  ;;  %6236 = vmatprep.subr.bf16.mxu1 %v8743_v37 }
 0x77b   : > { %6196 = vmatpush2.bf16.msra.mxu0 %v8738_v60  ;;  %6237 = vmatpush2.bf16.msra.mxu1 %v8741_v21 }
 0x77c   : > { %6197 = vmatprep.subr.bf16.mxu0 %v8746_v61  ;;  %6238 = vmatprep.subr.bf16.mxu1 %v8749_v62 }
 0x77f   : > { %6198 = vmatpush2.bf16.msra.mxu0 %v8744_v63  ;;  %6239 = vmatpush2.bf16.msra.mxu1 %v8747_v0 }
 0x780   : > { %6199 = vmatprep.subr.bf16.mxu0 %v8752_v3  ;;  %6240 = vmatprep.subr.bf16.mxu1 %v8755_v4 }
 0x783   : > { %6200 = vmatpush2.bf16.msra.mxu0 %v8750_v5  ;;  %6241 = vmatpush2.bf16.msra.mxu1 %v8753_v9 }
 0x784   : > { %6201 = vmatprep.subr.bf16.mxu0 %v8758_v10  ;;  %6242 = vmatprep.subr.bf16.mxu1 %v8761_v11 }
 0x787   : > { %6202 = vmatpush2.bf16.msra.mxu0 %v8756_v12  ;;  %6243 = vmatpush2.bf16.msra.mxu1 %v8759_v13 }
 0x788   : > { %6203 = vmatprep.subr.bf16.mxu0 %v8764_v14  ;;  %6244 = vmatprep.subr.bf16.mxu1 %v8767_v16  ;;  %v8786_v14 = vld [vmem:[#allocation19 + $0xe8] ss:$16 sps:$4 sm:$0xff]  }
 0x789   : > { %v8789_v16 = vld [vmem:[#allocation19 + $0x2e8] ss:$16 sps:$4 sm:$0xff]  }
 0x78b   : > { %6204 = vmatpush2.bf16.msra.mxu0 %v8762_v8  ;;  %6245 = vmatpush2.bf16.msra.mxu1 %v8765_v17 }
 0x78c   : > { %6205 = vmatprep.subr.bf16.mxu0 %v8770_v18  ;;  %6246 = vmatprep.subr.bf16.mxu1 %v8773_v29  ;;  %v8794_v18 = vld [vmem:[#allocation19 + $0xcc] ss:$16 sps:$4 sm:$0xff]  }
 0x78d   : > { %v8797_v29 = vld [vmem:[#allocation19 + $0x2cc] ss:$16 sps:$4 sm:$0xff]  }
 0x78f   : > { %6206 = vmatpush2.bf16.msra.mxu0 %v8768_v15  ;;  %6247 = vmatpush2.bf16.msra.mxu1 %v8771_v19  ;;  %v8792_v15 = vld [vmem:[#allocation19 + $0xc8] ss:$16 sps:$4 sm:$0xff]  }
 0x790   : > { %6207 = vmatprep.subr.bf16.mxu0 %v8776_v20  ;;  %6248 = vmatprep.subr.bf16.mxu1 %v8779_v22  ;;  %v8795_v19 = vld [vmem:[#allocation19 + $0x2c8] ss:$16 sps:$4 sm:$0xff]   ;;  %v8800_v20 = vld [vmem:[#allocation19 + $0xac] ss:$16 sps:$4 sm:$0xff]  }
 0x791   : > { %v8803_v22 = vld [vmem:[#allocation19 + $0x2ac] ss:$16 sps:$4 sm:$0xff]  }
 0x793   : > { %6208 = vmatpush2.bf16.msra.mxu0 %v8774_v23  ;;  %6249 = vmatpush2.bf16.msra.mxu1 %v8777_v24  ;;  %v8798_v23 = vld [vmem:[#allocation19 + $0xa8] ss:$16 sps:$4 sm:$0xff]  }
 0x794   : > { %6209 = vmatprep.subr.bf16.mxu0 %v8782_v25  ;;  %6250 = vmatprep.subr.bf16.mxu1 %v8785_v27  ;;  %v8801_v24 = vld [vmem:[#allocation19 + $0x2a8] ss:$16 sps:$4 sm:$0xff]   ;;  %v8806_v25 = vld [vmem:[#allocation19 + $0x8c] ss:$16 sps:$4 sm:$0xff]  }
 0x795   : > { %v8809_v27 = vld [vmem:[#allocation19 + $0x28c] ss:$16 sps:$4 sm:$0xff]  }
 0x797   : > { %6210 = vmatpush2.bf16.msra.mxu0 %v8780_v39  ;;  %6251 = vmatpush2.bf16.msra.mxu1 %v8783_v41  ;;  %v8804_v39 = vld [vmem:[#allocation19 + $0x88] ss:$16 sps:$4 sm:$0xff]  }
 0x798   : > { %6261 = vmatprep.subr.bf16.mxu0 %v8788_v46  ;;  %6302 = vmatprep.subr.bf16.mxu1 %v8791_v30  ;;  %v8807_v41 = vld [vmem:[#allocation19 + $0x288] ss:$16 sps:$4 sm:$0xff]   ;;  %v8812_v46 = vld [vmem:[#allocation19 + $0x6c] ss:$16 sps:$4 sm:$0xff]  }
 0x799   : > { %v8815_v30 = vld [vmem:[#allocation19 + $0x26c] ss:$16 sps:$4 sm:$0xff]  }
 0x81a   : > { %v5295_v42 = vpop.f32.mrf.mxu0  ;;  %v5336_v44 = vpop.f32.mrf.mxu1 }
 0x81b   : > { %v5347_v48 = vadd.f32 %v5343_v26, %v5295_v42  ;;  %v5349_v50 = vadd.f32 %v5345_v7, %v5336_v44  ;;  %v8816_v26 = vld [vmem:[#allocation19 + $0x48] ss:$16 sps:$4 sm:$0xff]   ;;  %v8830_v44 = vld [vmem:[#allocation19 + $0xc] ss:$16 sps:$4 sm:$0xff]  }
 0x81c   : > { %v5297_v51 = vpop.f32.mrf.mxu0  ;;  %v5338_v52 = vpop.f32.mrf.mxu1  ;;  %v8819_v7 = vld [vmem:[#allocation19 + $0x248] ss:$16 sps:$4 sm:$0xff]  }
 0x81d   : > { %v5373_v57 = vmul.f32 %v5356_v55, %v5347_v48  ;;  %v5375_v58 = vmul.f32 %v5364_v28, %v5349_v50  ;;  %v5348_v2 = vadd.f32 %v5344_v45, %v5297_v51  ;;  %v5350_v54 = vadd.f32 %v5346_v1, %v5338_v52  ;;  %v8824_v55 = vld [vmem:[#allocation19 + $0x2c] ss:$16 sps:$4 sm:$0xff]   ;;  %v8822_v42 = vld [vmem:[#allocation19 + $0x28] ss:$16 sps:$4 sm:$0xff]  }
 0x81e   : > { %v5299_v59 = vpop.f32.mrf.mxu0  ;;  %v5340_v37 = vpop.f32.mrf.mxu1  ;;  %v8827_v28 = vld [vmem:[#allocation19 + $0x22c] ss:$16 sps:$4 sm:$0xff]   ;;  %v8828_v45 = vld [vmem:[#allocation19 + $0x8] ss:$16 sps:$4 sm:$0xff]  }
 0x81f   : > { %v5399_v60 = vadd.f32 %v5382_v43, %v5373_v57  ;;  %v5401_v21 = vadd.f32 %v5390_v56, %v5375_v58  ;;  %v5374_v61 = vmul.f32 %v5360_v40, %v5348_v2  ;;  %v5376_v62 = vmul.f32 %v5368_v38, %v5350_v54  ;;  %v8825_v43 = vld [vmem:[#allocation19 + $0x228] ss:$16 sps:$4 sm:$0xff]   ;;  %v8833_v56 = vld [vmem:[#allocation19 + $0x20c] ss:$16 sps:$4 sm:$0xff]  }
 0x820   : > { %v5300_v63 = vpop.f32.mrf.mxu0  ;;  %v5341_v0 = vpop.f32.mrf.mxu1  ;;  %v8831_v1 = vld [vmem:[#allocation19 + $0x208] ss:$16 sps:$4 sm:$0xff]   ;;  %v8836_v48 = vld [vmem:[#allocation19 + $0x1ec] ss:$16 sps:$4 sm:$0xff]  }
 0x821   : > { %v5400_v3 = vadd.f32 %v5386_v49, %v5374_v61  ;;  %v5402_v4 = vadd.f32 %v5394_v53, %v5376_v62  ;;  %v5403_v5 = vmax.f32 %v5399_v60, 0.0  ;;  %v5405_v9 = vmax.f32 %v5401_v21, 0.0  ;;  %v8839_v50 = vld [vmem:[#allocation19 + $0x3ec] ss:$16 sps:$4 sm:$0xff]   ;;  %v8834_v40 = vld [vmem:[#allocation19 + $0x1e8] ss:$16 sps:$4 sm:$0xff]  }
 0x822   : > { %v8837_v38 = vld [vmem:[#allocation19 + $0x3e8] ss:$16 sps:$4 sm:$0xff]   ;;  %v8842_v51 = vld [vmem:[#allocation19 + $0x1cc] ss:$16 sps:$4 sm:$0xff]  }
 0x823   : > { %v5404_v10 = vmax.f32 %v5400_v3, 0.0  ;;  %v5406_v11 = vmax.f32 %v5402_v4, 0.0  ;;  %v10620_v8 = vpack.c.bf16 %v5403_v5, %v5403_v5  ;;  %v10622_v17 = vpack.c.bf16 %v5405_v9, %v5405_v9  ;;  %v8845_v49 = vld [vmem:[#allocation19 + $0x3cc] ss:$16 sps:$4 sm:$0xff]   ;;  %v8840_v52 = vld [vmem:[#allocation19 + $0x1c8] ss:$16 sps:$4 sm:$0xff]  }
 0x824   : > { %v8843_v53 = vld [vmem:[#allocation19 + $0x3c8] ss:$16 sps:$4 sm:$0xff]   ;;  %v8848_v57 = vld [vmem:[#allocation19 + $0x1ac] ss:$16 sps:$4 sm:$0xff]  }
 0x825   : > { %v5408_v12 = vpack.c.bf16 %v5404_v10, %v5404_v10  ;;  %v5410_v13 = vpack.c.bf16 %v5406_v11, %v5406_v11  ;;  %v8851_v58 = vld [vmem:[#allocation19 + $0x3ac] ss:$16 sps:$4 sm:$0xff]   ;;  %v8846_v2 = vld [vmem:[#allocation19 + $0x1a8] ss:$16 sps:$4 sm:$0xff]  }
 0x826   : > { %v8849_v54 = vld [vmem:[#allocation19 + $0x3a8] ss:$16 sps:$4 sm:$0xff]   ;;  %v8854_v59 = vld [vmem:[#allocation19 + $0x18c] ss:$16 sps:$4 sm:$0xff]  }
 0x827   : > { %6211 = vmatprep.mubr.bf16.mxu0 %v5408_v12  ;;  %6252 = vmatprep.mubr.bf16.mxu1 %v5410_v13  ;;  %v8857_v37 = vld [vmem:[#allocation19 + $0x38c] ss:$16 sps:$4 sm:$0xff]   ;;  %v8852_v60 = vld [vmem:[#allocation19 + $0x188] ss:$16 sps:$4 sm:$0xff]  }
 0x828   : > { %6212 = vmatmul.mubr.bf16.vlgmr.msra.gmra.mxu0 %v10620_v8  ;;  %6253 = vmatmul.mubr.bf16.vlgmr.msra.gmra.mxu1 %v10622_v17  ;;  %v8855_v21 = vld [vmem:[#allocation19 + $0x388] ss:$16 sps:$4 sm:$0xff]   ;;  %v8860_v61 = vld [vmem:[#allocation19 + $0x16c] ss:$16 sps:$4 sm:$0xff]  }
 0x829   : > { %6262 = vmatpush1.bf16.msra.mxu0 %v8786_v14  ;;  %6303 = vmatpush1.bf16.msra.mxu1 %v8789_v16  ;;  %v8863_v62 = vld [vmem:[#allocation19 + $0x36c] ss:$16 sps:$4 sm:$0xff]   ;;  %v8858_v63 = vld [vmem:[#allocation19 + $0x168] ss:$16 sps:$4 sm:$0xff]  }
 0x82a   : > { %6293 = vmatprep.mubr.bf16.mxu0 %v5408_v12  ;;  %6334 = vmatprep.mubr.bf16.mxu1 %v5410_v13  ;;  %v8861_v0 = vld [vmem:[#allocation19 + $0x368] ss:$16 sps:$4 sm:$0xff]   ;;  %v8866_v3 = vld [vmem:[#allocation19 + $0x14c] ss:$16 sps:$4 sm:$0xff]  }
 0x82b   : > { %6263 = vmatprep.subr.bf16.mxu0 %v8794_v18  ;;  %6304 = vmatprep.subr.bf16.mxu1 %v8797_v29  ;;  %v8869_v4 = vld [vmem:[#allocation19 + $0x34c] ss:$16 sps:$4 sm:$0xff]   ;;  %v8864_v5 = vld [vmem:[#allocation19 + $0x148] ss:$16 sps:$4 sm:$0xff]  }
 0x82c   : > { %v8867_v9 = vld [vmem:[#allocation19 + $0x348] ss:$16 sps:$4 sm:$0xff]   ;;  %v8872_v10 = vld [vmem:[#allocation19 + $0x12c] ss:$16 sps:$4 sm:$0xff]  }
 0x82d   : > { %6264 = vmatpush1.bf16.msra.mxu0 %v8792_v15  ;;  %6305 = vmatpush1.bf16.msra.mxu1 %v8795_v19  ;;  %v8875_v11 = vld [vmem:[#allocation19 + $0x32c] ss:$16 sps:$4 sm:$0xff]   ;;  %v8870_v12 = vld [vmem:[#allocation19 + $0x128] ss:$16 sps:$4 sm:$0xff]   ;;  %v8882_v15 = vld [vmem:[#allocation24 + $0x78] sm:$0xff]  }
 0x82e   : > { %6265 = vmatprep.subr.bf16.mxu0 %v8800_v20  ;;  %6306 = vmatprep.subr.bf16.mxu1 %v8803_v22  ;;  %v8873_v13 = vld [vmem:[#allocation19 + $0x328] ss:$16 sps:$4 sm:$0xff]   ;;  %v8878_v14 = vld [vmem:[#allocation19 + $0x10c] ss:$16 sps:$4 sm:$0xff]   ;;  %v8883_v19 = vld [vmem:[#allocation24 + $0x38] sm:$0xff]  }
 0x82f   : > { %v8881_v16 = vld [vmem:[#allocation19 + $0x30c] ss:$16 sps:$4 sm:$0xff]   ;;  %v8876_v18 = vld [vmem:[#allocation19 + $0x108] ss:$16 sps:$4 sm:$0xff]  }
 0x830   : > { %v8879_v29 = vld [vmem:[#allocation19 + $0x308] ss:$16 sps:$4 sm:$0xff]  }
 0x831   : > { %6266 = vmatpush1.bf16.msra.mxu0 %v8798_v23  ;;  %6307 = vmatpush1.bf16.msra.mxu1 %v8801_v24  ;;  %v8884_v20 = vld [vmem:[#allocation24 + $0x70] sm:$0xff]   ;;  %v8886_v23 = vld [vmem:[#allocation24 + $0x68] sm:$0xff]  }
 0x832   : > { %6267 = vmatprep.subr.bf16.mxu0 %v8806_v25  ;;  %6308 = vmatprep.subr.bf16.mxu1 %v8809_v27  ;;  %v8885_v22 = vld [vmem:[#allocation24 + $0x30] sm:$0xff]   ;;  %v8887_v24 = vld [vmem:[#allocation24 + $0x28] sm:$0xff]   ;;  %v8888_v25 = vld [vmem:[#allocation24 + $0x60] sm:$0xff]  }
 0x833   : > { %v8889_v27 = vld [vmem:[#allocation24 + $0x20] sm:$0xff]  }
 0x835   : > { %6268 = vmatpush1.bf16.msra.mxu0 %v8804_v39  ;;  %6309 = vmatpush1.bf16.msra.mxu1 %v8807_v41  ;;  %v8890_v39 = vld [vmem:[#allocation24 + $0x58] sm:$0xff]  }
 0x836   : > { %6269 = vmatprep.subr.bf16.mxu0 %v8812_v46  ;;  %6310 = vmatprep.subr.bf16.mxu1 %v8815_v30  ;;  %v8891_v41 = vld [vmem:[#allocation24 + $0x18] sm:$0xff]   ;;  %v8892_v46 = vld [vmem:[#allocation24 + $0x50] sm:$0xff]  }
 0x837   : > { %v8898_v30 = vld [vmem:[#allocation24 + $0xf8] sm:$0xff]  }
 0x839   : > { %6270 = vmatpush1.bf16.msra.mxu0 %v8810_v31  ;;  %6311 = vmatpush1.bf16.msra.mxu1 %v8813_v32  ;;  %v8900_v31 = vld [vmem:[#allocation24 + $0xf0] sm:$0xff]  }
 0x83a   : > { %6271 = vmatprep.subr.bf16.mxu0 %v8818_v47  ;;  %6312 = vmatprep.subr.bf16.mxu1 %v8821_v35  ;;  %v8901_v32 = vld [vmem:[#allocation24 + $0xb0] sm:$0xff]   ;;  %v8894_v47 = vld [vmem:[#allocation24 + $0x48] sm:$0xff]  }
 0x83b   : > { %v8902_v35 = vld [vmem:[#allocation24 + $0xe8] sm:$0xff]  }
 0x83d   : > { %6272 = vmatpush1.bf16.msra.mxu0 %v8816_v26  ;;  %6313 = vmatpush1.bf16.msra.mxu1 %v8819_v7  ;;  %v8895_v26 = vld [vmem:[#allocation24 + $0x8] sm:$0xff]  }
 0x83e   : > { %6273 = vmatprep.subr.bf16.mxu0 %v8824_v55  ;;  %6314 = vmatprep.subr.bf16.mxu1 %v8827_v28  ;;  %v8903_v7 = vld [vmem:[#allocation24 + $0xa8] sm:$0xff]   ;;  %v8896_v55 = vld [vmem:[#allocation24 + $0x40] sm:$0xff]  }
 0x83f   : > { %v8904_v28 = vld [vmem:[#allocation24 + $0xe0] sm:$0xff]  }
 0x841   : > { %6274 = vmatpush1.bf16.msra.mxu0 %v8822_v42  ;;  %6315 = vmatpush1.bf16.msra.mxu1 %v8825_v43  ;;  %v8897_v42 = vld [vmem:[#allocation24] sm:$0xff]  }
 0x842   : > { %6275 = vmatprep.subr.bf16.mxu0 %v8830_v44  ;;  %6316 = vmatprep.subr.bf16.mxu1 %v8833_v56  ;;  %v8905_v43 = vld [vmem:[#allocation24 + $0xa0] sm:$0xff]   ;;  %v8906_v44 = vld [vmem:[#allocation24 + $0xd8] sm:$0xff]  }
 0x843   : > { %v8907_v56 = vld [vmem:[#allocation24 + $0x98] sm:$0xff]  }
 0x845   : > { %6276 = vmatpush1.bf16.msra.mxu0 %v8828_v45  ;;  %6317 = vmatpush1.bf16.msra.mxu1 %v8831_v1  ;;  %v8908_v45 = vld [vmem:[#allocation24 + $0xd0] sm:$0xff]  }
 0x846   : > { %6277 = vmatprep.subr.bf16.mxu0 %v8836_v48  ;;  %6318 = vmatprep.subr.bf16.mxu1 %v8839_v50  ;;  %v8909_v1 = vld [vmem:[#allocation24 + $0x90] sm:$0xff]   ;;  %v8910_v48 = vld [vmem:[#allocation24 + $0xc8] sm:$0xff]  }
 0x847   : > { %v8911_v50 = vld [vmem:[#allocation24 + $0x88] sm:$0xff]  }
 0x849   : > { %6278 = vmatpush2.bf16.msra.mxu0 %v8834_v40  ;;  %6319 = vmatpush2.bf16.msra.mxu1 %v8837_v38  ;;  %v8912_v40 = vld [vmem:[#allocation24 + $0xc0] sm:$0xff]  }
 0x84a   : > { %6279 = vmatprep.subr.bf16.mxu0 %v8842_v51  ;;  %6320 = vmatprep.subr.bf16.mxu1 %v8845_v49  ;;  %v8913_v38 = vld [vmem:[#allocation24 + $0x80] sm:$0xff]   ;;  %v6343_v51 = vld [vmem:[#allocation21] sm:$0xf]  ;;  %v6369_v49 = vld [vmem:[#allocation22] sm:$0xf] }
 0x84d   : > { %6280 = vmatpush2.bf16.msra.mxu0 %v8840_v52  ;;  %6321 = vmatpush2.bf16.msra.mxu1 %v8843_v53  ;;  %v6348_v52 = vrot.slane %v6343_v51, %v10604_v33 }
 0x84e   : > { %6281 = vmatprep.subr.bf16.mxu0 %v8848_v57  ;;  %6322 = vmatprep.subr.bf16.mxu1 %v8851_v58 }
 0x851   : > { %6282 = vmatpush2.bf16.msra.mxu0 %v8846_v2  ;;  %6323 = vmatpush2.bf16.msra.mxu1 %v8849_v54  ;;  %v6374_v2 = vrot.slane %v6369_v49, %v10604_v33  ;;  %v6352_v54 = vrot.slane %v6343_v51, %v10608_v6  ;;  %v6356_v33 = vrot.slane %v6343_v51, %v10606_v34 }
 0x852   : > { %6283 = vmatprep.subr.bf16.mxu0 %v8854_v59  ;;  %6324 = vmatprep.subr.bf16.mxu1 %v8857_v37 }
 0x855   : > { %6284 = vmatpush2.bf16.msra.mxu0 %v8852_v60  ;;  %6325 = vmatpush2.bf16.msra.mxu1 %v8855_v21 }
 0x856   : > { %6285 = vmatprep.subr.bf16.mxu0 %v8860_v61  ;;  %6326 = vmatprep.subr.bf16.mxu1 %v8863_v62  ;;  %v6378_v61 = vrot.slane %v6369_v49, %v10608_v6  ;;  %v6382_v6 = vrot.slane %v6369_v49, %v10606_v34 }
 0x859   : > { %6286 = vmatpush2.bf16.msra.mxu0 %v8858_v63  ;;  %6327 = vmatpush2.bf16.msra.mxu1 %v8861_v0 }
 0x85a   : > { %6287 = vmatprep.subr.bf16.mxu0 %v8866_v3  ;;  %6328 = vmatprep.subr.bf16.mxu1 %v8869_v4 }
 0x85d   : > { %6288 = vmatpush2.bf16.msra.mxu0 %v8864_v5  ;;  %6329 = vmatpush2.bf16.msra.mxu1 %v8867_v9 }
 0x85e   : > { %6289 = vmatprep.subr.bf16.mxu0 %v8872_v10  ;;  %6330 = vmatprep.subr.bf16.mxu1 %v8875_v11 }
 0x861   : > { %6290 = vmatpush2.bf16.msra.mxu0 %v8870_v12  ;;  %6331 = vmatpush2.bf16.msra.mxu1 %v8873_v13 }
 0x862   : > { %6291 = vmatprep.subr.bf16.mxu0 %v8878_v14  ;;  %6332 = vmatprep.subr.bf16.mxu1 %v8881_v16 }
 0x865   : > { %6292 = vmatpush2.bf16.msra.mxu0 %v8876_v18  ;;  %6333 = vmatpush2.bf16.msra.mxu1 %v8879_v29  ;;  %v6360_v29 = vrot.slane %v6343_v51, %v10610_v36 }
 0x866   : > { %7689 = vmatprep.subr.bf16.mxu0 %v8882_v15  ;;  %7711 = vmatprep.subr.bf16.mxu1 %v8898_v30 }
 0x868   : > { %6294 = vmatmul.mubr.bf16.vlgmr.msra.gmra.mxu0 %v10620_v8  ;;  %6335 = vmatmul.mubr.bf16.vlgmr.msra.gmra.mxu1 %v10622_v17  ;;  %v8899_v8 = vld [vmem:[#allocation24 + $0xb8] sm:$0xff]   ;;  %v8893_v17 = vld [vmem:[#allocation24 + $0x10] sm:$0xff]  }
 0x869   : > { %7690 = vmatpush3.bf16.msra.mxu0 %v8883_v19  ;;  %7712 = vmatpush3.bf16.msra.mxu1 %v8899_v8 }
 0x86a   : > { %7691 = vmatprep.subr.bf16.mxu0 %v8884_v20  ;;  %7713 = vmatprep.subr.bf16.mxu1 %v8900_v31 }
 0x86d   : > { %7692 = vmatpush3.bf16.msra.mxu0 %v8885_v22  ;;  %7714 = vmatpush3.bf16.msra.mxu1 %v8901_v32 }
 0x86e   : > { %7693 = vmatprep.subr.bf16.mxu0 %v8886_v23  ;;  %7715 = vmatprep.subr.bf16.mxu1 %v8902_v35  ;;  %v6386_v23 = vrot.slane %v6369_v49, %v10610_v36 }
 0x871   : > { %7694 = vmatpush3.bf16.msra.mxu0 %v8887_v24  ;;  %7716 = vmatpush3.bf16.msra.mxu1 %v8903_v7 }
 0x872   : > { %7695 = vmatprep.subr.bf16.mxu0 %v8888_v25  ;;  %7717 = vmatprep.subr.bf16.mxu1 %v8904_v28 }
 0x875   : > { %7696 = vmatpush3.bf16.msra.mxu0 %v8889_v27  ;;  %7718 = vmatpush3.bf16.msra.mxu1 %v8905_v43 }
 0x876   : > { %7697 = vmatprep.subr.bf16.mxu0 %v8890_v39  ;;  %7719 = vmatprep.subr.bf16.mxu1 %v8906_v44 }
 0x879   : > { %7698 = vmatpush3.bf16.msra.mxu0 %v8891_v41  ;;  %7720 = vmatpush3.bf16.msra.mxu1 %v8907_v56 }
 0x87a   : > { %7699 = vmatprep.subr.bf16.mxu0 %v8892_v46  ;;  %7721 = vmatprep.subr.bf16.mxu1 %v8908_v45 }
 0x87d   : > { %7700 = vmatpush3.bf16.msra.mxu0 %v8893_v17  ;;  %7722 = vmatpush3.bf16.msra.mxu1 %v8909_v1 }
 0x87e   : > { %7701 = vmatprep.subr.bf16.mxu0 %v8894_v47  ;;  %7723 = vmatprep.subr.bf16.mxu1 %v8910_v48 }
 0x881   : > { %7702 = vmatpush3.bf16.msra.mxu0 %v8895_v26  ;;  %7724 = vmatpush3.bf16.msra.mxu1 %v8911_v50 }
 0x882   : > { %7703 = vmatprep.subr.bf16.mxu0 %v8896_v55  ;;  %7725 = vmatprep.subr.bf16.mxu1 %v8912_v40  ;;  %v7594_v55 = vld [vmem:[#allocation25] ss:$0 sm:$0xff] }
 0x885   : > { %7704 = vmatpush3.bf16.msra.mxu0 %v8897_v42  ;;  %7726 = vmatpush3.bf16.msra.mxu1 %v8913_v38 }
 0x8e8   : > { %v6213_v53 = vpop.f32.mrf.mxu0  ;;  %v6254_v57 = vpop.f32.mrf.mxu1 }
 0x8e9   : > { %v6255_v58 = vadd.f32 %v6254_v57, %v6213_v53 }
 0x8ea   : > { %v6215_v59 = vpop.f32.mrf.mxu0  ;;  %v6256_v37 = vpop.f32.mrf.mxu1 }
 0x8eb   : > { %v6365_v60 = vmul.f32 %v6348_v52, %v6255_v58  ;;  %v6257_v21 = vadd.f32 %v6256_v37, %v6215_v59 }
 0x8ec   : > { %v6217_v62 = vpop.f32.mrf.mxu0  ;;  %v6258_v63 = vpop.f32.mrf.mxu1 }
 0x8ed   : > { %v6391_v0 = vadd.f32 %v6374_v2, %v6365_v60  ;;  %v6366_v3 = vmul.f32 %v6352_v54, %v6257_v21 }
 0x8ee   : > { %v6218_v4 = vpop.f32.mrf.mxu0  ;;  %v6259_v5 = vpop.f32.mrf.mxu1 }
 0x8ef   : > { %v6392_v9 = vadd.f32 %v6378_v61, %v6366_v3  ;;  %v6395_v10 = vmax.f32 %v6391_v0, 0.0 }
 0x8f1   : > { %v6396_v11 = vmax.f32 %v6392_v9, 0.0  ;;  %v6399_v13 = vpack.c.bf16 %v6395_v10, %v6395_v10 }
 0x8f3   : > { %v6400_v12 = vpack.c.bf16 %v6396_v11, %v6396_v11 }
 0x8f5   : > { %6698 = vmatprep.mubr.bf16.mxu0 %v6400_v12 }
 0x8f6   : > { %6699 = vmatmul.mubr.bf16.vlgmr.msra.gmra.mxu0 %v6399_v13 }
 0x928   : > { %v6295_v14 = vpop.f32.mrf.mxu0  ;;  %v6336_v16 = vpop.f32.mrf.mxu1 }
 0x929   : > { %v6337_v18 = vadd.f32 %v6336_v16, %v6295_v14 }
 0x92a   : > { %v6297_v15 = vpop.f32.mrf.mxu0  ;;  %v6338_v19 = vpop.f32.mrf.mxu1 }
 0x92b   : > { %v6367_v20 = vmul.f32 %v6356_v33, %v6337_v18  ;;  %v6339_v22 = vadd.f32 %v6338_v19, %v6297_v15 }
 0x92c   : > { %v6299_v24 = vpop.f32.mrf.mxu0  ;;  %v6340_v25 = vpop.f32.mrf.mxu1 }
 0x92d   : > { %v6393_v27 = vadd.f32 %v6382_v6, %v6367_v20  ;;  %v6368_v39 = vmul.f32 %v6360_v29, %v6339_v22 }
 0x92e   : > { %v6300_v41 = vpop.f32.mrf.mxu0  ;;  %v6341_v46 = vpop.f32.mrf.mxu1 }
 0x92f   : > { %v6394_v30 = vadd.f32 %v6386_v23, %v6368_v39  ;;  %v6397_v8 = vmax.f32 %v6393_v27, 0.0 }
 0x931   : > { %v6398_v31 = vmax.f32 %v6394_v30, 0.0  ;;  %v6401_v32 = vpack.c.bf16 %v6397_v8, %v6397_v8 }
 0x933   : > { %v6402_v17 = vpack.c.bf16 %v6398_v31, %v6398_v31 }
 0x935   : > { %6738 = vmatprep.mubr.bf16.mxu1 %v6402_v17 }
 0x936   : > { %6739 = vmatmul.mubr.bf16.vlgmr.msra.gmra.mxu1 %v6401_v32 }
 0x9b6   : > { %v7705_v34 = vpop.f32.mrf.mxu0 }
 0x9b8   : > { %v7706_v47 = vpop.f32.mrf.mxu0 }
 0x9b9   : > { %v7707_v7 = vadd.f32 %v7706_v47, %v7705_v34 }
 0x9ba   : > { %v7708_v35 = vpop.f32.mrf.mxu0 }
 0x9bb   : > { %v6701_v42 = vadd.f32 %v7707_v7, %v7594_v55 }
 0x9bc   : > { %v7709_v26 = vpop.f32.mrf.mxu0 }
 0x9f6   : > { %v7727_v36 = vpop.f32.mrf.mxu1 }
 0x9f8   : > { %v7728_v28 = vpop.f32.mrf.mxu1 }
 0x9f9   : > { %v7729_v43 = vadd.f32 %v7728_v28, %v7727_v36 }
 0x9fa   : > { %v7730_v44 = vpop.f32.mrf.mxu1 }
 0x9fb   : > { %v6741_v56 = vadd.f32 %v7729_v43, %v6701_v42 }
 0x9fc   : > { %v7731_v45 = vpop.f32.mrf.mxu1 }
 0x9fd   : > { %6746 = vst [vmem:[%s10749_s0] sm:$0xff] %v6741_v56 }
 0x9fe PF: > { %p34_p11 = scmp.ge.s32.totalorder %s9622_s26, 4   ;;  %s10750_s27 = smov %s9374_s28 }
 0x9ff   : > { %s10751_s28 = smov %s9378_s29  ;;  %s10752_s29 = smov %s9633_s22 }
 0xa00   : > { %s10753_s30 = smov %s9622_s26  ;;  %36 = sbr.rel (!%p34_p11) target bundleno = 23 (0x17), region = 202 }
 0xa05   :  { %6758 = vsyncpa [#allocation6], 1 }
 0xa06   :  { %6760 = vsyncpa [#allocation6 + $0x1], 1 }
 0xa07   :  { %6761 = vsyncpa [#allocation8], 1 }
 0xa08   :  { %6762 = vsyncpa [#allocation11], 1 }
 0xa09   :  { %6763 = vsyncpa [#allocation14], 1 }
 0xa0a   :  { %6764 = vsyncpa [#allocation20], 1 }
 0xa0b   :  { %6765 = vsyncpa [#allocation23], 1 }
 0xa0c   :  { %6766 = vsyncpa [#allocation26], 1 }

</bundles_post_ra>
